<compile_context>
chip_gen: v6e
topology: v6e:2x2x1
jax: 0.10.0
libtpu: 0.0.40
codegen_flags: <defaults>
</compile_context>

<pallas_src>
import jax
import jax.numpy as jnp
from jax.experimental import pallas as pl
from jax.experimental.pallas import tpu as pltpu

LN_EPS = 1e-5      # torch.nn.LayerNorm default eps
MSG_EPS = 1e-7     # GENConv eps
SOFTMAX_T = 1.0    # GENConv temperature (learn_t=True, init value 1.0)


def _layernorm(x, gamma, beta):
    # Independent sum(x) / sum(x*x) reductions (var = E[x^2] - mu^2) so the
    # two XLU cross-lane reduces are not serialized through a VPU pass.
    n = x.shape[-1]
    s1 = jnp.sum(x, axis=-1, keepdims=True)
    s2 = jnp.sum(x * x, axis=-1, keepdims=True)
    mu = s1 * (1.0 / n)
    var = jnp.maximum(s2 * (1.0 / n) - mu * mu, 0.0)
    return (x - mu) * jax.lax.rsqrt(var + LN_EPS) * gamma + beta


# ------------------------------ fused kernel ------------------------------- #

def _fused_resgcn_kernel(x_ref, adj_ref, enc_w_ref, enc_b_ref,
                         w1_ref, w2_ref, vh_ref, v2h_ref,
                         pool_ref, cls_w_ref, cls_b_ref, o_ref):
    # Node encoder (K=8 badly underfills the MXU -> f32).
    h = (jnp.dot(x_ref[...], enc_w_ref[...], preferred_element_type=jnp.float32)
         + enc_b_ref[...])                                   # (N, H) f32

    adj = adj_ref[...]                                       # (N, N) f32
    L = w1_ref.shape[0]
    H = h.shape[-1]

    # Fully-unrolled layer loop; all weights are already VMEM-resident.
    for l in range(L):
        vh = vh_ref[l]                                       # (3, H):  ln_g, ln_b, b2
        v2h = v2h_ref[l]                                     # (3, 2H): b1, mlp_g, mlp_b
        ln_g, ln_b, b2 = vh[0:1, :], vh[1:2, :], vh[2:3, :]
        b1, mlp_g, mlp_b = v2h[0:1, :], v2h[1:2, :], v2h[2:3, :]

        # DeepGCNLayer 'res+' pre-activation: LayerNorm -> ReLU -> dropout(=id).
        # TODO(synk): dropout(p=0.1) in training mode and ckpt_grad are not
        #             implemented (inference forward only).
        t = jnp.maximum(_layernorm(h, ln_g, ln_b), 0.0)

        # GENConv message: relu(t) + eps == t + eps (t already clamped at 0).
        msg = t + MSG_EPS
        # Per-channel stabilizer (cancels exactly in num/den); kept for
        # robustness to arbitrary LayerNorm gamma magnitudes.
        m = jnp.max(msg * SOFTMAX_T, axis=0, keepdims=True)
        e = jnp.exp(msg * SOFTMAX_T - m)                     # f32 (EUP)

        # Fused softmax aggregation: one f32 MXU pass with a 2H-wide RHS.
        rhs = jnp.concatenate([e, e * msg], axis=-1)         # (N, 2H) f32
        agg = jnp.dot(adj, rhs, preferred_element_type=jnp.float32)
        den, num = agg[:, :H], agg[:, H:]
        inv = pl.reciprocal(jnp.maximum(den, 1e-12), approx=True)   # EUP slot
        aggr = jnp.where(den > 0.0, num * inv, 0.0)

        # GENConv: out = aggr + x_dst ; MLP = Lin(H,2H) -> LN(2H) -> ReLU -> Lin(2H,H)
        # w1/w2 are pre-cast bf16 (host side); activations cast at the dot input,
        # f32 accumulation via preferred_element_type.
        out = aggr + t
        z = jnp.dot(out.astype(jnp.bfloat16), w1_ref[l],
                    preferred_element_type=jnp.float32) + b1
        z = jnp.maximum(_layernorm(z, mlp_g, mlp_b), 0.0)
        z = jnp.dot(z.astype(jnp.bfloat16), w2_ref[l],
                    preferred_element_type=jnp.float32) + b2

        # 'res+' skip connection.
        h = h + z

    # global_add_pool + classifier (tiny G/C -> f32).
    pooled = jnp.dot(pool_ref[...], h, preferred_element_type=jnp.float32)
    o_ref[...] = (jnp.dot(pooled, cls_w_ref[...],
                          preferred_element_type=jnp.float32) + cls_b_ref[...])


# ------------------------------ pallas_call glue ---------------------------- #

def res_gcn_forward(x, adj, pool, params):
    layers = params["layers"]
    G = pool.shape[0]
    C = params["cls_w"].shape[1]

    # Stacked per-layer weights; w1/w2 pre-cast to bf16 on the XLA side so the
    # kernel DMAs half the bytes and does no per-layer converts.
    w1 = jnp.stack([lp["w1"] for lp in layers]).astype(jnp.bfloat16)   # (L, H, 2H)
    w2 = jnp.stack([lp["w2"] for lp in layers]).astype(jnp.bfloat16)   # (L, 2H, H)
    # Small per-layer vectors packed into two arrays (fewer DMA descriptors).
    vecs_h = jnp.stack([jnp.concatenate([lp["ln_g"], lp["ln_b"], lp["b2"]], axis=0)
                        for lp in layers])                             # (L, 3, H)
    vecs_2h = jnp.stack([jnp.concatenate([lp["b1"], lp["mlp_ln_g"], lp["mlp_ln_b"]],
                                         axis=0)
                         for lp in layers])                            # (L, 3, 2H)

    # No grid: a single kernel invocation with every operand VMEM-resident
    # (total footprint < 2 MiB, far under the 64 MiB/TC v7x limit).
    return pl.pallas_call(
        _fused_resgcn_kernel,
        out_shape=jax.ShapeDtypeStruct((G, C), jnp.float32),
        compiler_params=pltpu.CompilerParams(
            vmem_limit_bytes=8 * 1024 * 1024,
        ),
    )(x, adj, params["enc_w"], params["enc_b"],
      w1, w2, vecs_h, vecs_2h,
      pool, params["cls_w"], params["cls_b"])


# --------------------------- parameters / reference ------------------------- #

def init_params(key, in_feat, h_feat, num_classes, num_layers):
    def lin(k, fi, fo):
        kw, kb = jax.random.split(k)
        w = jax.random.normal(kw, (fi, fo), jnp.float32) / jnp.sqrt(jnp.float32(fi))
        b = 0.01 * jax.random.normal(kb, (1, fo), jnp.float32)
        return w, b

    keys = jax.random.split(key, 2 + 2 * num_layers)
    enc_w, enc_b = lin(keys[0], in_feat, h_feat)
    cls_w, cls_b = lin(keys[1], h_feat, num_classes)
    params = {"enc_w": enc_w, "enc_b": enc_b,
              "cls_w": cls_w, "cls_b": cls_b, "layers": []}
    for i in range(num_layers):
        w1, b1 = lin(keys[2 + 2 * i], h_feat, 2 * h_feat)
        w2, b2 = lin(keys[3 + 2 * i], 2 * h_feat, h_feat)
        params["layers"].append({
            "ln_g": jnp.ones((1, h_feat), jnp.float32),
            "ln_b": jnp.zeros((1, h_feat), jnp.float32),
            "w1": w1, "b1": b1,
            "mlp_ln_g": jnp.ones((1, 2 * h_feat), jnp.float32),
            "mlp_ln_b": jnp.zeros((1, 2 * h_feat), jnp.float32),
            "w2": w2, "b2": b2,
        })
    return params


def reference_forward(x, adj, pool, params, *, bf16_mlp):
    # bf16_mlp=True mirrors the kernel's mixed precision (bf16 w1/w2 dots with
    # f32 accumulation, f32 aggregation); False is pure-f32 PyTorch semantics.
    cast = (lambda a: a.astype(jnp.bfloat16)) if bf16_mlp else (lambda a: a)
    h = x @ params["enc_w"] + params["enc_b"]
    for lp in params["layers"]:
        t = jnp.maximum(_layernorm(h, lp["ln_g"], lp["ln_b"]), 0.0)
        msg = t + MSG_EPS
        m = jnp.max(msg * SOFTMAX_T, axis=0, keepdims=True)
        e = jnp.exp(msg * SOFTMAX_T - m)
        rhs = jnp.concatenate([e, e * msg], axis=-1)
        agg = jnp.dot(adj, rhs, preferred_element_type=jnp.float32)
        H = t.shape[-1]
        den, num = agg[:, :H], agg[:, H:]
        aggr = jnp.where(den > 0.0, num / jnp.maximum(den, 1e-12), 0.0)
        z = jnp.dot(cast(aggr + t), cast(lp["w1"]),
                    preferred_element_type=jnp.float32) + lp["b1"]
        z = jnp.maximum(_layernorm(z, lp["mlp_ln_g"], lp["mlp_ln_b"]), 0.0)
        z = jnp.dot(cast(z), cast(lp["w2"]),
                    preferred_element_type=jnp.float32) + lp["b2"]
        h = h + z
    return (pool @ h) @ params["cls_w"] + params["cls_b"]


# ---------------------------------- main ------------------------------------ #

if __name__ == "__main__":
    N, IN_FEAT, H_FEAT = 32, 8, 128
    NUM_CLASSES, NUM_LAYERS, NUM_GRAPHS = 4, 6, 2

    key = jax.random.PRNGKey(0)
    kx, ke, kp = jax.random.split(key, 3)

    # Node features.
    x = jax.random.normal(kx, (N, IN_FEAT), jnp.float32)

    # Synthetic batched graph: per-graph ring edges + random intra-graph edges.
    npg = N // NUM_GRAPHS
    srcs, dsts = [], []
    for g in range(NUM_GRAPHS):
        base = g * npg
        local = jnp.arange(npg)
        srcs.append(base + local)
        dsts.append(base + (local + 1) % npg)
        kg = jax.random.fold_in(ke, g)
        srcs.append(base + jax.random.randint(jax.random.fold_in(kg, 0), (32,), 0, npg))
        dsts.append(base + jax.random.randint(jax.random.fold_in(kg, 1), (32,), 0, npg))
    src = jnp.concatenate(srcs)
    dst = jnp.concatenate(dsts)
    # Dense adjacency with edge multiplicities: A[dst, src].
    adj = jnp.zeros((N, N), jnp.float32).at[dst, src].add(1.0)

    # global_add_pool as a one-hot pooling matrix P[graph, node].
    batch = jnp.repeat(jnp.arange(NUM_GRAPHS), npg)
    pool = (batch[None, :] == jnp.arange(NUM_GRAPHS)[:, None]).astype(jnp.float32)

    params = init_params(kp, IN_FEAT, H_FEAT, NUM_CLASSES, NUM_LAYERS)

    logits = jax.jit(res_gcn_forward)(x, adj, pool, params)
    logits = jax.block_until_ready(logits)

    assert logits.shape == (NUM_GRAPHS, NUM_CLASSES)
    assert bool(jnp.all(jnp.isfinite(logits)))

    # Primary check: reference with the same mixed precision as the kernel.
    ref_matched = reference_forward(x, adj, pool, params, bf16_mlp=True)
    assert bool(jnp.allclose(logits, ref_matched, atol=2e-2, rtol=2e-2)), \
        "mismatch vs mixed-precision reference"

    # Loose sanity bound vs the pure-f32 (PyTorch-equivalent) reference: only
    # the documented bf16 w1/w2 matmul tradeoff separates the two.
    ref_f32 = reference_forward(x, adj, pool, params, bf16_mlp=False)
    assert bool(jnp.allclose(logits, ref_f32, atol=0.5, rtol=0.1)), \
        "mismatch vs f32 reference beyond bf16 tolerance"

    print("KERNEL_OK")
</pallas_src>

<mosaic_0001>
module attributes {stable_mosaic.version = 11 : i64} {
  func.func @_fused_resgcn_kernel(%arg0: memref<32x8xf32, #tpu.memory_space<vmem>>, %arg1: memref<32x32xf32, #tpu.memory_space<vmem>>, %arg2: memref<8x128xf32, #tpu.memory_space<vmem>>, %arg3: memref<1x128xf32, #tpu.memory_space<vmem>>, %arg4: memref<6x128x256xbf16, #tpu.memory_space<vmem>>, %arg5: memref<6x256x128xbf16, #tpu.memory_space<vmem>>, %arg6: memref<6x3x128xf32, #tpu.memory_space<vmem>>, %arg7: memref<6x3x256xf32, #tpu.memory_space<vmem>>, %arg8: memref<2x32xf32, #tpu.memory_space<vmem>>, %arg9: memref<128x4xf32, #tpu.memory_space<vmem>>, %arg10: memref<1x4xf32, #tpu.memory_space<vmem>>, %arg11: memref<2x4xf32, #tpu.memory_space<vmem>>) attributes {dimension_semantics = [], scalar_prefetch = 0 : i64, scratch_operands = 0 : i64, tpu.core_type = #tpu.core_type<tc>} {
    %c0 = arith.constant 0 : index
    %c0_0 = arith.constant 0 : index
    %0 = vector.load %arg0[%c0, %c0_0] : memref<32x8xf32, #tpu.memory_space<vmem>>, vector<32x8xf32>
    %c0_1 = arith.constant 0 : index
    %c0_2 = arith.constant 0 : index
    %1 = vector.load %arg2[%c0_1, %c0_2] : memref<8x128xf32, #tpu.memory_space<vmem>>, vector<8x128xf32>
    %cst = arith.constant dense<0.000000e+00> : vector<32x128xf32>
    %2 = tpu.matmul %0, %1, %cst {dimension_numbers = #tpu.dot_dimension_numbers<[1], [0], [0], [1], [0, 0, 1, 1], [], []>} : vector<32x8xf32>, vector<8x128xf32>, vector<32x128xf32> -> vector<32x128xf32>
    %c0_3 = arith.constant 0 : index
    %c0_4 = arith.constant 0 : index
    %3 = vector.load %arg3[%c0_3, %c0_4] : memref<1x128xf32, #tpu.memory_space<vmem>>, vector<1x128xf32>
    %4 = vector.broadcast %3 : vector<1x128xf32> to vector<32x128xf32>
    %5 = arith.addf %2, %4 : vector<32x128xf32>
    %c0_5 = arith.constant 0 : index
    %c0_6 = arith.constant 0 : index
    %6 = vector.load %arg1[%c0_5, %c0_6] : memref<32x32xf32, #tpu.memory_space<vmem>>, vector<32x32xf32>
    %c0_7 = arith.constant 0 : index
    %c0_8 = arith.constant 0 : index
    %c0_9 = arith.constant 0 : index
    %7 = vector.load %arg6[%c0_7, %c0_8, %c0_9] : memref<6x3x128xf32, #tpu.memory_space<vmem>>, vector<1x3x128xf32>
    %8 = vector.shape_cast %7 : vector<1x3x128xf32> to vector<3x128xf32>
    %c0_10 = arith.constant 0 : index
    %c0_11 = arith.constant 0 : index
    %c0_12 = arith.constant 0 : index
    %9 = vector.load %arg7[%c0_10, %c0_11, %c0_12] : memref<6x3x256xf32, #tpu.memory_space<vmem>>, vector<1x3x256xf32>
    %10 = vector.shape_cast %9 : vector<1x3x256xf32> to vector<3x256xf32>
    %11 = vector.extract_strided_slice %8 {offsets = [0, 0], sizes = [1, 128], strides = [1, 1]} : vector<3x128xf32> to vector<1x128xf32>
    %12 = vector.extract_strided_slice %8 {offsets = [1, 0], sizes = [1, 128], strides = [1, 1]} : vector<3x128xf32> to vector<1x128xf32>
    %13 = vector.extract_strided_slice %8 {offsets = [2, 0], sizes = [1, 128], strides = [1, 1]} : vector<3x128xf32> to vector<1x128xf32>
    %14 = vector.extract_strided_slice %10 {offsets = [0, 0], sizes = [1, 256], strides = [1, 1]} : vector<3x256xf32> to vector<1x256xf32>
    %15 = vector.extract_strided_slice %10 {offsets = [1, 0], sizes = [1, 256], strides = [1, 1]} : vector<3x256xf32> to vector<1x256xf32>
    %16 = vector.extract_strided_slice %10 {offsets = [2, 0], sizes = [1, 256], strides = [1, 1]} : vector<3x256xf32> to vector<1x256xf32>
    %cst_13 = arith.constant dense<0.000000e+00> : vector<32xf32>
    %17 = vector.multi_reduction <add>, %5, %cst_13 [1] : vector<32x128xf32> to vector<32xf32>
    %18 = vector.shape_cast %17 : vector<32xf32> to vector<32x1xf32>
    %19 = arith.mulf %5, %5 : vector<32x128xf32>
    %cst_14 = arith.constant dense<0.000000e+00> : vector<32xf32>
    %20 = vector.multi_reduction <add>, %19, %cst_14 [1] : vector<32x128xf32> to vector<32xf32>
    %21 = vector.shape_cast %20 : vector<32xf32> to vector<32x1xf32>
    %cst_15 = arith.constant 7.812500e-03 : f32
    %22 = vector.broadcast %cst_15 : f32 to vector<32x1xf32>
    %23 = arith.mulf %18, %22 : vector<32x1xf32>
    %cst_16 = arith.constant 7.812500e-03 : f32
    %24 = vector.broadcast %cst_16 : f32 to vector<32x1xf32>
    %25 = arith.mulf %21, %24 : vector<32x1xf32>
    %26 = arith.mulf %23, %23 : vector<32x1xf32>
    %27 = arith.subf %25, %26 : vector<32x1xf32>
    %cst_17 = arith.constant 0.000000e+00 : f32
    %28 = vector.broadcast %cst_17 : f32 to vector<32x1xf32>
    %29 = arith.maximumf %27, %28 : vector<32x1xf32>
    %30 = vector.broadcast %23 : vector<32x1xf32> to vector<32x128xf32>
    %31 = arith.subf %5, %30 : vector<32x128xf32>
    %cst_18 = arith.constant 9.99999974E-6 : f32
    %32 = vector.broadcast %cst_18 : f32 to vector<32x1xf32>
    %33 = arith.addf %29, %32 : vector<32x1xf32>
    %34 = math.rsqrt %33 : vector<32x1xf32>
    %35 = vector.broadcast %34 : vector<32x1xf32> to vector<32x128xf32>
    %36 = arith.mulf %31, %35 : vector<32x128xf32>
    %37 = vector.broadcast %11 : vector<1x128xf32> to vector<32x128xf32>
    %38 = arith.mulf %36, %37 : vector<32x128xf32>
    %39 = vector.broadcast %12 : vector<1x128xf32> to vector<32x128xf32>
    %40 = arith.addf %38, %39 : vector<32x128xf32>
    %cst_19 = arith.constant 0.000000e+00 : f32
    %41 = vector.broadcast %cst_19 : f32 to vector<32x128xf32>
    %42 = arith.maximumf %40, %41 : vector<32x128xf32>
    %cst_20 = arith.constant 1.000000e-07 : f32
    %43 = vector.broadcast %cst_20 : f32 to vector<32x128xf32>
    %44 = arith.addf %42, %43 : vector<32x128xf32>
    %cst_21 = arith.constant 1.000000e+00 : f32
    %45 = vector.broadcast %cst_21 : f32 to vector<32x128xf32>
    %46 = arith.mulf %44, %45 : vector<32x128xf32>
    %cst_22 = arith.constant dense<0xFF800000> : vector<128xf32>
    %47 = vector.multi_reduction <maximumf>, %46, %cst_22 [0] : vector<32x128xf32> to vector<128xf32>
    %48 = vector.shape_cast %47 : vector<128xf32> to vector<1x128xf32>
    %cst_23 = arith.constant 1.000000e+00 : f32
    %49 = vector.broadcast %cst_23 : f32 to vector<32x128xf32>
    %50 = arith.mulf %44, %49 : vector<32x128xf32>
    %51 = vector.broadcast %48 : vector<1x128xf32> to vector<32x128xf32>
    %52 = arith.subf %50, %51 : vector<32x128xf32>
    %53 = math.exp %52 : vector<32x128xf32>
    %54 = arith.mulf %53, %44 : vector<32x128xf32>
    %55 = tpu.concatenate %53, %54 in 1 : vector<32x128xf32>, vector<32x128xf32> -> vector<32x256xf32>
    %cst_24 = arith.constant dense<0.000000e+00> : vector<32x256xf32>
    %56 = tpu.matmul %6, %55, %cst_24 {dimension_numbers = #tpu.dot_dimension_numbers<[1], [0], [0], [1], [0, 0, 1, 1], [], []>} : vector<32x32xf32>, vector<32x256xf32>, vector<32x256xf32> -> vector<32x256xf32>
    %57 = vector.extract_strided_slice %56 {offsets = [0, 0], sizes = [32, 128], strides = [1, 1]} : vector<32x256xf32> to vector<32x128xf32>
    %58 = vector.extract_strided_slice %56 {offsets = [0, 128], sizes = [32, 128], strides = [1, 1]} : vector<32x256xf32> to vector<32x128xf32>
    %cst_25 = arith.constant 9.99999996E-13 : f32
    %59 = vector.broadcast %cst_25 : f32 to vector<32x128xf32>
    %60 = arith.maximumf %57, %59 : vector<32x128xf32>
    %61 = tpu.reciprocal %60 {approx = true} : vector<32x128xf32> -> vector<32x128xf32>
    %cst_26 = arith.constant 0.000000e+00 : f32
    %62 = vector.broadcast %cst_26 : f32 to vector<32x128xf32>
    %63 = arith.cmpf ogt, %57, %62 : vector<32x128xf32>
    %64 = arith.mulf %58, %61 : vector<32x128xf32>
    %cst_27 = arith.constant 0.000000e+00 : f32
    %65 = vector.broadcast %cst_27 : f32 to vector<32x128xf32>
    %66 = arith.select %63, %64, %65 : vector<32x128xi1>, vector<32x128xf32>
    %67 = arith.addf %66, %42 : vector<32x128xf32>
    %68 = arith.truncf %67 : vector<32x128xf32> to vector<32x128xbf16>
    %c0_28 = arith.constant 0 : index
    %c0_29 = arith.constant 0 : index
    %c0_30 = arith.constant 0 : index
    %69 = vector.load %arg4[%c0_28, %c0_29, %c0_30] : memref<6x128x256xbf16, #tpu.memory_space<vmem>>, vector<1x128x256xbf16>
    %70 = vector.shape_cast %69 : vector<1x128x256xbf16> to vector<128x256xbf16>
    %cst_31 = arith.constant dense<0.000000e+00> : vector<32x256xf32>
    %71 = tpu.matmul %68, %70, %cst_31 {dimension_numbers = #tpu.dot_dimension_numbers<[1], [0], [0], [1], [0, 0, 1, 1], [], []>} : vector<32x128xbf16>, vector<128x256xbf16>, vector<32x256xf32> -> vector<32x256xf32>
    %72 = vector.broadcast %14 : vector<1x256xf32> to vector<32x256xf32>
    %73 = arith.addf %71, %72 : vector<32x256xf32>
    %cst_32 = arith.constant dense<0.000000e+00> : vector<32xf32>
    %74 = vector.multi_reduction <add>, %73, %cst_32 [1] : vector<32x256xf32> to vector<32xf32>
    %75 = vector.shape_cast %74 : vector<32xf32> to vector<32x1xf32>
    %76 = arith.mulf %73, %73 : vector<32x256xf32>
    %cst_33 = arith.constant dense<0.000000e+00> : vector<32xf32>
    %77 = vector.multi_reduction <add>, %76, %cst_33 [1] : vector<32x256xf32> to vector<32xf32>
    %78 = vector.shape_cast %77 : vector<32xf32> to vector<32x1xf32>
    %cst_34 = arith.constant 3.906250e-03 : f32
    %79 = vector.broadcast %cst_34 : f32 to vector<32x1xf32>
    %80 = arith.mulf %75, %79 : vector<32x1xf32>
    %cst_35 = arith.constant 3.906250e-03 : f32
    %81 = vector.broadcast %cst_35 : f32 to vector<32x1xf32>
    %82 = arith.mulf %78, %81 : vector<32x1xf32>
    %83 = arith.mulf %80, %80 : vector<32x1xf32>
    %84 = arith.subf %82, %83 : vector<32x1xf32>
    %cst_36 = arith.constant 0.000000e+00 : f32
    %85 = vector.broadcast %cst_36 : f32 to vector<32x1xf32>
    %86 = arith.maximumf %84, %85 : vector<32x1xf32>
    %87 = vector.broadcast %80 : vector<32x1xf32> to vector<32x256xf32>
    %88 = arith.subf %73, %87 : vector<32x256xf32>
    %cst_37 = arith.constant 9.99999974E-6 : f32
    %89 = vector.broadcast %cst_37 : f32 to vector<32x1xf32>
    %90 = arith.addf %86, %89 : vector<32x1xf32>
    %91 = math.rsqrt %90 : vector<32x1xf32>
    %92 = vector.broadcast %91 : vector<32x1xf32> to vector<32x256xf32>
    %93 = arith.mulf %88, %92 : vector<32x256xf32>
    %94 = vector.broadcast %15 : vector<1x256xf32> to vector<32x256xf32>
    %95 = arith.mulf %93, %94 : vector<32x256xf32>
    %96 = vector.broadcast %16 : vector<1x256xf32> to vector<32x256xf32>
    %97 = arith.addf %95, %96 : vector<32x256xf32>
    %cst_38 = arith.constant 0.000000e+00 : f32
    %98 = vector.broadcast %cst_38 : f32 to vector<32x256xf32>
    %99 = arith.maximumf %97, %98 : vector<32x256xf32>
    %100 = arith.truncf %99 : vector<32x256xf32> to vector<32x256xbf16>
    %c0_39 = arith.constant 0 : index
    %c0_40 = arith.constant 0 : index
    %c0_41 = arith.constant 0 : index
    %101 = vector.load %arg5[%c0_39, %c0_40, %c0_41] : memref<6x256x128xbf16, #tpu.memory_space<vmem>>, vector<1x256x128xbf16>
    %102 = vector.shape_cast %101 : vector<1x256x128xbf16> to vector<256x128xbf16>
    %cst_42 = arith.constant dense<0.000000e+00> : vector<32x128xf32>
    %103 = tpu.matmul %100, %102, %cst_42 {dimension_numbers = #tpu.dot_dimension_numbers<[1], [0], [0], [1], [0, 0, 1, 1], [], []>} : vector<32x256xbf16>, vector<256x128xbf16>, vector<32x128xf32> -> vector<32x128xf32>
    %104 = vector.broadcast %13 : vector<1x128xf32> to vector<32x128xf32>
    %105 = arith.addf %103, %104 : vector<32x128xf32>
    %106 = arith.addf %5, %105 : vector<32x128xf32>
    %c1 = arith.constant 1 : index
    %c0_43 = arith.constant 0 : index
    %c0_44 = arith.constant 0 : index
    %107 = vector.load %arg6[%c1, %c0_43, %c0_44] : memref<6x3x128xf32, #tpu.memory_space<vmem>>, vector<1x3x128xf32>
    %108 = vector.shape_cast %107 : vector<1x3x128xf32> to vector<3x128xf32>
    %c1_45 = arith.constant 1 : index
    %c0_46 = arith.constant 0 : index
    %c0_47 = arith.constant 0 : index
    %109 = vector.load %arg7[%c1_45, %c0_46, %c0_47] : memref<6x3x256xf32, #tpu.memory_space<vmem>>, vector<1x3x256xf32>
    %110 = vector.shape_cast %109 : vector<1x3x256xf32> to vector<3x256xf32>
    %111 = vector.extract_strided_slice %108 {offsets = [0, 0], sizes = [1, 128], strides = [1, 1]} : vector<3x128xf32> to vector<1x128xf32>
    %112 = vector.extract_strided_slice %108 {offsets = [1, 0], sizes = [1, 128], strides = [1, 1]} : vector<3x128xf32> to vector<1x128xf32>
    %113 = vector.extract_strided_slice %108 {offsets = [2, 0], sizes = [1, 128], strides = [1, 1]} : vector<3x128xf32> to vector<1x128xf32>
    %114 = vector.extract_strided_slice %110 {offsets = [0, 0], sizes = [1, 256], strides = [1, 1]} : vector<3x256xf32> to vector<1x256xf32>
    %115 = vector.extract_strided_slice %110 {offsets = [1, 0], sizes = [1, 256], strides = [1, 1]} : vector<3x256xf32> to vector<1x256xf32>
    %116 = vector.extract_strided_slice %110 {offsets = [2, 0], sizes = [1, 256], strides = [1, 1]} : vector<3x256xf32> to vector<1x256xf32>
    %cst_48 = arith.constant dense<0.000000e+00> : vector<32xf32>
    %117 = vector.multi_reduction <add>, %106, %cst_48 [1] : vector<32x128xf32> to vector<32xf32>
    %118 = vector.shape_cast %117 : vector<32xf32> to vector<32x1xf32>
    %119 = arith.mulf %106, %106 : vector<32x128xf32>
    %cst_49 = arith.constant dense<0.000000e+00> : vector<32xf32>
    %120 = vector.multi_reduction <add>, %119, %cst_49 [1] : vector<32x128xf32> to vector<32xf32>
    %121 = vector.shape_cast %120 : vector<32xf32> to vector<32x1xf32>
    %cst_50 = arith.constant 7.812500e-03 : f32
    %122 = vector.broadcast %cst_50 : f32 to vector<32x1xf32>
    %123 = arith.mulf %118, %122 : vector<32x1xf32>
    %cst_51 = arith.constant 7.812500e-03 : f32
    %124 = vector.broadcast %cst_51 : f32 to vector<32x1xf32>
    %125 = arith.mulf %121, %124 : vector<32x1xf32>
    %126 = arith.mulf %123, %123 : vector<32x1xf32>
    %127 = arith.subf %125, %126 : vector<32x1xf32>
    %cst_52 = arith.constant 0.000000e+00 : f32
    %128 = vector.broadcast %cst_52 : f32 to vector<32x1xf32>
    %129 = arith.maximumf %127, %128 : vector<32x1xf32>
    %130 = vector.broadcast %123 : vector<32x1xf32> to vector<32x128xf32>
    %131 = arith.subf %106, %130 : vector<32x128xf32>
    %cst_53 = arith.constant 9.99999974E-6 : f32
    %132 = vector.broadcast %cst_53 : f32 to vector<32x1xf32>
    %133 = arith.addf %129, %132 : vector<32x1xf32>
    %134 = math.rsqrt %133 : vector<32x1xf32>
    %135 = vector.broadcast %134 : vector<32x1xf32> to vector<32x128xf32>
    %136 = arith.mulf %131, %135 : vector<32x128xf32>
    %137 = vector.broadcast %111 : vector<1x128xf32> to vector<32x128xf32>
    %138 = arith.mulf %136, %137 : vector<32x128xf32>
    %139 = vector.broadcast %112 : vector<1x128xf32> to vector<32x128xf32>
    %140 = arith.addf %138, %139 : vector<32x128xf32>
    %cst_54 = arith.constant 0.000000e+00 : f32
    %141 = vector.broadcast %cst_54 : f32 to vector<32x128xf32>
    %142 = arith.maximumf %140, %141 : vector<32x128xf32>
    %cst_55 = arith.constant 1.000000e-07 : f32
    %143 = vector.broadcast %cst_55 : f32 to vector<32x128xf32>
    %144 = arith.addf %142, %143 : vector<32x128xf32>
    %cst_56 = arith.constant 1.000000e+00 : f32
    %145 = vector.broadcast %cst_56 : f32 to vector<32x128xf32>
    %146 = arith.mulf %144, %145 : vector<32x128xf32>
    %cst_57 = arith.constant dense<0xFF800000> : vector<128xf32>
    %147 = vector.multi_reduction <maximumf>, %146, %cst_57 [0] : vector<32x128xf32> to vector<128xf32>
    %148 = vector.shape_cast %147 : vector<128xf32> to vector<1x128xf32>
    %cst_58 = arith.constant 1.000000e+00 : f32
    %149 = vector.broadcast %cst_58 : f32 to vector<32x128xf32>
    %150 = arith.mulf %144, %149 : vector<32x128xf32>
    %151 = vector.broadcast %148 : vector<1x128xf32> to vector<32x128xf32>
    %152 = arith.subf %150, %151 : vector<32x128xf32>
    %153 = math.exp %152 : vector<32x128xf32>
    %154 = arith.mulf %153, %144 : vector<32x128xf32>
    %155 = tpu.concatenate %153, %154 in 1 : vector<32x128xf32>, vector<32x128xf32> -> vector<32x256xf32>
    %cst_59 = arith.constant dense<0.000000e+00> : vector<32x256xf32>
    %156 = tpu.matmul %6, %155, %cst_59 {dimension_numbers = #tpu.dot_dimension_numbers<[1], [0], [0], [1], [0, 0, 1, 1], [], []>} : vector<32x32xf32>, vector<32x256xf32>, vector<32x256xf32> -> vector<32x256xf32>
    %157 = vector.extract_strided_slice %156 {offsets = [0, 0], sizes = [32, 128], strides = [1, 1]} : vector<32x256xf32> to vector<32x128xf32>
    %158 = vector.extract_strided_slice %156 {offsets = [0, 128], sizes = [32, 128], strides = [1, 1]} : vector<32x256xf32> to vector<32x128xf32>
    %cst_60 = arith.constant 9.99999996E-13 : f32
    %159 = vector.broadcast %cst_60 : f32 to vector<32x128xf32>
    %160 = arith.maximumf %157, %159 : vector<32x128xf32>
    %161 = tpu.reciprocal %160 {approx = true} : vector<32x128xf32> -> vector<32x128xf32>
    %cst_61 = arith.constant 0.000000e+00 : f32
    %162 = vector.broadcast %cst_61 : f32 to vector<32x128xf32>
    %163 = arith.cmpf ogt, %157, %162 : vector<32x128xf32>
    %164 = arith.mulf %158, %161 : vector<32x128xf32>
    %cst_62 = arith.constant 0.000000e+00 : f32
    %165 = vector.broadcast %cst_62 : f32 to vector<32x128xf32>
    %166 = arith.select %163, %164, %165 : vector<32x128xi1>, vector<32x128xf32>
    %167 = arith.addf %166, %142 : vector<32x128xf32>
    %168 = arith.truncf %167 : vector<32x128xf32> to vector<32x128xbf16>
    %c1_63 = arith.constant 1 : index
    %c0_64 = arith.constant 0 : index
    %c0_65 = arith.constant 0 : index
    %169 = vector.load %arg4[%c1_63, %c0_64, %c0_65] : memref<6x128x256xbf16, #tpu.memory_space<vmem>>, vector<1x128x256xbf16>
    %170 = vector.shape_cast %169 : vector<1x128x256xbf16> to vector<128x256xbf16>
    %cst_66 = arith.constant dense<0.000000e+00> : vector<32x256xf32>
    %171 = tpu.matmul %168, %170, %cst_66 {dimension_numbers = #tpu.dot_dimension_numbers<[1], [0], [0], [1], [0, 0, 1, 1], [], []>} : vector<32x128xbf16>, vector<128x256xbf16>, vector<32x256xf32> -> vector<32x256xf32>
    %172 = vector.broadcast %114 : vector<1x256xf32> to vector<32x256xf32>
    %173 = arith.addf %171, %172 : vector<32x256xf32>
    %cst_67 = arith.constant dense<0.000000e+00> : vector<32xf32>
    %174 = vector.multi_reduction <add>, %173, %cst_67 [1] : vector<32x256xf32> to vector<32xf32>
    %175 = vector.shape_cast %174 : vector<32xf32> to vector<32x1xf32>
    %176 = arith.mulf %173, %173 : vector<32x256xf32>
    %cst_68 = arith.constant dense<0.000000e+00> : vector<32xf32>
    %177 = vector.multi_reduction <add>, %176, %cst_68 [1] : vector<32x256xf32> to vector<32xf32>
    %178 = vector.shape_cast %177 : vector<32xf32> to vector<32x1xf32>
    %cst_69 = arith.constant 3.906250e-03 : f32
    %179 = vector.broadcast %cst_69 : f32 to vector<32x1xf32>
    %180 = arith.mulf %175, %179 : vector<32x1xf32>
    %cst_70 = arith.constant 3.906250e-03 : f32
    %181 = vector.broadcast %cst_70 : f32 to vector<32x1xf32>
    %182 = arith.mulf %178, %181 : vector<32x1xf32>
    %183 = arith.mulf %180, %180 : vector<32x1xf32>
    %184 = arith.subf %182, %183 : vector<32x1xf32>
    %cst_71 = arith.constant 0.000000e+00 : f32
    %185 = vector.broadcast %cst_71 : f32 to vector<32x1xf32>
    %186 = arith.maximumf %184, %185 : vector<32x1xf32>
    %187 = vector.broadcast %180 : vector<32x1xf32> to vector<32x256xf32>
    %188 = arith.subf %173, %187 : vector<32x256xf32>
    %cst_72 = arith.constant 9.99999974E-6 : f32
    %189 = vector.broadcast %cst_72 : f32 to vector<32x1xf32>
    %190 = arith.addf %186, %189 : vector<32x1xf32>
    %191 = math.rsqrt %190 : vector<32x1xf32>
    %192 = vector.broadcast %191 : vector<32x1xf32> to vector<32x256xf32>
    %193 = arith.mulf %188, %192 : vector<32x256xf32>
    %194 = vector.broadcast %115 : vector<1x256xf32> to vector<32x256xf32>
    %195 = arith.mulf %193, %194 : vector<32x256xf32>
    %196 = vector.broadcast %116 : vector<1x256xf32> to vector<32x256xf32>
    %197 = arith.addf %195, %196 : vector<32x256xf32>
    %cst_73 = arith.constant 0.000000e+00 : f32
    %198 = vector.broadcast %cst_73 : f32 to vector<32x256xf32>
    %199 = arith.maximumf %197, %198 : vector<32x256xf32>
    %200 = arith.truncf %199 : vector<32x256xf32> to vector<32x256xbf16>
    %c1_74 = arith.constant 1 : index
    %c0_75 = arith.constant 0 : index
    %c0_76 = arith.constant 0 : index
    %201 = vector.load %arg5[%c1_74, %c0_75, %c0_76] : memref<6x256x128xbf16, #tpu.memory_space<vmem>>, vector<1x256x128xbf16>
    %202 = vector.shape_cast %201 : vector<1x256x128xbf16> to vector<256x128xbf16>
    %cst_77 = arith.constant dense<0.000000e+00> : vector<32x128xf32>
    %203 = tpu.matmul %200, %202, %cst_77 {dimension_numbers = #tpu.dot_dimension_numbers<[1], [0], [0], [1], [0, 0, 1, 1], [], []>} : vector<32x256xbf16>, vector<256x128xbf16>, vector<32x128xf32> -> vector<32x128xf32>
    %204 = vector.broadcast %113 : vector<1x128xf32> to vector<32x128xf32>
    %205 = arith.addf %203, %204 : vector<32x128xf32>
    %206 = arith.addf %106, %205 : vector<32x128xf32>
    %c2 = arith.constant 2 : index
    %c0_78 = arith.constant 0 : index
    %c0_79 = arith.constant 0 : index
    %207 = vector.load %arg6[%c2, %c0_78, %c0_79] : memref<6x3x128xf32, #tpu.memory_space<vmem>>, vector<1x3x128xf32>
    %208 = vector.shape_cast %207 : vector<1x3x128xf32> to vector<3x128xf32>
    %c2_80 = arith.constant 2 : index
    %c0_81 = arith.constant 0 : index
    %c0_82 = arith.constant 0 : index
    %209 = vector.load %arg7[%c2_80, %c0_81, %c0_82] : memref<6x3x256xf32, #tpu.memory_space<vmem>>, vector<1x3x256xf32>
    %210 = vector.shape_cast %209 : vector<1x3x256xf32> to vector<3x256xf32>
    %211 = vector.extract_strided_slice %208 {offsets = [0, 0], sizes = [1, 128], strides = [1, 1]} : vector<3x128xf32> to vector<1x128xf32>
    %212 = vector.extract_strided_slice %208 {offsets = [1, 0], sizes = [1, 128], strides = [1, 1]} : vector<3x128xf32> to vector<1x128xf32>
    %213 = vector.extract_strided_slice %208 {offsets = [2, 0], sizes = [1, 128], strides = [1, 1]} : vector<3x128xf32> to vector<1x128xf32>
    %214 = vector.extract_strided_slice %210 {offsets = [0, 0], sizes = [1, 256], strides = [1, 1]} : vector<3x256xf32> to vector<1x256xf32>
    %215 = vector.extract_strided_slice %210 {offsets = [1, 0], sizes = [1, 256], strides = [1, 1]} : vector<3x256xf32> to vector<1x256xf32>
    %216 = vector.extract_strided_slice %210 {offsets = [2, 0], sizes = [1, 256], strides = [1, 1]} : vector<3x256xf32> to vector<1x256xf32>
    %cst_83 = arith.constant dense<0.000000e+00> : vector<32xf32>
    %217 = vector.multi_reduction <add>, %206, %cst_83 [1] : vector<32x128xf32> to vector<32xf32>
    %218 = vector.shape_cast %217 : vector<32xf32> to vector<32x1xf32>
    %219 = arith.mulf %206, %206 : vector<32x128xf32>
    %cst_84 = arith.constant dense<0.000000e+00> : vector<32xf32>
    %220 = vector.multi_reduction <add>, %219, %cst_84 [1] : vector<32x128xf32> to vector<32xf32>
    %221 = vector.shape_cast %220 : vector<32xf32> to vector<32x1xf32>
    %cst_85 = arith.constant 7.812500e-03 : f32
    %222 = vector.broadcast %cst_85 : f32 to vector<32x1xf32>
    %223 = arith.mulf %218, %222 : vector<32x1xf32>
    %cst_86 = arith.constant 7.812500e-03 : f32
    %224 = vector.broadcast %cst_86 : f32 to vector<32x1xf32>
    %225 = arith.mulf %221, %224 : vector<32x1xf32>
    %226 = arith.mulf %223, %223 : vector<32x1xf32>
    %227 = arith.subf %225, %226 : vector<32x1xf32>
    %cst_87 = arith.constant 0.000000e+00 : f32
    %228 = vector.broadcast %cst_87 : f32 to vector<32x1xf32>
    %229 = arith.maximumf %227, %228 : vector<32x1xf32>
    %230 = vector.broadcast %223 : vector<32x1xf32> to vector<32x128xf32>
    %231 = arith.subf %206, %230 : vector<32x128xf32>
    %cst_88 = arith.constant 9.99999974E-6 : f32
    %232 = vector.broadcast %cst_88 : f32 to vector<32x1xf32>
    %233 = arith.addf %229, %232 : vector<32x1xf32>
    %234 = math.rsqrt %233 : vector<32x1xf32>
    %235 = vector.broadcast %234 : vector<32x1xf32> to vector<32x128xf32>
    %236 = arith.mulf %231, %235 : vector<32x128xf32>
    %237 = vector.broadcast %211 : vector<1x128xf32> to vector<32x128xf32>
    %238 = arith.mulf %236, %237 : vector<32x128xf32>
    %239 = vector.broadcast %212 : vector<1x128xf32> to vector<32x128xf32>
    %240 = arith.addf %238, %239 : vector<32x128xf32>
    %cst_89 = arith.constant 0.000000e+00 : f32
    %241 = vector.broadcast %cst_89 : f32 to vector<32x128xf32>
    %242 = arith.maximumf %240, %241 : vector<32x128xf32>
    %cst_90 = arith.constant 1.000000e-07 : f32
    %243 = vector.broadcast %cst_90 : f32 to vector<32x128xf32>
    %244 = arith.addf %242, %243 : vector<32x128xf32>
    %cst_91 = arith.constant 1.000000e+00 : f32
    %245 = vector.broadcast %cst_91 : f32 to vector<32x128xf32>
    %246 = arith.mulf %244, %245 : vector<32x128xf32>
    %cst_92 = arith.constant dense<0xFF800000> : vector<128xf32>
    %247 = vector.multi_reduction <maximumf>, %246, %cst_92 [0] : vector<32x128xf32> to vector<128xf32>
    %248 = vector.shape_cast %247 : vector<128xf32> to vector<1x128xf32>
    %cst_93 = arith.constant 1.000000e+00 : f32
    %249 = vector.broadcast %cst_93 : f32 to vector<32x128xf32>
    %250 = arith.mulf %244, %249 : vector<32x128xf32>
    %251 = vector.broadcast %248 : vector<1x128xf32> to vector<32x128xf32>
    %252 = arith.subf %250, %251 : vector<32x128xf32>
    %253 = math.exp %252 : vector<32x128xf32>
    %254 = arith.mulf %253, %244 : vector<32x128xf32>
    %255 = tpu.concatenate %253, %254 in 1 : vector<32x128xf32>, vector<32x128xf32> -> vector<32x256xf32>
    %cst_94 = arith.constant dense<0.000000e+00> : vector<32x256xf32>
    %256 = tpu.matmul %6, %255, %cst_94 {dimension_numbers = #tpu.dot_dimension_numbers<[1], [0], [0], [1], [0, 0, 1, 1], [], []>} : vector<32x32xf32>, vector<32x256xf32>, vector<32x256xf32> -> vector<32x256xf32>
    %257 = vector.extract_strided_slice %256 {offsets = [0, 0], sizes = [32, 128], strides = [1, 1]} : vector<32x256xf32> to vector<32x128xf32>
    %258 = vector.extract_strided_slice %256 {offsets = [0, 128], sizes = [32, 128], strides = [1, 1]} : vector<32x256xf32> to vector<32x128xf32>
    %cst_95 = arith.constant 9.99999996E-13 : f32
    %259 = vector.broadcast %cst_95 : f32 to vector<32x128xf32>
    %260 = arith.maximumf %257, %259 : vector<32x128xf32>
    %261 = tpu.reciprocal %260 {approx = true} : vector<32x128xf32> -> vector<32x128xf32>
    %cst_96 = arith.constant 0.000000e+00 : f32
    %262 = vector.broadcast %cst_96 : f32 to vector<32x128xf32>
    %263 = arith.cmpf ogt, %257, %262 : vector<32x128xf32>
    %264 = arith.mulf %258, %261 : vector<32x128xf32>
    %cst_97 = arith.constant 0.000000e+00 : f32
    %265 = vector.broadcast %cst_97 : f32 to vector<32x128xf32>
    %266 = arith.select %263, %264, %265 : vector<32x128xi1>, vector<32x128xf32>
    %267 = arith.addf %266, %242 : vector<32x128xf32>
    %268 = arith.truncf %267 : vector<32x128xf32> to vector<32x128xbf16>
    %c2_98 = arith.constant 2 : index
    %c0_99 = arith.constant 0 : index
    %c0_100 = arith.constant 0 : index
    %269 = vector.load %arg4[%c2_98, %c0_99, %c0_100] : memref<6x128x256xbf16, #tpu.memory_space<vmem>>, vector<1x128x256xbf16>
    %270 = vector.shape_cast %269 : vector<1x128x256xbf16> to vector<128x256xbf16>
    %cst_101 = arith.constant dense<0.000000e+00> : vector<32x256xf32>
    %271 = tpu.matmul %268, %270, %cst_101 {dimension_numbers = #tpu.dot_dimension_numbers<[1], [0], [0], [1], [0, 0, 1, 1], [], []>} : vector<32x128xbf16>, vector<128x256xbf16>, vector<32x256xf32> -> vector<32x256xf32>
    %272 = vector.broadcast %214 : vector<1x256xf32> to vector<32x256xf32>
    %273 = arith.addf %271, %272 : vector<32x256xf32>
    %cst_102 = arith.constant dense<0.000000e+00> : vector<32xf32>
    %274 = vector.multi_reduction <add>, %273, %cst_102 [1] : vector<32x256xf32> to vector<32xf32>
    %275 = vector.shape_cast %274 : vector<32xf32> to vector<32x1xf32>
    %276 = arith.mulf %273, %273 : vector<32x256xf32>
    %cst_103 = arith.constant dense<0.000000e+00> : vector<32xf32>
    %277 = vector.multi_reduction <add>, %276, %cst_103 [1] : vector<32x256xf32> to vector<32xf32>
    %278 = vector.shape_cast %277 : vector<32xf32> to vector<32x1xf32>
    %cst_104 = arith.constant 3.906250e-03 : f32
    %279 = vector.broadcast %cst_104 : f32 to vector<32x1xf32>
    %280 = arith.mulf %275, %279 : vector<32x1xf32>
    %cst_105 = arith.constant 3.906250e-03 : f32
    %281 = vector.broadcast %cst_105 : f32 to vector<32x1xf32>
    %282 = arith.mulf %278, %281 : vector<32x1xf32>
    %283 = arith.mulf %280, %280 : vector<32x1xf32>
    %284 = arith.subf %282, %283 : vector<32x1xf32>
    %cst_106 = arith.constant 0.000000e+00 : f32
    %285 = vector.broadcast %cst_106 : f32 to vector<32x1xf32>
    %286 = arith.maximumf %284, %285 : vector<32x1xf32>
    %287 = vector.broadcast %280 : vector<32x1xf32> to vector<32x256xf32>
    %288 = arith.subf %273, %287 : vector<32x256xf32>
    %cst_107 = arith.constant 9.99999974E-6 : f32
    %289 = vector.broadcast %cst_107 : f32 to vector<32x1xf32>
    %290 = arith.addf %286, %289 : vector<32x1xf32>
    %291 = math.rsqrt %290 : vector<32x1xf32>
    %292 = vector.broadcast %291 : vector<32x1xf32> to vector<32x256xf32>
    %293 = arith.mulf %288, %292 : vector<32x256xf32>
    %294 = vector.broadcast %215 : vector<1x256xf32> to vector<32x256xf32>
    %295 = arith.mulf %293, %294 : vector<32x256xf32>
    %296 = vector.broadcast %216 : vector<1x256xf32> to vector<32x256xf32>
    %297 = arith.addf %295, %296 : vector<32x256xf32>
    %cst_108 = arith.constant 0.000000e+00 : f32
    %298 = vector.broadcast %cst_108 : f32 to vector<32x256xf32>
    %299 = arith.maximumf %297, %298 : vector<32x256xf32>
    %300 = arith.truncf %299 : vector<32x256xf32> to vector<32x256xbf16>
    %c2_109 = arith.constant 2 : index
    %c0_110 = arith.constant 0 : index
    %c0_111 = arith.constant 0 : index
    %301 = vector.load %arg5[%c2_109, %c0_110, %c0_111] : memref<6x256x128xbf16, #tpu.memory_space<vmem>>, vector<1x256x128xbf16>
    %302 = vector.shape_cast %301 : vector<1x256x128xbf16> to vector<256x128xbf16>
    %cst_112 = arith.constant dense<0.000000e+00> : vector<32x128xf32>
    %303 = tpu.matmul %300, %302, %cst_112 {dimension_numbers = #tpu.dot_dimension_numbers<[1], [0], [0], [1], [0, 0, 1, 1], [], []>} : vector<32x256xbf16>, vector<256x128xbf16>, vector<32x128xf32> -> vector<32x128xf32>
    %304 = vector.broadcast %213 : vector<1x128xf32> to vector<32x128xf32>
    %305 = arith.addf %303, %304 : vector<32x128xf32>
    %306 = arith.addf %206, %305 : vector<32x128xf32>
    %c3 = arith.constant 3 : index
    %c0_113 = arith.constant 0 : index
    %c0_114 = arith.constant 0 : index
    %307 = vector.load %arg6[%c3, %c0_113, %c0_114] : memref<6x3x128xf32, #tpu.memory_space<vmem>>, vector<1x3x128xf32>
    %308 = vector.shape_cast %307 : vector<1x3x128xf32> to vector<3x128xf32>
    %c3_115 = arith.constant 3 : index
    %c0_116 = arith.constant 0 : index
    %c0_117 = arith.constant 0 : index
    %309 = vector.load %arg7[%c3_115, %c0_116, %c0_117] : memref<6x3x256xf32, #tpu.memory_space<vmem>>, vector<1x3x256xf32>
    %310 = vector.shape_cast %309 : vector<1x3x256xf32> to vector<3x256xf32>
    %311 = vector.extract_strided_slice %308 {offsets = [0, 0], sizes = [1, 128], strides = [1, 1]} : vector<3x128xf32> to vector<1x128xf32>
    %312 = vector.extract_strided_slice %308 {offsets = [1, 0], sizes = [1, 128], strides = [1, 1]} : vector<3x128xf32> to vector<1x128xf32>
    %313 = vector.extract_strided_slice %308 {offsets = [2, 0], sizes = [1, 128], strides = [1, 1]} : vector<3x128xf32> to vector<1x128xf32>
    %314 = vector.extract_strided_slice %310 {offsets = [0, 0], sizes = [1, 256], strides = [1, 1]} : vector<3x256xf32> to vector<1x256xf32>
    %315 = vector.extract_strided_slice %310 {offsets = [1, 0], sizes = [1, 256], strides = [1, 1]} : vector<3x256xf32> to vector<1x256xf32>
    %316 = vector.extract_strided_slice %310 {offsets = [2, 0], sizes = [1, 256], strides = [1, 1]} : vector<3x256xf32> to vector<1x256xf32>
    %cst_118 = arith.constant dense<0.000000e+00> : vector<32xf32>
    %317 = vector.multi_reduction <add>, %306, %cst_118 [1] : vector<32x128xf32> to vector<32xf32>
    %318 = vector.shape_cast %317 : vector<32xf32> to vector<32x1xf32>
    %319 = arith.mulf %306, %306 : vector<32x128xf32>
    %cst_119 = arith.constant dense<0.000000e+00> : vector<32xf32>
    %320 = vector.multi_reduction <add>, %319, %cst_119 [1] : vector<32x128xf32> to vector<32xf32>
    %321 = vector.shape_cast %320 : vector<32xf32> to vector<32x1xf32>
    %cst_120 = arith.constant 7.812500e-03 : f32
    %322 = vector.broadcast %cst_120 : f32 to vector<32x1xf32>
    %323 = arith.mulf %318, %322 : vector<32x1xf32>
    %cst_121 = arith.constant 7.812500e-03 : f32
    %324 = vector.broadcast %cst_121 : f32 to vector<32x1xf32>
    %325 = arith.mulf %321, %324 : vector<32x1xf32>
    %326 = arith.mulf %323, %323 : vector<32x1xf32>
    %327 = arith.subf %325, %326 : vector<32x1xf32>
    %cst_122 = arith.constant 0.000000e+00 : f32
    %328 = vector.broadcast %cst_122 : f32 to vector<32x1xf32>
    %329 = arith.maximumf %327, %328 : vector<32x1xf32>
    %330 = vector.broadcast %323 : vector<32x1xf32> to vector<32x128xf32>
    %331 = arith.subf %306, %330 : vector<32x128xf32>
    %cst_123 = arith.constant 9.99999974E-6 : f32
    %332 = vector.broadcast %cst_123 : f32 to vector<32x1xf32>
    %333 = arith.addf %329, %332 : vector<32x1xf32>
    %334 = math.rsqrt %333 : vector<32x1xf32>
    %335 = vector.broadcast %334 : vector<32x1xf32> to vector<32x128xf32>
    %336 = arith.mulf %331, %335 : vector<32x128xf32>
    %337 = vector.broadcast %311 : vector<1x128xf32> to vector<32x128xf32>
    %338 = arith.mulf %336, %337 : vector<32x128xf32>
    %339 = vector.broadcast %312 : vector<1x128xf32> to vector<32x128xf32>
    %340 = arith.addf %338, %339 : vector<32x128xf32>
    %cst_124 = arith.constant 0.000000e+00 : f32
    %341 = vector.broadcast %cst_124 : f32 to vector<32x128xf32>
    %342 = arith.maximumf %340, %341 : vector<32x128xf32>
    %cst_125 = arith.constant 1.000000e-07 : f32
    %343 = vector.broadcast %cst_125 : f32 to vector<32x128xf32>
    %344 = arith.addf %342, %343 : vector<32x128xf32>
    %cst_126 = arith.constant 1.000000e+00 : f32
    %345 = vector.broadcast %cst_126 : f32 to vector<32x128xf32>
    %346 = arith.mulf %344, %345 : vector<32x128xf32>
    %cst_127 = arith.constant dense<0xFF800000> : vector<128xf32>
    %347 = vector.multi_reduction <maximumf>, %346, %cst_127 [0] : vector<32x128xf32> to vector<128xf32>
    %348 = vector.shape_cast %347 : vector<128xf32> to vector<1x128xf32>
    %cst_128 = arith.constant 1.000000e+00 : f32
    %349 = vector.broadcast %cst_128 : f32 to vector<32x128xf32>
    %350 = arith.mulf %344, %349 : vector<32x128xf32>
    %351 = vector.broadcast %348 : vector<1x128xf32> to vector<32x128xf32>
    %352 = arith.subf %350, %351 : vector<32x128xf32>
    %353 = math.exp %352 : vector<32x128xf32>
    %354 = arith.mulf %353, %344 : vector<32x128xf32>
    %355 = tpu.concatenate %353, %354 in 1 : vector<32x128xf32>, vector<32x128xf32> -> vector<32x256xf32>
    %cst_129 = arith.constant dense<0.000000e+00> : vector<32x256xf32>
    %356 = tpu.matmul %6, %355, %cst_129 {dimension_numbers = #tpu.dot_dimension_numbers<[1], [0], [0], [1], [0, 0, 1, 1], [], []>} : vector<32x32xf32>, vector<32x256xf32>, vector<32x256xf32> -> vector<32x256xf32>
    %357 = vector.extract_strided_slice %356 {offsets = [0, 0], sizes = [32, 128], strides = [1, 1]} : vector<32x256xf32> to vector<32x128xf32>
    %358 = vector.extract_strided_slice %356 {offsets = [0, 128], sizes = [32, 128], strides = [1, 1]} : vector<32x256xf32> to vector<32x128xf32>
    %cst_130 = arith.constant 9.99999996E-13 : f32
    %359 = vector.broadcast %cst_130 : f32 to vector<32x128xf32>
    %360 = arith.maximumf %357, %359 : vector<32x128xf32>
    %361 = tpu.reciprocal %360 {approx = true} : vector<32x128xf32> -> vector<32x128xf32>
    %cst_131 = arith.constant 0.000000e+00 : f32
    %362 = vector.broadcast %cst_131 : f32 to vector<32x128xf32>
    %363 = arith.cmpf ogt, %357, %362 : vector<32x128xf32>
    %364 = arith.mulf %358, %361 : vector<32x128xf32>
    %cst_132 = arith.constant 0.000000e+00 : f32
    %365 = vector.broadcast %cst_132 : f32 to vector<32x128xf32>
    %366 = arith.select %363, %364, %365 : vector<32x128xi1>, vector<32x128xf32>
    %367 = arith.addf %366, %342 : vector<32x128xf32>
    %368 = arith.truncf %367 : vector<32x128xf32> to vector<32x128xbf16>
    %c3_133 = arith.constant 3 : index
    %c0_134 = arith.constant 0 : index
    %c0_135 = arith.constant 0 : index
    %369 = vector.load %arg4[%c3_133, %c0_134, %c0_135] : memref<6x128x256xbf16, #tpu.memory_space<vmem>>, vector<1x128x256xbf16>
    %370 = vector.shape_cast %369 : vector<1x128x256xbf16> to vector<128x256xbf16>
    %cst_136 = arith.constant dense<0.000000e+00> : vector<32x256xf32>
    %371 = tpu.matmul %368, %370, %cst_136 {dimension_numbers = #tpu.dot_dimension_numbers<[1], [0], [0], [1], [0, 0, 1, 1], [], []>} : vector<32x128xbf16>, vector<128x256xbf16>, vector<32x256xf32> -> vector<32x256xf32>
    %372 = vector.broadcast %314 : vector<1x256xf32> to vector<32x256xf32>
    %373 = arith.addf %371, %372 : vector<32x256xf32>
    %cst_137 = arith.constant dense<0.000000e+00> : vector<32xf32>
    %374 = vector.multi_reduction <add>, %373, %cst_137 [1] : vector<32x256xf32> to vector<32xf32>
    %375 = vector.shape_cast %374 : vector<32xf32> to vector<32x1xf32>
    %376 = arith.mulf %373, %373 : vector<32x256xf32>
    %cst_138 = arith.constant dense<0.000000e+00> : vector<32xf32>
    %377 = vector.multi_reduction <add>, %376, %cst_138 [1] : vector<32x256xf32> to vector<32xf32>
    %378 = vector.shape_cast %377 : vector<32xf32> to vector<32x1xf32>
    %cst_139 = arith.constant 3.906250e-03 : f32
    %379 = vector.broadcast %cst_139 : f32 to vector<32x1xf32>
    %380 = arith.mulf %375, %379 : vector<32x1xf32>
    %cst_140 = arith.constant 3.906250e-03 : f32
    %381 = vector.broadcast %cst_140 : f32 to vector<32x1xf32>
    %382 = arith.mulf %378, %381 : vector<32x1xf32>
    %383 = arith.mulf %380, %380 : vector<32x1xf32>
    %384 = arith.subf %382, %383 : vector<32x1xf32>
    %cst_141 = arith.constant 0.000000e+00 : f32
    %385 = vector.broadcast %cst_141 : f32 to vector<32x1xf32>
    %386 = arith.maximumf %384, %385 : vector<32x1xf32>
    %387 = vector.broadcast %380 : vector<32x1xf32> to vector<32x256xf32>
    %388 = arith.subf %373, %387 : vector<32x256xf32>
    %cst_142 = arith.constant 9.99999974E-6 : f32
    %389 = vector.broadcast %cst_142 : f32 to vector<32x1xf32>
    %390 = arith.addf %386, %389 : vector<32x1xf32>
    %391 = math.rsqrt %390 : vector<32x1xf32>
    %392 = vector.broadcast %391 : vector<32x1xf32> to vector<32x256xf32>
    %393 = arith.mulf %388, %392 : vector<32x256xf32>
    %394 = vector.broadcast %315 : vector<1x256xf32> to vector<32x256xf32>
    %395 = arith.mulf %393, %394 : vector<32x256xf32>
    %396 = vector.broadcast %316 : vector<1x256xf32> to vector<32x256xf32>
    %397 = arith.addf %395, %396 : vector<32x256xf32>
    %cst_143 = arith.constant 0.000000e+00 : f32
    %398 = vector.broadcast %cst_143 : f32 to vector<32x256xf32>
    %399 = arith.maximumf %397, %398 : vector<32x256xf32>
    %400 = arith.truncf %399 : vector<32x256xf32> to vector<32x256xbf16>
    %c3_144 = arith.constant 3 : index
    %c0_145 = arith.constant 0 : index
    %c0_146 = arith.constant 0 : index
    %401 = vector.load %arg5[%c3_144, %c0_145, %c0_146] : memref<6x256x128xbf16, #tpu.memory_space<vmem>>, vector<1x256x128xbf16>
    %402 = vector.shape_cast %401 : vector<1x256x128xbf16> to vector<256x128xbf16>
    %cst_147 = arith.constant dense<0.000000e+00> : vector<32x128xf32>
    %403 = tpu.matmul %400, %402, %cst_147 {dimension_numbers = #tpu.dot_dimension_numbers<[1], [0], [0], [1], [0, 0, 1, 1], [], []>} : vector<32x256xbf16>, vector<256x128xbf16>, vector<32x128xf32> -> vector<32x128xf32>
    %404 = vector.broadcast %313 : vector<1x128xf32> to vector<32x128xf32>
    %405 = arith.addf %403, %404 : vector<32x128xf32>
    %406 = arith.addf %306, %405 : vector<32x128xf32>
    %c4 = arith.constant 4 : index
    %c0_148 = arith.constant 0 : index
    %c0_149 = arith.constant 0 : index
    %407 = vector.load %arg6[%c4, %c0_148, %c0_149] : memref<6x3x128xf32, #tpu.memory_space<vmem>>, vector<1x3x128xf32>
    %408 = vector.shape_cast %407 : vector<1x3x128xf32> to vector<3x128xf32>
    %c4_150 = arith.constant 4 : index
    %c0_151 = arith.constant 0 : index
    %c0_152 = arith.constant 0 : index
    %409 = vector.load %arg7[%c4_150, %c0_151, %c0_152] : memref<6x3x256xf32, #tpu.memory_space<vmem>>, vector<1x3x256xf32>
    %410 = vector.shape_cast %409 : vector<1x3x256xf32> to vector<3x256xf32>
    %411 = vector.extract_strided_slice %408 {offsets = [0, 0], sizes = [1, 128], strides = [1, 1]} : vector<3x128xf32> to vector<1x128xf32>
    %412 = vector.extract_strided_slice %408 {offsets = [1, 0], sizes = [1, 128], strides = [1, 1]} : vector<3x128xf32> to vector<1x128xf32>
    %413 = vector.extract_strided_slice %408 {offsets = [2, 0], sizes = [1, 128], strides = [1, 1]} : vector<3x128xf32> to vector<1x128xf32>
    %414 = vector.extract_strided_slice %410 {offsets = [0, 0], sizes = [1, 256], strides = [1, 1]} : vector<3x256xf32> to vector<1x256xf32>
    %415 = vector.extract_strided_slice %410 {offsets = [1, 0], sizes = [1, 256], strides = [1, 1]} : vector<3x256xf32> to vector<1x256xf32>
    %416 = vector.extract_strided_slice %410 {offsets = [2, 0], sizes = [1, 256], strides = [1, 1]} : vector<3x256xf32> to vector<1x256xf32>
    %cst_153 = arith.constant dense<0.000000e+00> : vector<32xf32>
    %417 = vector.multi_reduction <add>, %406, %cst_153 [1] : vector<32x128xf32> to vector<32xf32>
    %418 = vector.shape_cast %417 : vector<32xf32> to vector<32x1xf32>
    %419 = arith.mulf %406, %406 : vector<32x128xf32>
    %cst_154 = arith.constant dense<0.000000e+00> : vector<32xf32>
    %420 = vector.multi_reduction <add>, %419, %cst_154 [1] : vector<32x128xf32> to vector<32xf32>
    %421 = vector.shape_cast %420 : vector<32xf32> to vector<32x1xf32>
    %cst_155 = arith.constant 7.812500e-03 : f32
    %422 = vector.broadcast %cst_155 : f32 to vector<32x1xf32>
    %423 = arith.mulf %418, %422 : vector<32x1xf32>
    %cst_156 = arith.constant 7.812500e-03 : f32
    %424 = vector.broadcast %cst_156 : f32 to vector<32x1xf32>
    %425 = arith.mulf %421, %424 : vector<32x1xf32>
    %426 = arith.mulf %423, %423 : vector<32x1xf32>
    %427 = arith.subf %425, %426 : vector<32x1xf32>
    %cst_157 = arith.constant 0.000000e+00 : f32
    %428 = vector.broadcast %cst_157 : f32 to vector<32x1xf32>
    %429 = arith.maximumf %427, %428 : vector<32x1xf32>
    %430 = vector.broadcast %423 : vector<32x1xf32> to vector<32x128xf32>
    %431 = arith.subf %406, %430 : vector<32x128xf32>
    %cst_158 = arith.constant 9.99999974E-6 : f32
    %432 = vector.broadcast %cst_158 : f32 to vector<32x1xf32>
    %433 = arith.addf %429, %432 : vector<32x1xf32>
    %434 = math.rsqrt %433 : vector<32x1xf32>
    %435 = vector.broadcast %434 : vector<32x1xf32> to vector<32x128xf32>
    %436 = arith.mulf %431, %435 : vector<32x128xf32>
    %437 = vector.broadcast %411 : vector<1x128xf32> to vector<32x128xf32>
    %438 = arith.mulf %436, %437 : vector<32x128xf32>
    %439 = vector.broadcast %412 : vector<1x128xf32> to vector<32x128xf32>
    %440 = arith.addf %438, %439 : vector<32x128xf32>
    %cst_159 = arith.constant 0.000000e+00 : f32
    %441 = vector.broadcast %cst_159 : f32 to vector<32x128xf32>
    %442 = arith.maximumf %440, %441 : vector<32x128xf32>
    %cst_160 = arith.constant 1.000000e-07 : f32
    %443 = vector.broadcast %cst_160 : f32 to vector<32x128xf32>
    %444 = arith.addf %442, %443 : vector<32x128xf32>
    %cst_161 = arith.constant 1.000000e+00 : f32
    %445 = vector.broadcast %cst_161 : f32 to vector<32x128xf32>
    %446 = arith.mulf %444, %445 : vector<32x128xf32>
    %cst_162 = arith.constant dense<0xFF800000> : vector<128xf32>
    %447 = vector.multi_reduction <maximumf>, %446, %cst_162 [0] : vector<32x128xf32> to vector<128xf32>
    %448 = vector.shape_cast %447 : vector<128xf32> to vector<1x128xf32>
    %cst_163 = arith.constant 1.000000e+00 : f32
    %449 = vector.broadcast %cst_163 : f32 to vector<32x128xf32>
    %450 = arith.mulf %444, %449 : vector<32x128xf32>
    %451 = vector.broadcast %448 : vector<1x128xf32> to vector<32x128xf32>
    %452 = arith.subf %450, %451 : vector<32x128xf32>
    %453 = math.exp %452 : vector<32x128xf32>
    %454 = arith.mulf %453, %444 : vector<32x128xf32>
    %455 = tpu.concatenate %453, %454 in 1 : vector<32x128xf32>, vector<32x128xf32> -> vector<32x256xf32>
    %cst_164 = arith.constant dense<0.000000e+00> : vector<32x256xf32>
    %456 = tpu.matmul %6, %455, %cst_164 {dimension_numbers = #tpu.dot_dimension_numbers<[1], [0], [0], [1], [0, 0, 1, 1], [], []>} : vector<32x32xf32>, vector<32x256xf32>, vector<32x256xf32> -> vector<32x256xf32>
    %457 = vector.extract_strided_slice %456 {offsets = [0, 0], sizes = [32, 128], strides = [1, 1]} : vector<32x256xf32> to vector<32x128xf32>
    %458 = vector.extract_strided_slice %456 {offsets = [0, 128], sizes = [32, 128], strides = [1, 1]} : vector<32x256xf32> to vector<32x128xf32>
    %cst_165 = arith.constant 9.99999996E-13 : f32
    %459 = vector.broadcast %cst_165 : f32 to vector<32x128xf32>
    %460 = arith.maximumf %457, %459 : vector<32x128xf32>
    %461 = tpu.reciprocal %460 {approx = true} : vector<32x128xf32> -> vector<32x128xf32>
    %cst_166 = arith.constant 0.000000e+00 : f32
    %462 = vector.broadcast %cst_166 : f32 to vector<32x128xf32>
    %463 = arith.cmpf ogt, %457, %462 : vector<32x128xf32>
    %464 = arith.mulf %458, %461 : vector<32x128xf32>
    %cst_167 = arith.constant 0.000000e+00 : f32
    %465 = vector.broadcast %cst_167 : f32 to vector<32x128xf32>
    %466 = arith.select %463, %464, %465 : vector<32x128xi1>, vector<32x128xf32>
    %467 = arith.addf %466, %442 : vector<32x128xf32>
    %468 = arith.truncf %467 : vector<32x128xf32> to vector<32x128xbf16>
    %c4_168 = arith.constant 4 : index
    %c0_169 = arith.constant 0 : index
    %c0_170 = arith.constant 0 : index
    %469 = vector.load %arg4[%c4_168, %c0_169, %c0_170] : memref<6x128x256xbf16, #tpu.memory_space<vmem>>, vector<1x128x256xbf16>
    %470 = vector.shape_cast %469 : vector<1x128x256xbf16> to vector<128x256xbf16>
    %cst_171 = arith.constant dense<0.000000e+00> : vector<32x256xf32>
    %471 = tpu.matmul %468, %470, %cst_171 {dimension_numbers = #tpu.dot_dimension_numbers<[1], [0], [0], [1], [0, 0, 1, 1], [], []>} : vector<32x128xbf16>, vector<128x256xbf16>, vector<32x256xf32> -> vector<32x256xf32>
    %472 = vector.broadcast %414 : vector<1x256xf32> to vector<32x256xf32>
    %473 = arith.addf %471, %472 : vector<32x256xf32>
    %cst_172 = arith.constant dense<0.000000e+00> : vector<32xf32>
    %474 = vector.multi_reduction <add>, %473, %cst_172 [1] : vector<32x256xf32> to vector<32xf32>
    %475 = vector.shape_cast %474 : vector<32xf32> to vector<32x1xf32>
    %476 = arith.mulf %473, %473 : vector<32x256xf32>
    %cst_173 = arith.constant dense<0.000000e+00> : vector<32xf32>
    %477 = vector.multi_reduction <add>, %476, %cst_173 [1] : vector<32x256xf32> to vector<32xf32>
    %478 = vector.shape_cast %477 : vector<32xf32> to vector<32x1xf32>
    %cst_174 = arith.constant 3.906250e-03 : f32
    %479 = vector.broadcast %cst_174 : f32 to vector<32x1xf32>
    %480 = arith.mulf %475, %479 : vector<32x1xf32>
    %cst_175 = arith.constant 3.906250e-03 : f32
    %481 = vector.broadcast %cst_175 : f32 to vector<32x1xf32>
    %482 = arith.mulf %478, %481 : vector<32x1xf32>
    %483 = arith.mulf %480, %480 : vector<32x1xf32>
    %484 = arith.subf %482, %483 : vector<32x1xf32>
    %cst_176 = arith.constant 0.000000e+00 : f32
    %485 = vector.broadcast %cst_176 : f32 to vector<32x1xf32>
    %486 = arith.maximumf %484, %485 : vector<32x1xf32>
    %487 = vector.broadcast %480 : vector<32x1xf32> to vector<32x256xf32>
    %488 = arith.subf %473, %487 : vector<32x256xf32>
    %cst_177 = arith.constant 9.99999974E-6 : f32
    %489 = vector.broadcast %cst_177 : f32 to vector<32x1xf32>
    %490 = arith.addf %486, %489 : vector<32x1xf32>
    %491 = math.rsqrt %490 : vector<32x1xf32>
    %492 = vector.broadcast %491 : vector<32x1xf32> to vector<32x256xf32>
    %493 = arith.mulf %488, %492 : vector<32x256xf32>
    %494 = vector.broadcast %415 : vector<1x256xf32> to vector<32x256xf32>
    %495 = arith.mulf %493, %494 : vector<32x256xf32>
    %496 = vector.broadcast %416 : vector<1x256xf32> to vector<32x256xf32>
    %497 = arith.addf %495, %496 : vector<32x256xf32>
    %cst_178 = arith.constant 0.000000e+00 : f32
    %498 = vector.broadcast %cst_178 : f32 to vector<32x256xf32>
    %499 = arith.maximumf %497, %498 : vector<32x256xf32>
    %500 = arith.truncf %499 : vector<32x256xf32> to vector<32x256xbf16>
    %c4_179 = arith.constant 4 : index
    %c0_180 = arith.constant 0 : index
    %c0_181 = arith.constant 0 : index
    %501 = vector.load %arg5[%c4_179, %c0_180, %c0_181] : memref<6x256x128xbf16, #tpu.memory_space<vmem>>, vector<1x256x128xbf16>
    %502 = vector.shape_cast %501 : vector<1x256x128xbf16> to vector<256x128xbf16>
    %cst_182 = arith.constant dense<0.000000e+00> : vector<32x128xf32>
    %503 = tpu.matmul %500, %502, %cst_182 {dimension_numbers = #tpu.dot_dimension_numbers<[1], [0], [0], [1], [0, 0, 1, 1], [], []>} : vector<32x256xbf16>, vector<256x128xbf16>, vector<32x128xf32> -> vector<32x128xf32>
    %504 = vector.broadcast %413 : vector<1x128xf32> to vector<32x128xf32>
    %505 = arith.addf %503, %504 : vector<32x128xf32>
    %506 = arith.addf %406, %505 : vector<32x128xf32>
    %c5 = arith.constant 5 : index
    %c0_183 = arith.constant 0 : index
    %c0_184 = arith.constant 0 : index
    %507 = vector.load %arg6[%c5, %c0_183, %c0_184] : memref<6x3x128xf32, #tpu.memory_space<vmem>>, vector<1x3x128xf32>
    %508 = vector.shape_cast %507 : vector<1x3x128xf32> to vector<3x128xf32>
    %c5_185 = arith.constant 5 : index
    %c0_186 = arith.constant 0 : index
    %c0_187 = arith.constant 0 : index
    %509 = vector.load %arg7[%c5_185, %c0_186, %c0_187] : memref<6x3x256xf32, #tpu.memory_space<vmem>>, vector<1x3x256xf32>
    %510 = vector.shape_cast %509 : vector<1x3x256xf32> to vector<3x256xf32>
    %511 = vector.extract_strided_slice %508 {offsets = [0, 0], sizes = [1, 128], strides = [1, 1]} : vector<3x128xf32> to vector<1x128xf32>
    %512 = vector.extract_strided_slice %508 {offsets = [1, 0], sizes = [1, 128], strides = [1, 1]} : vector<3x128xf32> to vector<1x128xf32>
    %513 = vector.extract_strided_slice %508 {offsets = [2, 0], sizes = [1, 128], strides = [1, 1]} : vector<3x128xf32> to vector<1x128xf32>
    %514 = vector.extract_strided_slice %510 {offsets = [0, 0], sizes = [1, 256], strides = [1, 1]} : vector<3x256xf32> to vector<1x256xf32>
    %515 = vector.extract_strided_slice %510 {offsets = [1, 0], sizes = [1, 256], strides = [1, 1]} : vector<3x256xf32> to vector<1x256xf32>
    %516 = vector.extract_strided_slice %510 {offsets = [2, 0], sizes = [1, 256], strides = [1, 1]} : vector<3x256xf32> to vector<1x256xf32>
    %cst_188 = arith.constant dense<0.000000e+00> : vector<32xf32>
    %517 = vector.multi_reduction <add>, %506, %cst_188 [1] : vector<32x128xf32> to vector<32xf32>
    %518 = vector.shape_cast %517 : vector<32xf32> to vector<32x1xf32>
    %519 = arith.mulf %506, %506 : vector<32x128xf32>
    %cst_189 = arith.constant dense<0.000000e+00> : vector<32xf32>
    %520 = vector.multi_reduction <add>, %519, %cst_189 [1] : vector<32x128xf32> to vector<32xf32>
    %521 = vector.shape_cast %520 : vector<32xf32> to vector<32x1xf32>
    %cst_190 = arith.constant 7.812500e-03 : f32
    %522 = vector.broadcast %cst_190 : f32 to vector<32x1xf32>
    %523 = arith.mulf %518, %522 : vector<32x1xf32>
    %cst_191 = arith.constant 7.812500e-03 : f32
    %524 = vector.broadcast %cst_191 : f32 to vector<32x1xf32>
    %525 = arith.mulf %521, %524 : vector<32x1xf32>
    %526 = arith.mulf %523, %523 : vector<32x1xf32>
    %527 = arith.subf %525, %526 : vector<32x1xf32>
    %cst_192 = arith.constant 0.000000e+00 : f32
    %528 = vector.broadcast %cst_192 : f32 to vector<32x1xf32>
    %529 = arith.maximumf %527, %528 : vector<32x1xf32>
    %530 = vector.broadcast %523 : vector<32x1xf32> to vector<32x128xf32>
    %531 = arith.subf %506, %530 : vector<32x128xf32>
    %cst_193 = arith.constant 9.99999974E-6 : f32
    %532 = vector.broadcast %cst_193 : f32 to vector<32x1xf32>
    %533 = arith.addf %529, %532 : vector<32x1xf32>
    %534 = math.rsqrt %533 : vector<32x1xf32>
    %535 = vector.broadcast %534 : vector<32x1xf32> to vector<32x128xf32>
    %536 = arith.mulf %531, %535 : vector<32x128xf32>
    %537 = vector.broadcast %511 : vector<1x128xf32> to vector<32x128xf32>
    %538 = arith.mulf %536, %537 : vector<32x128xf32>
    %539 = vector.broadcast %512 : vector<1x128xf32> to vector<32x128xf32>
    %540 = arith.addf %538, %539 : vector<32x128xf32>
    %cst_194 = arith.constant 0.000000e+00 : f32
    %541 = vector.broadcast %cst_194 : f32 to vector<32x128xf32>
    %542 = arith.maximumf %540, %541 : vector<32x128xf32>
    %cst_195 = arith.constant 1.000000e-07 : f32
    %543 = vector.broadcast %cst_195 : f32 to vector<32x128xf32>
    %544 = arith.addf %542, %543 : vector<32x128xf32>
    %cst_196 = arith.constant 1.000000e+00 : f32
    %545 = vector.broadcast %cst_196 : f32 to vector<32x128xf32>
    %546 = arith.mulf %544, %545 : vector<32x128xf32>
    %cst_197 = arith.constant dense<0xFF800000> : vector<128xf32>
    %547 = vector.multi_reduction <maximumf>, %546, %cst_197 [0] : vector<32x128xf32> to vector<128xf32>
    %548 = vector.shape_cast %547 : vector<128xf32> to vector<1x128xf32>
    %cst_198 = arith.constant 1.000000e+00 : f32
    %549 = vector.broadcast %cst_198 : f32 to vector<32x128xf32>
    %550 = arith.mulf %544, %549 : vector<32x128xf32>
    %551 = vector.broadcast %548 : vector<1x128xf32> to vector<32x128xf32>
    %552 = arith.subf %550, %551 : vector<32x128xf32>
    %553 = math.exp %552 : vector<32x128xf32>
    %554 = arith.mulf %553, %544 : vector<32x128xf32>
    %555 = tpu.concatenate %553, %554 in 1 : vector<32x128xf32>, vector<32x128xf32> -> vector<32x256xf32>
    %cst_199 = arith.constant dense<0.000000e+00> : vector<32x256xf32>
    %556 = tpu.matmul %6, %555, %cst_199 {dimension_numbers = #tpu.dot_dimension_numbers<[1], [0], [0], [1], [0, 0, 1, 1], [], []>} : vector<32x32xf32>, vector<32x256xf32>, vector<32x256xf32> -> vector<32x256xf32>
    %557 = vector.extract_strided_slice %556 {offsets = [0, 0], sizes = [32, 128], strides = [1, 1]} : vector<32x256xf32> to vector<32x128xf32>
    %558 = vector.extract_strided_slice %556 {offsets = [0, 128], sizes = [32, 128], strides = [1, 1]} : vector<32x256xf32> to vector<32x128xf32>
    %cst_200 = arith.constant 9.99999996E-13 : f32
    %559 = vector.broadcast %cst_200 : f32 to vector<32x128xf32>
    %560 = arith.maximumf %557, %559 : vector<32x128xf32>
    %561 = tpu.reciprocal %560 {approx = true} : vector<32x128xf32> -> vector<32x128xf32>
    %cst_201 = arith.constant 0.000000e+00 : f32
    %562 = vector.broadcast %cst_201 : f32 to vector<32x128xf32>
    %563 = arith.cmpf ogt, %557, %562 : vector<32x128xf32>
    %564 = arith.mulf %558, %561 : vector<32x128xf32>
    %cst_202 = arith.constant 0.000000e+00 : f32
    %565 = vector.broadcast %cst_202 : f32 to vector<32x128xf32>
    %566 = arith.select %563, %564, %565 : vector<32x128xi1>, vector<32x128xf32>
    %567 = arith.addf %566, %542 : vector<32x128xf32>
    %568 = arith.truncf %567 : vector<32x128xf32> to vector<32x128xbf16>
    %c5_203 = arith.constant 5 : index
    %c0_204 = arith.constant 0 : index
    %c0_205 = arith.constant 0 : index
    %569 = vector.load %arg4[%c5_203, %c0_204, %c0_205] : memref<6x128x256xbf16, #tpu.memory_space<vmem>>, vector<1x128x256xbf16>
    %570 = vector.shape_cast %569 : vector<1x128x256xbf16> to vector<128x256xbf16>
    %cst_206 = arith.constant dense<0.000000e+00> : vector<32x256xf32>
    %571 = tpu.matmul %568, %570, %cst_206 {dimension_numbers = #tpu.dot_dimension_numbers<[1], [0], [0], [1], [0, 0, 1, 1], [], []>} : vector<32x128xbf16>, vector<128x256xbf16>, vector<32x256xf32> -> vector<32x256xf32>
    %572 = vector.broadcast %514 : vector<1x256xf32> to vector<32x256xf32>
    %573 = arith.addf %571, %572 : vector<32x256xf32>
    %cst_207 = arith.constant dense<0.000000e+00> : vector<32xf32>
    %574 = vector.multi_reduction <add>, %573, %cst_207 [1] : vector<32x256xf32> to vector<32xf32>
    %575 = vector.shape_cast %574 : vector<32xf32> to vector<32x1xf32>
    %576 = arith.mulf %573, %573 : vector<32x256xf32>
    %cst_208 = arith.constant dense<0.000000e+00> : vector<32xf32>
    %577 = vector.multi_reduction <add>, %576, %cst_208 [1] : vector<32x256xf32> to vector<32xf32>
    %578 = vector.shape_cast %577 : vector<32xf32> to vector<32x1xf32>
    %cst_209 = arith.constant 3.906250e-03 : f32
    %579 = vector.broadcast %cst_209 : f32 to vector<32x1xf32>
    %580 = arith.mulf %575, %579 : vector<32x1xf32>
    %cst_210 = arith.constant 3.906250e-03 : f32
    %581 = vector.broadcast %cst_210 : f32 to vector<32x1xf32>
    %582 = arith.mulf %578, %581 : vector<32x1xf32>
    %583 = arith.mulf %580, %580 : vector<32x1xf32>
    %584 = arith.subf %582, %583 : vector<32x1xf32>
    %cst_211 = arith.constant 0.000000e+00 : f32
    %585 = vector.broadcast %cst_211 : f32 to vector<32x1xf32>
    %586 = arith.maximumf %584, %585 : vector<32x1xf32>
    %587 = vector.broadcast %580 : vector<32x1xf32> to vector<32x256xf32>
    %588 = arith.subf %573, %587 : vector<32x256xf32>
    %cst_212 = arith.constant 9.99999974E-6 : f32
    %589 = vector.broadcast %cst_212 : f32 to vector<32x1xf32>
    %590 = arith.addf %586, %589 : vector<32x1xf32>
    %591 = math.rsqrt %590 : vector<32x1xf32>
    %592 = vector.broadcast %591 : vector<32x1xf32> to vector<32x256xf32>
    %593 = arith.mulf %588, %592 : vector<32x256xf32>
    %594 = vector.broadcast %515 : vector<1x256xf32> to vector<32x256xf32>
    %595 = arith.mulf %593, %594 : vector<32x256xf32>
    %596 = vector.broadcast %516 : vector<1x256xf32> to vector<32x256xf32>
    %597 = arith.addf %595, %596 : vector<32x256xf32>
    %cst_213 = arith.constant 0.000000e+00 : f32
    %598 = vector.broadcast %cst_213 : f32 to vector<32x256xf32>
    %599 = arith.maximumf %597, %598 : vector<32x256xf32>
    %600 = arith.truncf %599 : vector<32x256xf32> to vector<32x256xbf16>
    %c5_214 = arith.constant 5 : index
    %c0_215 = arith.constant 0 : index
    %c0_216 = arith.constant 0 : index
    %601 = vector.load %arg5[%c5_214, %c0_215, %c0_216] : memref<6x256x128xbf16, #tpu.memory_space<vmem>>, vector<1x256x128xbf16>
    %602 = vector.shape_cast %601 : vector<1x256x128xbf16> to vector<256x128xbf16>
    %cst_217 = arith.constant dense<0.000000e+00> : vector<32x128xf32>
    %603 = tpu.matmul %600, %602, %cst_217 {dimension_numbers = #tpu.dot_dimension_numbers<[1], [0], [0], [1], [0, 0, 1, 1], [], []>} : vector<32x256xbf16>, vector<256x128xbf16>, vector<32x128xf32> -> vector<32x128xf32>
    %604 = vector.broadcast %513 : vector<1x128xf32> to vector<32x128xf32>
    %605 = arith.addf %603, %604 : vector<32x128xf32>
    %606 = arith.addf %506, %605 : vector<32x128xf32>
    %c0_218 = arith.constant 0 : index
    %c0_219 = arith.constant 0 : index
    %607 = vector.load %arg8[%c0_218, %c0_219] : memref<2x32xf32, #tpu.memory_space<vmem>>, vector<2x32xf32>
    %cst_220 = arith.constant dense<0.000000e+00> : vector<2x128xf32>
    %608 = tpu.matmul %607, %606, %cst_220 {dimension_numbers = #tpu.dot_dimension_numbers<[1], [0], [0], [1], [0, 0, 1, 1], [], []>} : vector<2x32xf32>, vector<32x128xf32>, vector<2x128xf32> -> vector<2x128xf32>
    %c0_221 = arith.constant 0 : index
    %c0_222 = arith.constant 0 : index
    %609 = vector.load %arg9[%c0_221, %c0_222] : memref<128x4xf32, #tpu.memory_space<vmem>>, vector<128x4xf32>
    %cst_223 = arith.constant dense<0.000000e+00> : vector<2x4xf32>
    %610 = tpu.matmul %608, %609, %cst_223 {dimension_numbers = #tpu.dot_dimension_numbers<[1], [0], [0], [1], [0, 0, 1, 1], [], []>} : vector<2x128xf32>, vector<128x4xf32>, vector<2x4xf32> -> vector<2x4xf32>
    %c0_224 = arith.constant 0 : index
    %c0_225 = arith.constant 0 : index
    %611 = vector.load %arg10[%c0_224, %c0_225] : memref<1x4xf32, #tpu.memory_space<vmem>>, vector<1x4xf32>
    %612 = vector.broadcast %611 : vector<1x4xf32> to vector<2x4xf32>
    %613 = arith.addf %610, %612 : vector<2x4xf32>
    %c0_226 = arith.constant 0 : index
    %c0_227 = arith.constant 0 : index
    %614 = vector.load %arg11[%c0_226, %c0_227] : memref<2x4xf32, #tpu.memory_space<vmem>>, vector<2x4xf32>
    tpu.vector_store %arg11[%c0_226, %c0_227], %613 {strides = array<i32>} : memref<2x4xf32, #tpu.memory_space<vmem>>, vector<2x4xf32>,
    return
  }
}

</mosaic_0001>

<bundles_post_ra>
// kernel: res_gcn_forward.1
= control target key start
LH: loop header
LB: loop body
LE: loop exit
PB: predicated region body
PF: predicated region fallthrough
CT: control target
= control target key end

     0   :  { %vm52_vm0 = vcmask 64512   ;;  %s7578_s0 = inlined_call_operand.vmem [shape: f32[32,8], index: 0, kind: input, shape index: {}]   ;;  %s7579_s1 = inlined_call_operand.vmem [shape: f32[32,32], index: 1, kind: input, shape index: {}]   ;;  %s7580_s2 = inlined_call_operand.vmem [shape: f32[8,128], index: 2, kind: input, shape index: {}]   ;;  %s7581_s3 = inlined_call_operand.vmem [shape: f32[1,128], index: 3, kind: input, shape index: {}]   ;;  %s7582_s4 = inlined_call_operand.vmem [shape: bf16[6,128,256], index: 4, kind: input, shape index: {}]   ;;  %s7583_s5 = inlined_call_operand.vmem [shape: bf16[6,256,128], index: 5, kind: input, shape index: {}]   ;;  %s7584_s6 = inlined_call_operand.vmem [shape: f32[6,3,128], index: 6, kind: input, shape index: {}]   ;;  %s7585_s7 = inlined_call_operand.vmem [shape: f32[6,3,256], index: 7, kind: input, shape index: {}]   ;;  %s7586_s8 = inlined_call_operand.vmem [shape: f32[2,32], index: 8, kind: input, shape index: {}]   ;;  %s7587_s9 = inlined_call_operand.vmem [shape: f32[128,4], index: 9, kind: input, shape index: {}]   ;;  %s7588_s10 = inlined_call_operand.vmem [shape: f32[1,4], index: 10, kind: input, shape index: {}]   ;;  %s7589_s11 = inlined_call_operand.hbm [shape: f32[2,4], index: 11, kind: output, shape index: {}]  }
   0x1   :  { %v44_v0 = vld [vmem:[%s7580_s2] sm:$0xff]  ;;  %v41_v2 = vld [vmem:[%s7578_s0 + $0x8] sm:$0xff]  ;;  %v42_v3 = vld [vmem:[%s7578_s0 + $0x10] sm:$0xff] }
   0x2   :  { %v40_v1 = vld [vmem:[%s7578_s0] sm:$0xff]  ;;  %5328 = vmatprep.subr.mxu0 %v44_v0  ;;  %v43_v4 = vld [vmem:[%s7578_s0 + $0x18] sm:$0xff] }
   0x3   :  { %5330 = vmatprep.mubr.msk.f32.mxu0 %vm52_vm0, %v40_v1  ;;  %5329 = vmatpush3.msra.mxu0 %v44_v0 }
   0x4   :  { %5331 = vmatmul.mubr.msk.f32.vlgmr.msra.gmra.mxu0 %vm52_vm0, %v41_v2 }
   0x5   :  { %5333 = vmatprep.mubr.msk.f32.mxu0 %vm52_vm0, %v42_v3 }
   0x8   :  { %5334 = vmatmul.mubr.msk.f32.gmra.mxu0 %vm52_vm0, %v43_v4 }
   0x9   :  { %16 = vsyncpa [#allocation3], 0  ;;  %v4660_v5 = vld [vmem:[%s7581_s3] ss:$0 sm:$0xff]  ;;  %v5848_v18 = vmov 0.0   ;;  %v212_v50 = vlaneseq  ;;  %vm261_vm1 = vcmask 261120  }
   0xa   :  { %338 = vmatprep.mubr.f32.mxu1 %v5848_v18  ;;  %v5386_v19 = vld [vmem:[%s7582_s4 + $0x70] ss:$8 sps:$4 sm:$0xff]   ;;  %v5388_v20 = vld [vmem:[%s7582_s4 + $0x74] ss:$8 sps:$4 sm:$0xff]   ;;  %v5965_v57 = vld [vmem:[%s7584_s6] sm:$0x7] }
   0xb   :  { %504 = vmatprep.subr.bf16.mxu0 %v5388_v20  ;;  %v5957_v54 = vshrl.u32 %v212_v50, 7  ;;  %s5851_s16 = smov [#allocation2]  }
   0xc   :  { %505 = vmatpush1.bf16.msra.mxu0 %v5386_v19  ;;  %s4652_s17 = sshll.u32 %s5851_s16, 4  ;;  %s4653_s17 = int_to_ptr.vmem [resolvable:$true] %s4652_s17 }
   0xd   :  { %v5960_v55 = vsub.s32 0, %v5957_v54  ;;  %v5972_v62 = vsub.s32 1, %v5957_v54  ;;  %p5831_p1 = scmp.lt.s32.totalorder %s4653_s17, %s4653_s17 }
   0xf   :  { %v215_v61 = vrot.slane %v5965_v57, %v5960_v55  ;;  %v223_v4 = vrot.slane %v5965_v57, %v5972_v62 }
  0xc4   :  { %v5332_v6 = vpop.f32.mrf.mxu0 }
  0xc5   :  { %v5930_v7 = vadd.f32 %v5332_v6, %v4660_v5 }
  0xc6   :  { %v131_v8 = vpop.f32.mrf.mxu0 }
  0xc7   :  { %158 = vadd.xlane.f32.xlu0 %v5930_v7  ;;  %v165_v9 = vmul.f32 %v5930_v7, %v5930_v7  ;;  %v5935_v11 = vadd.f32 %v4660_v5, %v131_v8 }
  0xc8   :  { %v5335_v10 = vpop.f32.mrf.mxu0 }
  0xc9   :  { %v5937_v12 = vadd.f32 %v5335_v10, %v4660_v5  ;;  %170 = vadd.xlane.f32.xlu1 %v165_v9  ;;  %v164_v15 = vmul.f32 %v5935_v11, %v5935_v11 }
  0xca   :  { %v141_v13 = vpop.f32.mrf.mxu0 }
  0xcb   :  { %156 = vadd.xlane.f32.xlu0 %v5935_v11  ;;  %v5940_v14 = vadd.f32 %v4660_v5, %v141_v13  ;;  %v167_v17 = vmul.f32 %v5937_v12, %v5937_v12 }
  0xcd   :  { %162 = vadd.xlane.f32.xlu1 %v5937_v12  ;;  %v166_v16 = vmul.f32 %v5940_v14, %v5940_v14 }
  0xcf   :  { %168 = vadd.xlane.f32.xlu0 %v164_v15 }
  0xd1   :  { %160 = vadd.xlane.f32.xlu1 %v5940_v14 }
  0xd3   :  { %172 = vadd.xlane.f32.xlu0 %v166_v16 }
  0xd5   :  { %174 = vadd.xlane.f32.xlu1 %v167_v17 }
 0x150   :  { %v159_v21 = vpop.xlane.xlu0 %158 }
 0x151   :  { %v177_v22 = vmul.f32 0.0078125, %v159_v21 }
 0x152   :  { %v171_v23 = vpop.xlane.xlu1 %170 }
 0x153   :  { %v185_v24 = vmul.f32 %v177_v22, %v177_v22  ;;  %v181_v25 = vmul.f32 0.0078125, %v171_v23  ;;  %v197_v58 = vsub.f32 %v5930_v7, %v177_v22 }
 0x154   :  { %v157_v26 = vpop.xlane.xlu0 %156 }
 0x155   :  { %v189_v27 = vsub.f32 %v181_v25, %v185_v24  ;;  %v176_v28 = vmul.f32 0.0078125, %v157_v26 }
 0x156   :  { %v163_v29 = vpop.xlane.xlu1 %162 }
 0x157   :  { %v193_v30 = vmax.f32 %v189_v27, 0.0  ;;  %v184_v33 = vmul.f32 %v176_v28, %v176_v28  ;;  %v179_v36 = vmul.f32 0.0078125, %v163_v29  ;;  %v196_v60 = vsub.f32 %v5935_v11, %v176_v28 }
 0x158   :  { %v169_v31 = vpop.xlane.xlu0 %168 }
 0x159   :  { %v201_v32 = vadd.f32 1e-05, %v193_v30  ;;  %v180_v34 = vmul.f32 0.0078125, %v169_v31  ;;  %v187_v44 = vmul.f32 %v179_v36, %v179_v36  ;;  %v199_v6 = vsub.f32 %v5937_v12, %v179_v36 }
 0x15a   :  { %v161_v35 = vpop.xlane.xlu1 %160 }
 0x15b   :  { %v188_v37 = vsub.f32 %v180_v34, %v184_v33  ;;  %v178_v38 = vmul.f32 0.0078125, %v161_v35  ;;  %5626 = vrsqrt.f32 %v201_v32 }
 0x15c   :  { %v173_v39 = vpop.xlane.xlu0 %172 }
 0x15d   :  { %v192_v40 = vmax.f32 %v188_v37, 0.0  ;;  %v186_v41 = vmul.f32 %v178_v38, %v178_v38  ;;  %v182_v42 = vmul.f32 0.0078125, %v173_v39  ;;  %v198_v1 = vsub.f32 %v5940_v14, %v178_v38 }
 0x15e   :  { %v175_v43 = vpop.xlane.xlu1 %174 }
 0x15f   :  { %v200_v45 = vadd.f32 1e-05, %v192_v40  ;;  %v190_v46 = vsub.f32 %v182_v42, %v186_v41  ;;  %v183_v47 = vmul.f32 0.0078125, %v175_v43 }
 0x161   :  { %5628 = vrsqrt.f32 %v200_v45  ;;  %v194_v48 = vmax.f32 %v190_v46, 0.0  ;;  %v191_v49 = vsub.f32 %v183_v47, %v187_v44 }
 0x163   :  { %v202_v51 = vadd.f32 1e-05, %v194_v48  ;;  %v195_v52 = vmax.f32 %v191_v49, 0.0 }
 0x165   :  { %5630 = vrsqrt.f32 %v202_v51  ;;  %v203_v53 = vadd.f32 1e-05, %v195_v52 }
 0x167   :  { %5632 = vrsqrt.f32 %v203_v53 }
 0x168   :  { %v5627_v56 = vpop.eup %5626 }
 0x169   :  { %v209_v59 = vmul.f32 %v5627_v56, %v197_v58  ;;  %v6001_v56 = vld [vmem:[%s7579_s1] sm:$0xff]  ;;  %v6009_v58 = vld [vmem:[%s7579_s1 + $0x8] sm:$0xff] }
 0x16b   :  { %v217_v3 = vmul.f32 %v215_v61, %v209_v59  ;;  %v6017_v59 = vld [vmem:[%s7579_s1 + $0x10] sm:$0xff] }
 0x16d   :  { %v5980_v16 = vadd.f32 %v223_v4, %v217_v3  ;;  %v5395_v3 = vld [vmem:[%s7582_s4 + $0x40] ss:$8 sps:$4 sm:$0xff]  }
 0x16e   :  { %v5629_v63 = vpop.eup %5628 }
 0x16f   :  { %v208_v0 = vmul.f32 %v5629_v63, %v196_v60  ;;  %v229_v22 = vmax.f32 %v5980_v16, 0.0  ;;  %v6025_v60 = vld [vmem:[%s7579_s1 + $0x18] sm:$0xff]  ;;  %v5389_v63 = vld [vmem:[%s7582_s4 + $0x60] ss:$8 sps:$4 sm:$0xff]  }
 0x171   :  { %v216_v2 = vmul.f32 %v215_v61, %v208_v0  ;;  %v233_v26 = vadd.f32 1e-07, %v229_v22  ;;  %v5394_v0 = vld [vmem:[%s7582_s4 + $0x54] ss:$8 sps:$4 sm:$0xff]  }
 0x172   :  { %v5631_v5 = vpop.eup %5630 }
 0x173   :  { %v210_v8 = vmul.f32 %v5631_v5, %v198_v1  ;;  %v5978_v9 = vadd.f32 %v223_v4, %v216_v2  ;;  %v5392_v1 = vld [vmem:[%s7582_s4 + $0x50] ss:$8 sps:$4 sm:$0xff]   ;;  %v5397_v2 = vld [vmem:[%s7582_s4 + $0x44] ss:$8 sps:$4 sm:$0xff]  }
 0x174   :  { %v5633_v10 = vpop.eup %5632  ;;  %v5398_v5 = vld [vmem:[%s7582_s4 + $0x30] ss:$8 sps:$4 sm:$0xff]  }
 0x175   :  { %v211_v13 = vmul.f32 %v5633_v10, %v199_v6  ;;  %v218_v15 = vmul.f32 %v215_v61, %v210_v8  ;;  %v228_v20 = vmax.f32 %v5978_v9, 0.0  ;;  %v5403_v6 = vld [vmem:[%s7582_s4 + $0x24] ss:$8 sps:$4 sm:$0xff]   ;;  %v5401_v8 = vld [vmem:[%s7582_s4 + $0x20] ss:$8 sps:$4 sm:$0xff]  }
 0x176   :  { %v5406_v10 = vld [vmem:[%s7582_s4 + $0x14] ss:$8 sps:$4 sm:$0xff]  }
 0x177   :  { %v219_v17 = vmul.f32 %v215_v61, %v211_v13  ;;  %v5982_v19 = vadd.f32 %v223_v4, %v218_v15  ;;  %v232_v25 = vadd.f32 1e-07, %v228_v20  ;;  %v5391_v61 = vld [vmem:[%s7582_s4 + $0x64] ss:$8 sps:$4 sm:$0xff]   ;;  %v5404_v13 = vld [vmem:[%s7582_s4 + $0x10] ss:$8 sps:$4 sm:$0xff]  }
 0x178   :  { %506 = vmatprep.subr.bf16.mxu0 %v5391_v61  ;;  %v5409_v15 = vld [vmem:[%s7582_s4 + $0x4] ss:$8 sps:$4 sm:$0xff]  }
 0x179   :  { %v5985_v21 = vadd.f32 %v223_v4, %v219_v17  ;;  %v230_v23 = vmax.f32 %v5982_v19, 0.0  ;;  %v236_v29 = vmax.f32 %v232_v25, %v233_v26  ;;  %507 = vmatpush1.bf16.msra.mxu0 %v5389_v63  ;;  %v5400_v4 = vld [vmem:[%s7582_s4 + $0x34] ss:$8 sps:$4 sm:$0xff]   ;;  %v5407_v17 = vld [vmem:[%s7582_s4] ss:$8 sps:$4 sm:$0xff]  }
 0x17a   :  { %508 = vmatprep.subr.bf16.mxu0 %v5394_v0 }
 0x17b   :  { %v231_v24 = vmax.f32 %v5985_v21, 0.0  ;;  %v234_v27 = vadd.f32 1e-07, %v230_v23 }
 0x17d   :  { %v235_v28 = vadd.f32 1e-07, %v231_v24  ;;  %509 = vmatpush1.bf16.msra.mxu0 %v5392_v1 }
 0x17e   :  { %510 = vmatprep.subr.bf16.mxu0 %v5397_v2 }
 0x17f   :  { %v237_v30 = vmax.f32 %v234_v27, %v235_v28 }
 0x181   :  { %v238_v31 = vmax.f32 %v236_v29, %v237_v30  ;;  %511 = vmatpush1.bf16.msra.mxu0 %v5395_v3 }
 0x182   :  { %512 = vmatprep.subr.bf16.mxu0 %v5400_v4 }
 0x183   :  { %v239_v32 = vrot.slane %v238_v31, 4 }
 0x185   :  { %v240_v33 = vmax.f32 %v238_v31, %v239_v32  ;;  %513 = vmatpush1.bf16.msra.mxu0 %v5398_v5 }
 0x186   :  { %514 = vmatprep.subr.bf16.mxu0 %v5403_v6 }
 0x187   :  { %v241_v34 = vrot.slane %v240_v33, 2 }
 0x189   :  { %v242_v35 = vmax.f32 %v240_v33, %v241_v34  ;;  %515 = vmatpush1.bf16.msra.mxu0 %v5401_v8 }
 0x18a   :  { %516 = vmatprep.subr.bf16.mxu0 %v5406_v10 }
 0x18b   :  { %v243_v36 = vrot.slane %v242_v35, 1 }
 0x18d   :  { %v244_v37 = vmax.f32 %v242_v35, %v243_v36  ;;  %517 = vmatpush1.bf16.msra.mxu0 %v5404_v13 }
 0x18e   :  { %518 = vmatprep.subr.bf16.mxu0 %v5409_v15 }
 0x18f   :  { %v247_v38 = vsub.f32 %v234_v27, %v244_v37  ;;  %v248_v39 = vsub.f32 %v235_v28, %v244_v37  ;;  %v246_v40 = vsub.f32 %v233_v26, %v244_v37  ;;  %v245_v41 = vsub.f32 %v232_v25, %v244_v37 }
 0x191   :  { %v255_v42 = vmul.f32 1.442695, %v248_v39  ;;  %v253_v43 = vmul.f32 1.442695, %v247_v38  ;;  %v251_v44 = vmul.f32 1.442695, %v246_v40  ;;  %519 = vmatpush1.bf16.msra.mxu0 %v5407_v17 }
 0x192   :  { %v249_v45 = vmul.f32 1.442695, %v245_v41 }
 0x193   :  { %5634 = vpow2.f32 %v255_v42 }
 0x194   :  { %5636 = vpow2.f32 %v253_v43 }
 0x195   :  { %5638 = vpow2.f32 %v251_v44 }
 0x196   :  { %5640 = vpow2.f32 %v249_v45 }
 0x1a0   :  { %v5635_v46 = vpop.eup %5634 }
 0x1a1   :  { %v5637_v47 = vpop.eup %5636  ;;  %v260_v48 = vmul.f32 %v5635_v46, %v235_v28 }
 0x1a2   :  { %v5639_v49 = vpop.eup %5638  ;;  %v259_v50 = vmul.f32 %v5637_v47, %v234_v27 }
 0x1a3   :  { %298 = vmatprep.subr.mxu1 %v260_v48  ;;  %v5641_v51 = vpop.eup %5640  ;;  %v258_v52 = vmul.f32 %v5639_v49, %v233_v26 }
 0x1a4   :  { %299 = vmatpush1.msra.mxu1 %v5635_v46  ;;  %v257_v53 = vmul.f32 %v5641_v51, %v232_v25  ;;  %v5849_v25 = vmov 0  }
 0x1a5   :  { %300 = vmatprep.subr.mxu1 %v259_v50  ;;  %536 = vmatprep.mubr.bf16.mxu0 %v5849_v25 }
 0x1a6   :  { %301 = vmatpush1.msra.mxu1 %v5637_v47 }
 0x1a7   :  { %302 = vmatprep.subr.mxu1 %v258_v52 }
 0x1a8   :  { %303 = vmatpush1.msra.mxu1 %v5639_v49 }
 0x1a9   :  { %304 = vmatprep.subr.mxu1 %v257_v53 }
 0x1aa   :  { %305 = vmatpush1.msra.mxu1 %v5641_v51 }
 0x1ab   :  { %4665 = vmatmul.mubr.msk.f32.vlgmr.msra.gmra.mxu1 %vm261_vm1, %v6001_v56 }
 0x1ac   :  { %344 = vmatprep.mubr.f32.mxu1 %v5848_v18 }
 0x1af   :  { %4666 = vmatmul.mubr.msk.f32.gmra.mxu1 %vm261_vm1, %v6009_v58 }
 0x1b0   :  { %350 = vmatprep.mubr.f32.mxu1 %v5848_v18 }
 0x1b3   :  { %4667 = vmatmul.mubr.msk.f32.gmra.mxu1 %vm261_vm1, %v6017_v59 }
 0x1b4   :  { %356 = vmatprep.mubr.f32.mxu1 %v5848_v18 }
 0x1b7   :  { %4668 = vmatmul.mubr.msk.f32.gmra.mxu1 %vm261_vm1, %v6025_v60 }
 0x26b   :  { %v340_v26 = vpop.f32.mrf.mxu1 }
 0x26c   :  { %v363_v27 = vmax.f32 %v340_v26, 1e-12  ;;  %vm371_vm2 = vcmp.gt.f32.partialorder %v340_v26, 0.0 }
 0x26d   :  { %v342_v28 = vpop.f32.mrf.mxu1 }
 0x26e   :  { %5642 = vrcp.f32 %v363_v27 }
 0x26f   :  { %v346_v29 = vpop.f32.mrf.mxu1 }
 0x270   :  { %v364_v30 = vmax.f32 %v346_v29, 1e-12  ;;  %vm372_vm3 = vcmp.gt.f32.partialorder %v346_v29, 0.0 }
 0x271   :  { %v348_v31 = vpop.f32.mrf.mxu1 }
 0x272   :  { %5644 = vrcp.f32 %v364_v30 }
 0x273   :  { %v352_v32 = vpop.f32.mrf.mxu1 }
 0x274   :  { %v365_v33 = vmax.f32 %v352_v32, 1e-12  ;;  %vm373_vm4 = vcmp.gt.f32.partialorder %v352_v32, 0.0 }
 0x275   :  { %v354_v34 = vpop.f32.mrf.mxu1 }
 0x276   :  { %5646 = vrcp.f32 %v365_v33 }
 0x277   :  { %v358_v35 = vpop.f32.mrf.mxu1 }
 0x278   :  { %v366_v36 = vmax.f32 %v358_v35, 1e-12  ;;  %vm374_vm5 = vcmp.gt.f32.partialorder %v358_v35, 0.0 }
 0x279   :  { %v360_v49 = vpop.f32.mrf.mxu1 }
 0x27a   :  { %5648 = vrcp.f32 %v366_v36 }
 0x27b   :  { %v5643_v37 = vpop.eup %5642 }
 0x27c   :  { %v375_v38 = vmul.f32 %v5643_v37, %v342_v28 }
 0x27e   :  { %v379_v40 = vsel %vm371_vm2, %v375_v38, 0.0 }
 0x27f   :  { %v5645_v39 = vpop.eup %5644  ;;  %v383_v44 = vadd.f32 %v379_v40, %v228_v20  ;;  %v6082_v20 = vsub.s32 4, %v5957_v54 }
 0x280   :  { %v376_v41 = vmul.f32 %v5645_v39, %v348_v31 }
 0x282   :  { %v380_v42 = vsel %vm372_vm3, %v376_v41, 0.0 }
 0x283   :  { %v5647_v43 = vpop.eup %5646  ;;  %v384_v45 = vadd.f32 %v380_v42, %v229_v22  ;;  %v6087_v22 = vld [vmem:[%s7585_s7] sm:$0x77] }
 0x284   :  { %v377_v46 = vmul.f32 %v5647_v43, %v354_v34  ;;  %v409_v61 = vrot.slane %v6087_v22, %v5960_v55  ;;  %v413_v19 = vrot.slane %v6087_v22, %v6082_v20 }
 0x285   :  { %v387_v47 = vpack.c.bf16 %v384_v45, %v383_v44  ;;  %v5410_v44 = vld [vmem:[%s7583_s5 + $0x78] sm:$0xff]  }
 0x286   :  { %v381_v50 = vsel %vm373_vm4, %v377_v46, 0.0  ;;  %v423_v21 = vrot.slane %v413_v19, %v5960_v55  ;;  %v5411_v45 = vld [vmem:[%s7583_s5 + $0x38] sm:$0xff]   ;;  %5138 = vmatprep.subr.bf16.mxu1 %v5410_v44  ;;  %v5412_v46 = vld [vmem:[%s7583_s5 + $0x70] sm:$0xff]   ;;  %v5423_v19 = vld [vmem:[%s7583_s5 + $0x8] sm:$0xff]  }
 0x287   :  { %v5649_v48 = vpop.eup %5648  ;;  %537 = vmatmul.mubr.bf16.vlgmr.msra.gmra.mxu0 %v387_v47  ;;  %v385_v53 = vadd.f32 %v381_v50, %v230_v23  ;;  %v419_v23 = vrot.slane %v409_v61, %v5960_v55  ;;  %5139 = vmatpush3.bf16.msra.mxu1 %v5411_v45  ;;  %v5413_v47 = vld [vmem:[%s7583_s5 + $0x30] sm:$0xff]   ;;  %v5416_v50 = vld [vmem:[%s7583_s5 + $0x60] sm:$0xff]   ;;  %v5422_v61 = vld [vmem:[%s7583_s5 + $0x48] sm:$0xff]   ;;  %v6184_v45 = vsub.s32 5, %v5957_v54 }
 0x288   :  { %v378_v51 = vmul.f32 %v5649_v48, %v360_v49  ;;  %546 = vmatprep.mubr.bf16.mxu0 %v5849_v25  ;;  %5140 = vmatprep.subr.bf16.mxu1 %v5412_v46  ;;  %v5414_v48 = vld [vmem:[%s7583_s5 + $0x68] sm:$0xff]  }
 0x289   :  { %v5415_v49 = vld [vmem:[%s7583_s5 + $0x28] sm:$0xff]  }
 0x28a   :  { %v382_v52 = vsel %vm374_vm5, %v378_v51, 0.0  ;;  %v5417_v51 = vld [vmem:[%s7583_s5 + $0x20] sm:$0xff]  }
 0x28b   :  { %v386_v9 = vadd.f32 %v382_v52, %v231_v24  ;;  %5141 = vmatpush3.bf16.msra.mxu1 %v5413_v47  ;;  %v5418_v52 = vld [vmem:[%s7583_s5 + $0x58] sm:$0xff]  }
 0x28c   :  { %5142 = vmatprep.subr.bf16.mxu1 %v5414_v48 }
 0x28d   :  { %v388_v16 = vpack.c.bf16 %v386_v9, %v385_v53  ;;  %v5419_v53 = vld [vmem:[%s7583_s5 + $0x18] sm:$0xff]   ;;  %v5420_v9 = vld [vmem:[%s7583_s5 + $0x50] sm:$0xff]  }
 0x28f   :  { %547 = vmatmul.mubr.bf16.gmra.mxu0 %v388_v16  ;;  %5143 = vmatpush3.bf16.msra.mxu1 %v5415_v49  ;;  %v5421_v16 = vld [vmem:[%s7583_s5 + $0x10] sm:$0xff]  }
 0x290   :  { %5144 = vmatprep.subr.bf16.mxu1 %v5416_v50 }
 0x293   :  { %5145 = vmatpush3.bf16.msra.mxu1 %v5417_v51  ;;  %v640_v51 = vrot.slane %v6087_v22, %v6184_v45 }
 0x294   :  { %5146 = vmatprep.subr.bf16.mxu1 %v5418_v52  ;;  %v6189_v52 = vsub.s32 2, %v5957_v54 }
 0x297   :  { %5147 = vmatpush3.bf16.msra.mxu1 %v5419_v53  ;;  %v6192_v53 = vsub.s32 6, %v5957_v54 }
 0x298   :  { %5148 = vmatprep.subr.bf16.mxu1 %v5420_v9 }
 0x29b   :  { %5149 = vmatpush3.bf16.msra.mxu1 %v5421_v16  ;;  %v636_v16 = vrot.slane %v6087_v22, %v5972_v62 }
 0x29c   :  { %5150 = vmatprep.subr.bf16.mxu1 %v5422_v61 }
 0x29d   :  { %v646_v54 = vrot.slane %v636_v16, %v5972_v62 }
 0x29f   :  { %5151 = vmatpush3.bf16.msra.mxu1 %v5423_v19  ;;  %v650_v19 = vrot.slane %v640_v51, %v5972_v62 }
 0x347   :  { %v538_v24 = vpop.f32.mrf.mxu0 }
 0x348   :  { %v6095_v0 = vadd.f32 %v538_v24, %v419_v23 }
 0x349   :  { %v540_v63 = vpop.f32.mrf.mxu0 }
 0x34a   :  { %v6097_v1 = vadd.f32 %v540_v63, %v423_v21  ;;  %v569_v10 = vmul.f32 %v6095_v0, %v6095_v0 }
 0x34b   :  { %v542_v2 = vpop.f32.mrf.mxu0 }
 0x34c   :  { %v557_v3 = vadd.f32 %v6097_v1, %v6095_v0  ;;  %v570_v4 = vmul.f32 %v6097_v1, %v6097_v1  ;;  %v6103_v6 = vadd.f32 %v542_v2, %v419_v23 }
 0x34d   :  { %v544_v5 = vpop.f32.mrf.mxu0 }
 0x34e   :  { %v6105_v8 = vadd.f32 %v544_v5, %v423_v21  ;;  %558 = vadd.xlane.f32.xlu0 %v557_v3  ;;  %v577_v17 = vadd.f32 %v570_v4, %v569_v10  ;;  %v571_v30 = vmul.f32 %v6103_v6, %v6103_v6 }
 0x34f   :  { %v548_v13 = vpop.f32.mrf.mxu0 }
 0x350   :  { %v560_v15 = vadd.f32 %v6105_v8, %v6103_v6  ;;  %v572_v26 = vmul.f32 %v6105_v8, %v6105_v8  ;;  %v6113_v28 = vadd.f32 %v548_v13, %v419_v23 }
 0x351   :  { %v550_v27 = vpop.f32.mrf.mxu0 }
 0x352   :  { %v6115_v29 = vadd.f32 %v550_v27, %v423_v21  ;;  %561 = vadd.xlane.f32.xlu1 %v560_v15  ;;  %578 = vadd.xlane.f32.xlu0 %v577_v17  ;;  %v580_v32 = vadd.f32 %v572_v26, %v571_v30  ;;  %v573_v38 = vmul.f32 %v6113_v28, %v6113_v28 }
 0x353   :  { %v552_v31 = vpop.f32.mrf.mxu0 }
 0x354   :  { %v563_v33 = vadd.f32 %v6115_v29, %v6113_v28  ;;  %v574_v34 = vmul.f32 %v6115_v29, %v6115_v29  ;;  %v6123_v36 = vadd.f32 %v552_v31, %v419_v23  ;;  %v5424_v23 = vld [vmem:[%s7583_s5 + $0x40] sm:$0xff]  }
 0x355   :  { %v554_v35 = vpop.f32.mrf.mxu0  ;;  %5152 = vmatprep.subr.bf16.mxu1 %v5424_v23  ;;  %v666_v23 = vrot.slane %v6087_v22, %v6192_v53 }
 0x356   :  { %v6125_v37 = vadd.f32 %v554_v35, %v423_v21  ;;  %581 = vadd.xlane.f32.xlu1 %v580_v32  ;;  %564 = vadd.xlane.f32.xlu0 %v563_v33  ;;  %v583_v40 = vadd.f32 %v574_v34, %v573_v38  ;;  %v575_v42 = vmul.f32 %v6123_v36, %v6123_v36  ;;  %v5425_v21 = vld [vmem:[%s7583_s5] sm:$0xff]  }
 0x357   :  { %5153 = vmatpush3.bf16.msra.mxu1 %v5425_v21  ;;  %v662_v21 = vrot.slane %v6087_v22, %v6189_v52 }
 0x358   :  { %v566_v39 = vadd.f32 %v6125_v37, %v6123_v36  ;;  %v576_v41 = vmul.f32 %v6125_v37, %v6125_v37 }
 0x35a   :  { %567 = vadd.xlane.f32.xlu1 %v566_v39  ;;  %584 = vadd.xlane.f32.xlu0 %v583_v40  ;;  %v586_v43 = vadd.f32 %v576_v41, %v575_v42 }
 0x35e   :  { %587 = vadd.xlane.f32.xlu1 %v586_v43 }
 0x3d7   :  { %v559_v24 = vpop.xlane.xlu0 %558 }
 0x3d8   :  { %v589_v63 = vmul.f32 0.00390625, %v559_v24 }
 0x3da   :  { %v597_v5 = vmul.f32 %v589_v63, %v589_v63  ;;  %v609_v24 = vsub.f32 %v6095_v0, %v589_v63 }
 0x3db   :  { %v562_v2 = vpop.xlane.xlu1 %561  ;;  %v579_v3 = vpop.xlane.xlu0 %578 }
 0x3dc   :  { %v590_v4 = vmul.f32 0.00390625, %v562_v2  ;;  %v593_v10 = vmul.f32 0.00390625, %v579_v3  ;;  %v610_v2 = vsub.f32 %v6097_v1, %v589_v63 }
 0x3de   :  { %v601_v13 = vsub.f32 %v593_v10, %v597_v5  ;;  %v598_v27 = vmul.f32 %v590_v4, %v590_v4 }
 0x3df   :  { %v582_v15 = vpop.xlane.xlu1 %581  ;;  %v565_v17 = vpop.xlane.xlu0 %564 }
 0x3e0   :  { %v605_v26 = vmax.f32 %v601_v13, 0.0  ;;  %v594_v30 = vmul.f32 0.00390625, %v582_v15  ;;  %v591_v31 = vmul.f32 0.00390625, %v565_v17  ;;  %v676_v13 = vrot.slane %v666_v23, %v6189_v52 }
 0x3e1   :  { %v672_v15 = vrot.slane %v662_v21, %v6189_v52  ;;  %v611_v17 = vsub.f32 %v6103_v6, %v590_v4 }
 0x3e2   :  { %v617_v32 = vadd.f32 1e-05, %v605_v26  ;;  %v602_v33 = vsub.f32 %v594_v30, %v598_v27  ;;  %v599_v35 = vmul.f32 %v591_v31, %v591_v31  ;;  %v612_v26 = vsub.f32 %v6105_v8, %v590_v4 }
 0x3e3   :  { %v568_v34 = vpop.xlane.xlu1 %567  ;;  %v585_v38 = vpop.xlane.xlu0 %584  ;;  %v613_v1 = vsub.f32 %v6113_v28, %v591_v31 }
 0x3e4   :  { %5650 = vrsqrt.f32 %v617_v32  ;;  %v606_v39 = vmax.f32 %v602_v33, 0.0  ;;  %v592_v40 = vmul.f32 0.00390625, %v568_v34  ;;  %v595_v41 = vmul.f32 0.00390625, %v585_v38 }
 0x3e5   :  { %v614_v33 = vsub.f32 %v6115_v29, %v591_v31 }
 0x3e6   :  { %v618_v42 = vadd.f32 1e-05, %v606_v39  ;;  %v603_v43 = vsub.f32 %v595_v41, %v599_v35  ;;  %v600_v47 = vmul.f32 %v592_v40, %v592_v40  ;;  %v616_v8 = vsub.f32 %v6125_v37, %v592_v40 }
 0x3e7   :  { %v588_v44 = vpop.xlane.xlu1 %587  ;;  %v615_v28 = vsub.f32 %v6123_v36, %v592_v40  ;;  %v732_v40 = vrot.slane %v5965_v57, %v6189_v52 }
 0x3e8   :  { %5652 = vrsqrt.f32 %v618_v42  ;;  %v607_v46 = vmax.f32 %v603_v43, 0.0  ;;  %v596_v48 = vmul.f32 0.00390625, %v588_v44 }
 0x3ea   :  { %v619_v49 = vadd.f32 1e-05, %v607_v46  ;;  %v604_v50 = vsub.f32 %v596_v48, %v600_v47 }
 0x3ec   :  { %5654 = vrsqrt.f32 %v619_v49  ;;  %v608_v9 = vmax.f32 %v604_v50, 0.0 }
 0x3ee   :  { %v620_v61 = vadd.f32 1e-05, %v608_v9 }
 0x3f0   :  { %5656 = vrsqrt.f32 %v620_v61 }
 0x3f1   :  { %v5651_v3 = vpop.eup %5650 }
 0x3f2   :  { %v625_v5 = vmul.f32 %v5651_v3, %v609_v24  ;;  %v626_v10 = vmul.f32 %v5651_v3, %v610_v2 }
 0x3f4   :  { %v652_v27 = vmul.f32 %v650_v19, %v626_v10  ;;  %v651_v22 = vmul.f32 %v646_v54, %v625_v5 }
 0x3f5   :  { %v5653_v30 = vpop.eup %5652 }
 0x3f6   :  { %v627_v0 = vmul.f32 %v5653_v30, %v611_v17  ;;  %v628_v32 = vmul.f32 %v5653_v30, %v612_v26  ;;  %v678_v63 = vadd.f32 %v676_v13, %v652_v27  ;;  %v677_v38 = vadd.f32 %v672_v15, %v651_v22 }
 0x3f8   :  { %v654_v34 = vmul.f32 %v650_v19, %v628_v32  ;;  %v653_v35 = vmul.f32 %v646_v54, %v627_v0  ;;  %v686_v4 = vmax.f32 %v678_v63, 0.0  ;;  %v685_v46 = vmax.f32 %v677_v38, 0.0 }
 0x3f9   :  { %v5655_v39 = vpop.eup %5654 }
 0x3fa   :  { %v680_v41 = vadd.f32 %v676_v13, %v654_v34  ;;  %v679_v42 = vadd.f32 %v672_v15, %v653_v35  ;;  %v630_v43 = vmul.f32 %v5655_v39, %v614_v33  ;;  %v629_v6 = vmul.f32 %v5655_v39, %v613_v1 }
 0x3fc   :  { %v688_v44 = vmax.f32 %v680_v41, 0.0  ;;  %v687_v47 = vmax.f32 %v679_v42, 0.0  ;;  %v656_v48 = vmul.f32 %v650_v19, %v630_v43  ;;  %v655_v50 = vmul.f32 %v646_v54, %v629_v6 }
 0x3fd   :  { %v5657_v49 = vpop.eup %5656 }
 0x3fe   :  { %v694_v29 = vpack.c.bf16 %v688_v44, %v686_v4  ;;  %v693_v31 = vpack.c.bf16 %v687_v47, %v685_v46  ;;  %v632_v51 = vmul.f32 %v5657_v49, %v616_v8  ;;  %v631_v9 = vmul.f32 %v5657_v49, %v615_v28 }
 0x3ff   :  { %v682_v61 = vadd.f32 %v676_v13, %v656_v48  ;;  %v681_v21 = vadd.f32 %v672_v15, %v655_v50 }
 0x400   :  { %861 = vmatprep.mubr.bf16.mxu1 %v694_v29  ;;  %v658_v16 = vmul.f32 %v650_v19, %v632_v51  ;;  %v657_v23 = vmul.f32 %v646_v54, %v631_v9 }
 0x401   :  { %862 = vmatmul.mubr.bf16.vlgmr.msra.gmra.mxu1 %v693_v31  ;;  %v690_v2 = vmax.f32 %v682_v61, 0.0  ;;  %v689_v5 = vmax.f32 %v681_v21, 0.0 }
 0x402   :  { %v684_v37 = vadd.f32 %v676_v13, %v658_v16  ;;  %v683_v24 = vadd.f32 %v672_v15, %v657_v23 }
 0x404   :  { %v692_v3 = vmax.f32 %v684_v37, 0.0  ;;  %v691_v10 = vmax.f32 %v683_v24, 0.0 }
 0x406   :  { %v696_v17 = vpack.c.bf16 %v692_v3, %v690_v2  ;;  %v695_v26 = vpack.c.bf16 %v691_v10, %v689_v5 }
 0x408   :  { %869 = vmatprep.mubr.bf16.mxu1 %v696_v17 }
 0x409   :  { %870 = vmatmul.mubr.bf16.gmra.mxu1 %v695_v26 }
 0x40a   :  { %1055 = vmatprep.mubr.f32.mxu1 %v5848_v18 }
 0x4c1   :  { %v5154_v36 = vpop.f32.mrf.mxu1 }
 0x4c3   :  { %v5155_v19 = vpop.f32.mrf.mxu1 }
 0x4c4   :  { %v5156_v27 = vadd.f32 %v5155_v19, %v5154_v36 }
 0x4c5   :  { %v5157_v54 = vpop.f32.mrf.mxu1 }
 0x4c6   :  { %v864_v22 = vadd.f32 %v5156_v27, %v732_v40 }
 0x4c7   :  { %v5158_v13 = vpop.f32.mrf.mxu1 }
 0x4c8   :  { %v6216_v15 = vadd.f32 %v864_v22, %v5935_v11  ;;  %v5159_v30 = vadd.f32 %v5158_v13, %v5157_v54  ;;  %v6242_v13 = vld [vmem:[%s7584_s6 + $0x4] sm:$0x7] }
 0x4c9   :  { %v5160_v0 = vpop.f32.mrf.mxu1 }
 0x4ca   :  { %v867_v32 = vadd.f32 %v5159_v30, %v732_v40  ;;  %886 = vadd.xlane.f32.xlu0 %v6216_v15  ;;  %v894_v57 = vmul.f32 %v6216_v15, %v6216_v15 }
 0x4cb   :  { %v5161_v1 = vpop.f32.mrf.mxu1 }
 0x4cc   :  { %v6220_v63 = vadd.f32 %v867_v32, %v5930_v7  ;;  %v5162_v33 = vadd.f32 %v5161_v1, %v5160_v0  ;;  %v945_v1 = vrot.slane %v6242_v13, %v5960_v55 }
 0x4cd   :  { %v5163_v34 = vpop.f32.mrf.mxu1 }
 0x4ce   :  { %v872_v35 = vadd.f32 %v5162_v33, %v732_v40  ;;  %888 = vadd.xlane.f32.xlu1 %v6220_v63  ;;  %898 = vadd.xlane.f32.xlu0 %v894_v57  ;;  %v895_v41 = vmul.f32 %v6220_v63, %v6220_v63 }
 0x4cf   :  { %v5164_v11 = vpop.f32.mrf.mxu1 }
 0x4d0   :  { %v6226_v38 = vadd.f32 %v872_v35, %v5940_v14  ;;  %v5165_v39 = vadd.f32 %v5164_v11, %v5163_v34 }
 0x4d2   :  { %v875_v42 = vadd.f32 %v5165_v39, %v732_v40  ;;  %900 = vadd.xlane.f32.xlu1 %v895_v41  ;;  %890 = vadd.xlane.f32.xlu0 %v6226_v38  ;;  %v896_v43 = vmul.f32 %v6226_v38, %v6226_v38 }
 0x4d4   :  { %v6232_v7 = vadd.f32 %v875_v42, %v5937_v12  ;;  %v953_v42 = vrot.slane %v6242_v13, %v5972_v62 }
 0x4d6   :  { %892 = vadd.xlane.f32.xlu1 %v6232_v7  ;;  %902 = vadd.xlane.f32.xlu0 %v896_v43  ;;  %v897_v14 = vmul.f32 %v6232_v7, %v6232_v7 }
 0x4da   :  { %904 = vadd.xlane.f32.xlu1 %v897_v14 }
 0x553   :  { %v887_v6 = vpop.xlane.xlu0 %886 }
 0x554   :  { %v906_v8 = vmul.f32 0.0078125, %v887_v6 }
 0x556   :  { %v914_v46 = vmul.f32 %v906_v8, %v906_v8  ;;  %v926_v30 = vsub.f32 %v6216_v15, %v906_v8 }
 0x557   :  { %v889_v4 = vpop.xlane.xlu1 %888  ;;  %v899_v44 = vpop.xlane.xlu0 %898 }
 0x558   :  { %v907_v47 = vmul.f32 0.0078125, %v889_v4  ;;  %v910_v48 = vmul.f32 0.0078125, %v899_v44 }
 0x55a   :  { %v918_v49 = vsub.f32 %v910_v48, %v914_v46  ;;  %v915_v50 = vmul.f32 %v907_v47, %v907_v47  ;;  %v927_v0 = vsub.f32 %v6220_v63, %v907_v47 }
 0x55b   :  { %v901_v12 = vpop.xlane.xlu1 %900  ;;  %v891_v28 = vpop.xlane.xlu0 %890 }
 0x55c   :  { %v922_v29 = vmax.f32 %v918_v49, 0.0  ;;  %v911_v31 = vmul.f32 0.0078125, %v901_v12  ;;  %v908_v51 = vmul.f32 0.0078125, %v891_v28 }
 0x55e   :  { %v930_v9 = vadd.f32 1e-05, %v922_v29  ;;  %v919_v16 = vsub.f32 %v911_v31, %v915_v50  ;;  %v916_v37 = vmul.f32 %v908_v51, %v908_v51  ;;  %v928_v35 = vsub.f32 %v6226_v38, %v908_v51 }
 0x55f   :  { %v893_v61 = vpop.xlane.xlu1 %892  ;;  %v903_v23 = vpop.xlane.xlu0 %902 }
 0x560   :  { %v923_v21 = vmax.f32 %v919_v16, 0.0  ;;  %v909_v24 = vmul.f32 0.0078125, %v893_v61  ;;  %v912_v2 = vmul.f32 0.0078125, %v903_v23  ;;  %5658 = vrsqrt.f32 %v930_v9 }
 0x562   :  { %v931_v3 = vadd.f32 1e-05, %v923_v21  ;;  %v920_v5 = vsub.f32 %v912_v2, %v916_v37  ;;  %v917_v17 = vmul.f32 %v909_v24, %v909_v24  ;;  %v929_v43 = vsub.f32 %v6232_v7, %v909_v24 }
 0x563   :  { %v905_v10 = vpop.xlane.xlu1 %904 }
 0x564   :  { %5660 = vrsqrt.f32 %v931_v3  ;;  %v924_v26 = vmax.f32 %v920_v5, 0.0  ;;  %v913_v36 = vmul.f32 0.0078125, %v905_v10 }
 0x566   :  { %v932_v40 = vadd.f32 1e-05, %v924_v26  ;;  %v921_v19 = vsub.f32 %v913_v36, %v917_v17 }
 0x568   :  { %5662 = vrsqrt.f32 %v932_v40  ;;  %v925_v27 = vmax.f32 %v921_v19, 0.0 }
 0x56a   :  { %v933_v54 = vadd.f32 1e-05, %v925_v27 }
 0x56c   :  { %5664 = vrsqrt.f32 %v933_v54 }
 0x56d   :  { %v5659_v22 = vpop.eup %5658 }
 0x56e   :  { %v938_v33 = vmul.f32 %v5659_v22, %v926_v30 }
 0x570   :  { %v946_v39 = vmul.f32 %v945_v1, %v938_v33 }
 0x571   :  { %v5661_v32 = vpop.eup %5660 }
 0x572   :  { %v939_v57 = vmul.f32 %v5661_v32, %v927_v0  ;;  %v6254_v44 = vadd.f32 %v953_v42, %v946_v39  ;;  %v5437_v39 = vld [vmem:[%s7582_s4 + $0xc4] ss:$8 sps:$4 sm:$0xff]  }
 0x574   :  { %v947_v34 = vmul.f32 %v945_v1, %v939_v57  ;;  %v958_v12 = vmax.f32 %v6254_v44, 0.0 }
 0x575   :  { %v5663_v11 = vpop.eup %5662 }
 0x576   :  { %v940_v41 = vmul.f32 %v5663_v11, %v928_v35  ;;  %v6252_v6 = vadd.f32 %v953_v42, %v947_v34  ;;  %v962_v31 = vadd.f32 1e-07, %v958_v12  ;;  %v5428_v35 = vld [vmem:[%s7582_s4 + $0xf4] ss:$8 sps:$4 sm:$0xff]   ;;  %v5426_v11 = vld [vmem:[%s7582_s4 + $0xf0] ss:$8 sps:$4 sm:$0xff]  }
 0x578   :  { %v948_v14 = vmul.f32 %v945_v1, %v940_v41  ;;  %v959_v48 = vmax.f32 %v6252_v6, 0.0  ;;  %v5435_v41 = vld [vmem:[%s7582_s4 + $0xc0] ss:$8 sps:$4 sm:$0xff]  }
 0x579   :  { %v5665_v8 = vpop.eup %5664 }
 0x57a   :  { %v941_v4 = vmul.f32 %v5665_v8, %v929_v43  ;;  %v6256_v46 = vadd.f32 %v953_v42, %v948_v14  ;;  %v963_v29 = vadd.f32 1e-07, %v959_v48  ;;  %v5438_v43 = vld [vmem:[%s7582_s4 + $0xb0] ss:$8 sps:$4 sm:$0xff]   ;;  %v5443_v14 = vld [vmem:[%s7582_s4 + $0xa4] ss:$8 sps:$4 sm:$0xff]  }
 0x57b   :  { %v5441_v8 = vld [vmem:[%s7582_s4 + $0xa0] ss:$8 sps:$4 sm:$0xff]  }
 0x57c   :  { %v949_v47 = vmul.f32 %v945_v1, %v941_v4  ;;  %v960_v28 = vmax.f32 %v6256_v46, 0.0  ;;  %v966_v16 = vmax.f32 %v962_v31, %v963_v29  ;;  %v5446_v4 = vld [vmem:[%s7582_s4 + $0x94] ss:$8 sps:$4 sm:$0xff]  }
 0x57e   :  { %v6259_v49 = vadd.f32 %v953_v42, %v949_v47  ;;  %v964_v51 = vadd.f32 1e-07, %v960_v28  ;;  %v5440_v42 = vld [vmem:[%s7582_s4 + $0xb4] ss:$8 sps:$4 sm:$0xff]   ;;  %v5444_v47 = vld [vmem:[%s7582_s4 + $0x90] ss:$8 sps:$4 sm:$0xff]  }
 0x580   :  { %v961_v50 = vmax.f32 %v6259_v49, 0.0 }
 0x582   :  { %v965_v9 = vadd.f32 1e-07, %v961_v50 }
 0x584   :  { %v967_v61 = vmax.f32 %v964_v51, %v965_v9 }
 0x586   :  { %v968_v23 = vmax.f32 %v966_v16, %v967_v61 }
 0x588   :  { %v969_v21 = vrot.slane %v968_v23, 4 }
 0x58a   :  { %v970_v37 = vmax.f32 %v968_v23, %v969_v21 }
 0x58c   :  { %v971_v24 = vrot.slane %v970_v37, 2 }
 0x58e   :  { %v972_v2 = vmax.f32 %v970_v37, %v971_v24 }
 0x590   :  { %v973_v3 = vrot.slane %v972_v2, 1 }
 0x592   :  { %v974_v5 = vmax.f32 %v972_v2, %v973_v3 }
 0x594   :  { %v978_v10 = vsub.f32 %v965_v9, %v974_v5  ;;  %v977_v17 = vsub.f32 %v964_v51, %v974_v5  ;;  %v976_v26 = vsub.f32 %v963_v29, %v974_v5  ;;  %v975_v36 = vsub.f32 %v962_v31, %v974_v5 }
 0x596   :  { %v985_v40 = vmul.f32 1.442695, %v978_v10  ;;  %v983_v19 = vmul.f32 1.442695, %v977_v17  ;;  %v981_v27 = vmul.f32 1.442695, %v976_v26 }
 0x597   :  { %v979_v54 = vmul.f32 1.442695, %v975_v36 }
 0x598   :  { %5666 = vpow2.f32 %v985_v40 }
 0x599   :  { %5668 = vpow2.f32 %v983_v19 }
 0x59a   :  { %5670 = vpow2.f32 %v981_v27 }
 0x59b   :  { %5672 = vpow2.f32 %v979_v54 }
 0x5a5   :  { %v5667_v22 = vpop.eup %5666 }
 0x5a6   :  { %v5669_v30 = vpop.eup %5668  ;;  %v990_v0 = vmul.f32 %v5667_v22, %v965_v9 }
 0x5a7   :  { %v5671_v32 = vpop.eup %5670  ;;  %v989_v1 = vmul.f32 %v5669_v30, %v964_v51 }
 0x5a8   :  { %1015 = vmatprep.subr.mxu1 %v990_v0  ;;  %v5673_v33 = vpop.eup %5672  ;;  %v988_v57 = vmul.f32 %v5671_v32, %v963_v29  ;;  %v5449_v29 = vld [vmem:[%s7582_s4 + $0x84] ss:$8 sps:$4 sm:$0xff]  }
 0x5a9   :  { %1016 = vmatpush1.msra.mxu1 %v5667_v22  ;;  %v987_v34 = vmul.f32 %v5673_v33, %v962_v31  ;;  %v5447_v31 = vld [vmem:[%s7582_s4 + $0x80] ss:$8 sps:$4 sm:$0xff]  }
 0x5aa   :  { %1017 = vmatprep.subr.mxu1 %v989_v1 }
 0x5ab   :  { %1018 = vmatpush1.msra.mxu1 %v5669_v30 }
 0x5ac   :  { %1019 = vmatprep.subr.mxu1 %v988_v57 }
 0x5ad   :  { %1020 = vmatpush1.msra.mxu1 %v5671_v32 }
 0x5ae   :  { %1021 = vmatprep.subr.mxu1 %v987_v34 }
 0x5af   :  { %1022 = vmatpush1.msra.mxu1 %v5673_v33 }
 0x5b0   :  { %4703 = vmatmul.mubr.msk.f32.vlgmr.msra.gmra.mxu1 %vm261_vm1, %v6001_v56  ;;  %1222 = vmatprep.subr.bf16.mxu1 %v5428_v35  ;;  %v5431_v56 = vld [vmem:[%s7582_s4 + $0xe4] ss:$8 sps:$4 sm:$0xff]  }
 0x5b1   :  { %1061 = vmatprep.mubr.f32.mxu1 %v5848_v18  ;;  %1223 = vmatpush1.bf16.msra.mxu1 %v5426_v11 }
 0x5b2   :  { %1224 = vmatprep.subr.bf16.mxu1 %v5431_v56 }
 0x5b4   :  { %4704 = vmatmul.mubr.msk.f32.gmra.mxu1 %vm261_vm1, %v6009_v58  ;;  %v5429_v58 = vld [vmem:[%s7582_s4 + $0xe0] ss:$8 sps:$4 sm:$0xff]  }
 0x5b5   :  { %1067 = vmatprep.mubr.f32.mxu1 %v5848_v18  ;;  %1225 = vmatpush1.bf16.msra.mxu1 %v5429_v58 }
 0x5b8   :  { %4705 = vmatmul.mubr.msk.f32.gmra.mxu1 %vm261_vm1, %v6017_v59  ;;  %v5434_v59 = vld [vmem:[%s7582_s4 + $0xd4] ss:$8 sps:$4 sm:$0xff]  }
 0x5b9   :  { %1073 = vmatprep.mubr.f32.mxu1 %v5848_v18  ;;  %1226 = vmatprep.subr.bf16.mxu1 %v5434_v59 }
 0x5bc   :  { %4706 = vmatmul.mubr.msk.f32.gmra.mxu1 %vm261_vm1, %v6025_v60  ;;  %v5432_v60 = vld [vmem:[%s7582_s4 + $0xd0] ss:$8 sps:$4 sm:$0xff]  }
 0x5bd   :  { %1254 = vmatprep.mubr.bf16.mxu1 %v5849_v25  ;;  %1227 = vmatpush1.bf16.msra.mxu1 %v5432_v60 }
 0x5be   :  { %1228 = vmatprep.subr.bf16.mxu1 %v5437_v39 }
 0x5c1   :  { %1229 = vmatpush1.bf16.msra.mxu1 %v5435_v41 }
 0x5c2   :  { %1230 = vmatprep.subr.bf16.mxu1 %v5440_v42 }
 0x5c5   :  { %1231 = vmatpush1.bf16.msra.mxu1 %v5438_v43 }
 0x5c6   :  { %1232 = vmatprep.subr.bf16.mxu1 %v5443_v14 }
 0x5c9   :  { %1233 = vmatpush1.bf16.msra.mxu1 %v5441_v8 }
 0x5ca   :  { %1234 = vmatprep.subr.bf16.mxu1 %v5446_v4 }
 0x5cd   :  { %1235 = vmatpush1.bf16.msra.mxu1 %v5444_v47 }
 0x5ce   :  { %1236 = vmatprep.subr.bf16.mxu1 %v5449_v29 }
 0x5d1   :  { %1237 = vmatpush1.bf16.msra.mxu1 %v5447_v31 }
 0x670   :  { %v1057_v51 = vpop.f32.mrf.mxu1 }
 0x671   :  { %v1080_v9 = vmax.f32 %v1057_v51, 1e-12  ;;  %vm1088_vm6 = vcmp.gt.f32.partialorder %v1057_v51, 0.0 }
 0x672   :  { %v1059_v16 = vpop.f32.mrf.mxu1 }
 0x673   :  { %5674 = vrcp.f32 %v1080_v9 }
 0x674   :  { %v1063_v61 = vpop.f32.mrf.mxu1 }
 0x675   :  { %v1081_v23 = vmax.f32 %v1063_v61, 1e-12  ;;  %vm1089_vm7 = vcmp.gt.f32.partialorder %v1063_v61, 0.0 }
 0x676   :  { %v1065_v21 = vpop.f32.mrf.mxu1 }
 0x677   :  { %5676 = vrcp.f32 %v1081_v23 }
 0x678   :  { %v1069_v37 = vpop.f32.mrf.mxu1 }
 0x679   :  { %v1082_v24 = vmax.f32 %v1069_v37, 1e-12  ;;  %vm1090_vm8 = vcmp.gt.f32.partialorder %v1069_v37, 0.0 }
 0x67a   :  { %v1071_v2 = vpop.f32.mrf.mxu1 }
 0x67b   :  { %5678 = vrcp.f32 %v1082_v24 }
 0x67c   :  { %v1075_v3 = vpop.f32.mrf.mxu1 }
 0x67d   :  { %v1083_v5 = vmax.f32 %v1075_v3, 1e-12  ;;  %vm1091_vm9 = vcmp.gt.f32.partialorder %v1075_v3, 0.0 }
 0x67e   :  { %v1077_v1 = vpop.f32.mrf.mxu1 }
 0x67f   :  { %5680 = vrcp.f32 %v1083_v5 }
 0x680   :  { %v5675_v10 = vpop.eup %5674 }
 0x681   :  { %v1092_v17 = vmul.f32 %v5675_v10, %v1059_v16 }
 0x683   :  { %v1096_v36 = vsel %vm1088_vm6, %v1092_v17, 0.0 }
 0x684   :  { %v5677_v26 = vpop.eup %5676  ;;  %v1100_v54 = vadd.f32 %v1096_v36, %v958_v12 }
 0x685   :  { %v1093_v40 = vmul.f32 %v5677_v26, %v1065_v21 }
 0x687   :  { %v1097_v19 = vsel %vm1089_vm7, %v1093_v40, 0.0 }
 0x688   :  { %v5679_v27 = vpop.eup %5678  ;;  %v1101_v22 = vadd.f32 %v1097_v19, %v959_v48  ;;  %v6345_v48 = vld [vmem:[%s7585_s7 + $0x8] sm:$0x77]  ;;  %v5450_v19 = vld [vmem:[%s7583_s5 + $0xf8] sm:$0xff]  }
 0x689   :  { %v1094_v30 = vmul.f32 %v5679_v27, %v1071_v2  ;;  %v1127_v12 = vrot.slane %v6345_v48, %v5960_v55  ;;  %v1131_v11 = vrot.slane %v6345_v48, %v6082_v20  ;;  %v5451_v27 = vld [vmem:[%s7583_s5 + $0xb8] sm:$0xff]   ;;  %5166 = vmatprep.subr.bf16.mxu0 %v5450_v19 }
 0x68a   :  { %v1104_v0 = vpack.c.bf16 %v1101_v22, %v1100_v54  ;;  %5167 = vmatpush3.bf16.msra.mxu0 %v5451_v27  ;;  %v5452_v54 = vld [vmem:[%s7583_s5 + $0xf0] sm:$0xff]  }
 0x68b   :  { %v1098_v33 = vsel %vm1090_vm8, %v1094_v30, 0.0  ;;  %v1137_v46 = vrot.slane %v1127_v12, %v5960_v55  ;;  %v1141_v49 = vrot.slane %v1131_v11, %v5960_v55  ;;  %v5453_v22 = vld [vmem:[%s7583_s5 + $0xb0] sm:$0xff]   ;;  %5168 = vmatprep.subr.bf16.mxu0 %v5452_v54  ;;  %v5454_v30 = vld [vmem:[%s7583_s5 + $0xe8] sm:$0xff]   ;;  %v5464_v12 = vld [vmem:[%s7583_s5 + $0xc0] sm:$0xff]  }
 0x68c   :  { %v5681_v32 = vpop.eup %5680  ;;  %1255 = vmatmul.mubr.bf16.vlgmr.msra.gmra.mxu1 %v1104_v0  ;;  %v1102_v35 = vadd.f32 %v1098_v33, %v960_v28  ;;  %v5455_v0 = vld [vmem:[%s7583_s5 + $0xa8] sm:$0xff]   ;;  %v5458_v33 = vld [vmem:[%s7583_s5 + $0xd8] sm:$0xff]   ;;  %v5465_v11 = vld [vmem:[%s7583_s5 + $0x80] sm:$0xff]  }
 0x68d   :  { %v1095_v57 = vmul.f32 %v5681_v32, %v1077_v1  ;;  %1264 = vmatprep.mubr.bf16.mxu1 %v5849_v25  ;;  %v5456_v32 = vld [vmem:[%s7583_s5 + $0xe0] sm:$0xff]  }
 0x68e   :  { %5169 = vmatpush3.bf16.msra.mxu0 %v5453_v22  ;;  %v5457_v1 = vld [vmem:[%s7583_s5 + $0xa0] sm:$0xff]  }
 0x68f   :  { %v1099_v34 = vsel %vm1091_vm9, %v1095_v57, 0.0  ;;  %5170 = vmatprep.subr.bf16.mxu0 %v5454_v30  ;;  %v5459_v57 = vld [vmem:[%s7583_s5 + $0x98] sm:$0xff]   ;;  %v1358_v30 = vrot.slane %v6345_v48, %v6184_v45 }
 0x690   :  { %v1103_v44 = vadd.f32 %v1099_v34, %v961_v50  ;;  %v5460_v34 = vld [vmem:[%s7583_s5 + $0xd0] sm:$0xff]  }
 0x692   :  { %v1105_v6 = vpack.c.bf16 %v1103_v44, %v1102_v35  ;;  %5171 = vmatpush3.bf16.msra.mxu0 %v5455_v0  ;;  %v5461_v35 = vld [vmem:[%s7583_s5 + $0x90] sm:$0xff]   ;;  %v5462_v44 = vld [vmem:[%s7583_s5 + $0xc8] sm:$0xff]  }
 0x693   :  { %5172 = vmatprep.subr.bf16.mxu0 %v5456_v32  ;;  %v1354_v32 = vrot.slane %v6345_v48, %v5972_v62 }
 0x694   :  { %1265 = vmatmul.mubr.bf16.gmra.mxu1 %v1105_v6  ;;  %v5463_v6 = vld [vmem:[%s7583_s5 + $0x88] sm:$0xff]  }
 0x695   :  { %1774 = vmatprep.mubr.f32.mxu1 %v5848_v18 }
 0x696   :  { %5173 = vmatpush3.bf16.msra.mxu0 %v5457_v1 }
 0x697   :  { %5174 = vmatprep.subr.bf16.mxu0 %v5458_v33  ;;  %v1368_v33 = vrot.slane %v1358_v30, %v5972_v62 }
 0x69a   :  { %5175 = vmatpush3.bf16.msra.mxu0 %v5459_v57  ;;  %v1384_v57 = vrot.slane %v6345_v48, %v6192_v53 }
 0x69b   :  { %5176 = vmatprep.subr.bf16.mxu0 %v5460_v34  ;;  %v1380_v34 = vrot.slane %v6345_v48, %v6189_v52 }
 0x69e   :  { %5177 = vmatpush3.bf16.msra.mxu0 %v5461_v35 }
 0x69f   :  { %5178 = vmatprep.subr.bf16.mxu0 %v5462_v44 }
 0x6a2   :  { %5179 = vmatpush3.bf16.msra.mxu0 %v5463_v6  ;;  %v1364_v6 = vrot.slane %v1354_v32, %v5972_v62 }
 0x6a3   :  { %5180 = vmatprep.subr.bf16.mxu0 %v5464_v12 }
 0x6a6   :  { %5181 = vmatpush3.bf16.msra.mxu0 %v5465_v11 }
 0x74c   :  { %v1256_v28 = vpop.f32.mrf.mxu1 }
 0x74d   :  { %v6353_v56 = vadd.f32 %v1256_v28, %v1137_v46 }
 0x74e   :  { %v1258_v50 = vpop.f32.mrf.mxu1 }
 0x74f   :  { %v6355_v58 = vadd.f32 %v1258_v50, %v1141_v49  ;;  %v1287_v14 = vmul.f32 %v6353_v56, %v6353_v56 }
 0x750   :  { %v1260_v59 = vpop.f32.mrf.mxu1 }
 0x751   :  { %v1275_v60 = vadd.f32 %v6355_v58, %v6353_v56  ;;  %v1288_v39 = vmul.f32 %v6355_v58, %v6355_v58  ;;  %v6361_v42 = vadd.f32 %v1260_v59, %v1137_v46 }
 0x752   :  { %v1262_v41 = vpop.f32.mrf.mxu1 }
 0x753   :  { %v6363_v43 = vadd.f32 %v1262_v41, %v1141_v49  ;;  %1276 = vadd.xlane.f32.xlu0 %v1275_v60  ;;  %v1295_v47 = vadd.f32 %v1288_v39, %v1287_v14  ;;  %v1289_v16 = vmul.f32 %v6361_v42, %v6361_v42 }
 0x754   :  { %v1266_v8 = vpop.f32.mrf.mxu1 }
 0x755   :  { %v1278_v4 = vadd.f32 %v6363_v43, %v6361_v42  ;;  %v1290_v29 = vmul.f32 %v6363_v43, %v6363_v43  ;;  %v6371_v51 = vadd.f32 %v1266_v8, %v1137_v46 }
 0x756   :  { %v1268_v31 = vpop.f32.mrf.mxu1 }
 0x757   :  { %v6373_v9 = vadd.f32 %v1268_v31, %v1141_v49  ;;  %1279 = vadd.xlane.f32.xlu1 %v1278_v4  ;;  %1296 = vadd.xlane.f32.xlu0 %v1295_v47  ;;  %v1298_v23 = vadd.f32 %v1290_v29, %v1289_v16  ;;  %v1291_v5 = vmul.f32 %v6371_v51, %v6371_v51 }
 0x758   :  { %v1270_v61 = vpop.f32.mrf.mxu1 }
 0x759   :  { %v1281_v21 = vadd.f32 %v6373_v9, %v6371_v51  ;;  %v1292_v37 = vmul.f32 %v6373_v9, %v6373_v9  ;;  %v6381_v2 = vadd.f32 %v1270_v61, %v1137_v46 }
 0x75a   :  { %v1272_v24 = vpop.f32.mrf.mxu1 }
 0x75b   :  { %v6383_v3 = vadd.f32 %v1272_v24, %v1141_v49  ;;  %1299 = vadd.xlane.f32.xlu1 %v1298_v23  ;;  %1282 = vadd.xlane.f32.xlu0 %v1281_v21  ;;  %v1301_v17 = vadd.f32 %v1292_v37, %v1291_v5  ;;  %v1293_v36 = vmul.f32 %v6381_v2, %v6381_v2 }
 0x75d   :  { %v1284_v10 = vadd.f32 %v6383_v3, %v6381_v2  ;;  %v1294_v26 = vmul.f32 %v6383_v3, %v6383_v3 }
 0x75f   :  { %1285 = vadd.xlane.f32.xlu1 %v1284_v10  ;;  %1302 = vadd.xlane.f32.xlu0 %v1301_v17  ;;  %v1304_v40 = vadd.f32 %v1294_v26, %v1293_v36 }
 0x763   :  { %1305 = vadd.xlane.f32.xlu1 %v1304_v40 }
 0x7dc   :  { %v1277_v46 = vpop.xlane.xlu0 %1276 }
 0x7dd   :  { %v1307_v49 = vmul.f32 0.00390625, %v1277_v46 }
 0x7df   :  { %v1315_v60 = vmul.f32 %v1307_v49, %v1307_v49  ;;  %v1327_v35 = vsub.f32 %v6353_v56, %v1307_v49  ;;  %v1328_v44 = vsub.f32 %v6355_v58, %v1307_v49 }
 0x7e0   :  { %v1280_v28 = vpop.xlane.xlu1 %1279  ;;  %v1297_v50 = vpop.xlane.xlu0 %1296 }
 0x7e1   :  { %v1308_v59 = vmul.f32 0.00390625, %v1280_v28  ;;  %v1311_v39 = vmul.f32 0.00390625, %v1297_v50  ;;  %v1394_v28 = vrot.slane %v1384_v57, %v6189_v52  ;;  %v1390_v50 = vrot.slane %v1380_v34, %v6189_v52 }
 0x7e3   :  { %v1319_v41 = vsub.f32 %v1311_v39, %v1315_v60  ;;  %v1316_v47 = vmul.f32 %v1308_v59, %v1308_v59  ;;  %v1329_v60 = vsub.f32 %v6361_v42, %v1308_v59  ;;  %v1330_v39 = vsub.f32 %v6363_v43, %v1308_v59 }
 0x7e4   :  { %v1300_v14 = vpop.xlane.xlu1 %1299  ;;  %v1283_v8 = vpop.xlane.xlu0 %1282 }
 0x7e5   :  { %v1323_v4 = vmax.f32 %v1319_v41, 0.0  ;;  %v1312_v29 = vmul.f32 0.00390625, %v1300_v14  ;;  %v1309_v31 = vmul.f32 0.00390625, %v1283_v8 }
 0x7e7   :  { %v1335_v16 = vadd.f32 1e-05, %v1323_v4  ;;  %v1320_v61 = vsub.f32 %v1312_v29, %v1316_v47  ;;  %v1317_v21 = vmul.f32 %v1309_v31, %v1309_v31  ;;  %v1331_v58 = vsub.f32 %v6371_v51, %v1309_v31 }
 0x7e8   :  { %v1286_v23 = vpop.xlane.xlu1 %1285  ;;  %v1303_v37 = vpop.xlane.xlu0 %1302  ;;  %v1332_v4 = vsub.f32 %v6373_v9, %v1309_v31 }
 0x7e9   :  { %5682 = vrsqrt.f32 %v1335_v16  ;;  %v1324_v24 = vmax.f32 %v1320_v61, 0.0  ;;  %v1310_v5 = vmul.f32 0.00390625, %v1286_v23  ;;  %v1313_v10 = vmul.f32 0.00390625, %v1303_v37 }
 0x7eb   :  { %v1336_v17 = vadd.f32 1e-05, %v1324_v24  ;;  %v1321_v26 = vsub.f32 %v1313_v10, %v1317_v21  ;;  %v1318_v19 = vmul.f32 %v1310_v5, %v1310_v5  ;;  %v1334_v43 = vsub.f32 %v6383_v3, %v1310_v5 }
 0x7ec   :  { %v1306_v36 = vpop.xlane.xlu1 %1305  ;;  %v1333_v51 = vsub.f32 %v6381_v2, %v1310_v5  ;;  %v1451_v5 = vrot.slane %v6242_v13, %v6189_v52 }
 0x7ed   :  { %5684 = vrsqrt.f32 %v1336_v17  ;;  %v1325_v40 = vmax.f32 %v1321_v26, 0.0  ;;  %v1314_v27 = vmul.f32 0.00390625, %v1306_v36 }
 0x7ef   :  { %v1337_v54 = vadd.f32 1e-05, %v1325_v40  ;;  %v1322_v22 = vsub.f32 %v1314_v27, %v1318_v19 }
 0x7f1   :  { %5686 = vrsqrt.f32 %v1337_v54  ;;  %v1326_v0 = vmax.f32 %v1322_v22, 0.0 }
 0x7f3   :  { %v1338_v1 = vadd.f32 1e-05, %v1326_v0 }
 0x7f5   :  { %5688 = vrsqrt.f32 %v1338_v1 }
 0x7f6   :  { %v5683_v12 = vpop.eup %5682 }
 0x7f7   :  { %v1343_v11 = vmul.f32 %v5683_v12, %v1327_v35  ;;  %v1344_v46 = vmul.f32 %v5683_v12, %v1328_v44 }
 0x7f9   :  { %v1370_v41 = vmul.f32 %v1368_v33, %v1344_v46  ;;  %v1369_v48 = vmul.f32 %v1364_v6, %v1343_v11 }
 0x7fa   :  { %v5685_v14 = vpop.eup %5684 }
 0x7fb   :  { %v1345_v56 = vmul.f32 %v5685_v14, %v1329_v60  ;;  %v1346_v8 = vmul.f32 %v5685_v14, %v1330_v39  ;;  %v1396_v49 = vadd.f32 %v1394_v28, %v1370_v41  ;;  %v1395_v16 = vadd.f32 %v1390_v50, %v1369_v48 }
 0x7fd   :  { %v1372_v47 = vmul.f32 %v1368_v33, %v1346_v8  ;;  %v1371_v29 = vmul.f32 %v1364_v6, %v1345_v56  ;;  %v1404_v59 = vmax.f32 %v1396_v49, 0.0  ;;  %v1403_v10 = vmax.f32 %v1395_v16, 0.0 }
 0x7fe   :  { %v5687_v61 = vpop.eup %5686 }
 0x7ff   :  { %v1398_v23 = vadd.f32 %v1394_v28, %v1372_v47  ;;  %v1397_v21 = vadd.f32 %v1390_v50, %v1371_v29  ;;  %v1348_v37 = vmul.f32 %v5687_v61, %v1332_v4  ;;  %v1347_v42 = vmul.f32 %v5687_v61, %v1331_v58  ;;  %v5466_v61 = vld [vmem:[%s7582_s4 + $0x170] ss:$8 sps:$4 sm:$0xff]  }
 0x801   :  { %v1406_v24 = vmax.f32 %v1398_v23, 0.0  ;;  %v1405_v17 = vmax.f32 %v1397_v21, 0.0  ;;  %v1374_v26 = vmul.f32 %v1368_v33, %v1348_v37  ;;  %v1373_v40 = vmul.f32 %v1364_v6, %v1347_v42  ;;  %v5468_v23 = vld [vmem:[%s7582_s4 + $0x174] ss:$8 sps:$4 sm:$0xff]  }
 0x802   :  { %v5689_v36 = vpop.eup %5688  ;;  %1941 = vmatprep.subr.bf16.mxu0 %v5468_v23 }
 0x803   :  { %v1412_v9 = vpack.c.bf16 %v1406_v24, %v1404_v59  ;;  %v1411_v31 = vpack.c.bf16 %v1405_v17, %v1403_v10  ;;  %v1350_v19 = vmul.f32 %v5689_v36, %v1334_v43  ;;  %v1349_v27 = vmul.f32 %v5689_v36, %v1333_v51 }
 0x804   :  { %v1400_v22 = vadd.f32 %v1394_v28, %v1374_v26  ;;  %v1399_v0 = vadd.f32 %v1390_v50, %v1373_v40 }
 0x805   :  { %1580 = vmatprep.mubr.bf16.mxu0 %v1412_v9  ;;  %v1376_v54 = vmul.f32 %v1368_v33, %v1350_v19  ;;  %v1375_v30 = vmul.f32 %v1364_v6, %v1349_v27 }
 0x806   :  { %1581 = vmatmul.mubr.bf16.vlgmr.msra.gmra.mxu0 %v1411_v31  ;;  %v1408_v1 = vmax.f32 %v1400_v22, 0.0  ;;  %v1407_v34 = vmax.f32 %v1399_v0, 0.0 }
 0x807   :  { %v1402_v3 = vadd.f32 %v1394_v28, %v1376_v54  ;;  %v1401_v32 = vadd.f32 %v1390_v50, %v1375_v30  ;;  %1942 = vmatpush1.bf16.msra.mxu0 %v5466_v61 }
 0x809   :  { %v1410_v57 = vmax.f32 %v1402_v3, 0.0  ;;  %v1409_v35 = vmax.f32 %v1401_v32, 0.0 }
 0x80b   :  { %v1414_v44 = vpack.c.bf16 %v1410_v57, %v1408_v1  ;;  %v1413_v12 = vpack.c.bf16 %v1409_v35, %v1407_v34 }
 0x80d   :  { %1588 = vmatprep.mubr.bf16.mxu0 %v1414_v44 }
 0x80e   :  { %1589 = vmatmul.mubr.bf16.gmra.mxu0 %v1413_v12 }
 0x80f   :  { %1973 = vmatprep.mubr.bf16.mxu0 %v5849_v25 }
 0x8c6   :  { %v5182_v2 = vpop.f32.mrf.mxu0 }
 0x8c8   :  { %v5183_v33 = vpop.f32.mrf.mxu0 }
 0x8c9   :  { %v5184_v11 = vadd.f32 %v5183_v33, %v5182_v2 }
 0x8ca   :  { %v5185_v6 = vpop.f32.mrf.mxu0 }
 0x8cb   :  { %v1583_v46 = vadd.f32 %v5184_v11, %v1451_v5 }
 0x8cc   :  { %v5186_v28 = vpop.f32.mrf.mxu0 }
 0x8cd   :  { %v6465_v50 = vadd.f32 %v1583_v46, %v6216_v15  ;;  %v5187_v60 = vadd.f32 %v5186_v28, %v5185_v6  ;;  %v6497_v6 = vld [vmem:[%s7584_s6 + $0x8] sm:$0x7] }
 0x8ce   :  { %v5188_v39 = vpop.f32.mrf.mxu0 }
 0x8cf   :  { %v1586_v41 = vadd.f32 %v5187_v60, %v1451_v5  ;;  %1605 = vadd.xlane.f32.xlu0 %v6465_v50  ;;  %v1613_v13 = vmul.f32 %v6465_v50, %v6465_v50 }
 0x8d0   :  { %v5189_v48 = vpop.f32.mrf.mxu0 }
 0x8d1   :  { %v6469_v14 = vadd.f32 %v1586_v41, %v6220_v63  ;;  %v5190_v56 = vadd.f32 %v5189_v48, %v5188_v39  ;;  %v1664_v39 = vrot.slane %v6497_v6, %v5960_v55 }
 0x8d2   :  { %v5191_v8 = vpop.f32.mrf.mxu0 }
 0x8d3   :  { %v1591_v58 = vadd.f32 %v5190_v56, %v1451_v5  ;;  %1607 = vadd.xlane.f32.xlu1 %v6469_v14  ;;  %1617 = vadd.xlane.f32.xlu0 %v1613_v13  ;;  %v1614_v47 = vmul.f32 %v6469_v14, %v6469_v14 }
 0x8d4   :  { %v5192_v15 = vpop.f32.mrf.mxu0 }
 0x8d5   :  { %v6475_v49 = vadd.f32 %v1591_v58, %v6226_v38  ;;  %v5193_v4 = vadd.f32 %v5192_v15, %v5191_v8 }
 0x8d7   :  { %v1594_v29 = vadd.f32 %v5193_v4, %v1451_v5  ;;  %1619 = vadd.xlane.f32.xlu1 %v1614_v47  ;;  %1609 = vadd.xlane.f32.xlu0 %v6475_v49  ;;  %v1615_v16 = vmul.f32 %v6475_v49, %v6475_v49  ;;  %v1672_v4 = vrot.slane %v6497_v6, %v5972_v62 }
 0x8d9   :  { %v6481_v63 = vadd.f32 %v1594_v29, %v6232_v7 }
 0x8db   :  { %1611 = vadd.xlane.f32.xlu1 %v6481_v63  ;;  %1621 = vadd.xlane.f32.xlu0 %v1615_v16  ;;  %v1616_v38 = vmul.f32 %v6481_v63, %v6481_v63 }
 0x8df   :  { %1623 = vadd.xlane.f32.xlu1 %v1616_v38 }
 0x958   :  { %v1606_v7 = vpop.xlane.xlu0 %1605 }
 0x959   :  { %v1625_v21 = vmul.f32 0.0078125, %v1606_v7 }
 0x95b   :  { %v1633_v43 = vmul.f32 %v1625_v21, %v1625_v21  ;;  %v1645_v46 = vsub.f32 %v6465_v50, %v1625_v21 }
 0x95c   :  { %v1608_v37 = vpop.xlane.xlu1 %1607  ;;  %v1618_v42 = vpop.xlane.xlu0 %1617 }
 0x95d   :  { %v1626_v59 = vmul.f32 0.0078125, %v1608_v37  ;;  %v1629_v24 = vmul.f32 0.0078125, %v1618_v42 }
 0x95f   :  { %v1637_v10 = vsub.f32 %v1629_v24, %v1633_v43  ;;  %v1634_v36 = vmul.f32 %v1626_v59, %v1626_v59  ;;  %v1646_v28 = vsub.f32 %v6469_v14, %v1626_v59 }
 0x960   :  { %v1620_v17 = vpop.xlane.xlu1 %1619  ;;  %v1610_v26 = vpop.xlane.xlu0 %1609 }
 0x961   :  { %v1641_v51 = vmax.f32 %v1637_v10, 0.0  ;;  %v1630_v40 = vmul.f32 0.0078125, %v1620_v17  ;;  %v1627_v9 = vmul.f32 0.0078125, %v1610_v26 }
 0x963   :  { %v1649_v31 = vadd.f32 1e-05, %v1641_v51  ;;  %v1638_v19 = vsub.f32 %v1630_v40, %v1634_v36  ;;  %v1635_v30 = vmul.f32 %v1627_v9, %v1627_v9  ;;  %v1647_v13 = vsub.f32 %v6475_v49, %v1627_v9 }
 0x964   :  { %v1612_v27 = vpop.xlane.xlu1 %1611  ;;  %v1622_v54 = vpop.xlane.xlu0 %1621 }
 0x965   :  { %v1642_v22 = vmax.f32 %v1638_v19, 0.0  ;;  %v1628_v0 = vmul.f32 0.0078125, %v1612_v27  ;;  %v1631_v3 = vmul.f32 0.0078125, %v1622_v54  ;;  %5690 = vrsqrt.f32 %v1649_v31 }
 0x967   :  { %v1650_v32 = vadd.f32 1e-05, %v1642_v22  ;;  %v1639_v1 = vsub.f32 %v1631_v3, %v1635_v30  ;;  %v1636_v34 = vmul.f32 %v1628_v0, %v1628_v0  ;;  %v1648_v47 = vsub.f32 %v6481_v63, %v1628_v0 }
 0x968   :  { %v1624_v57 = vpop.xlane.xlu1 %1623 }
 0x969   :  { %5692 = vrsqrt.f32 %v1650_v32  ;;  %v1643_v35 = vmax.f32 %v1639_v1, 0.0  ;;  %v1632_v44 = vmul.f32 0.0078125, %v1624_v57 }
 0x96b   :  { %v1651_v12 = vadd.f32 1e-05, %v1643_v35  ;;  %v1640_v2 = vsub.f32 %v1632_v44, %v1636_v34 }
 0x96d   :  { %5694 = vrsqrt.f32 %v1651_v12  ;;  %v1644_v5 = vmax.f32 %v1640_v2, 0.0 }
 0x96f   :  { %v1652_v33 = vadd.f32 1e-05, %v1644_v5 }
 0x971   :  { %5696 = vrsqrt.f32 %v1652_v33 }
 0x972   :  { %v5691_v11 = vpop.eup %5690 }
 0x973   :  { %v1657_v41 = vmul.f32 %v5691_v11, %v1645_v46 }
 0x975   :  { %v1665_v58 = vmul.f32 %v1664_v39, %v1657_v41  ;;  %v6538_v41 = vld [vmem:[%s7579_s1 + $0x8] sm:$0xff] }
 0x976   :  { %v5693_v60 = vpop.eup %5692 }
 0x977   :  { %v1658_v48 = vmul.f32 %v5693_v60, %v1646_v28  ;;  %v6509_v23 = vadd.f32 %v1672_v4, %v1665_v58  ;;  %v5474_v58 = vld [vmem:[%s7582_s4 + $0x154] ss:$8 sps:$4 sm:$0xff]  }
 0x979   :  { %v1666_v56 = vmul.f32 %v1664_v39, %v1658_v48  ;;  %v1677_v43 = vmax.f32 %v6509_v23, 0.0  ;;  %v6546_v48 = vld [vmem:[%s7579_s1 + $0x10] sm:$0xff] }
 0x97a   :  { %v5695_v8 = vpop.eup %5694 }
 0x97b   :  { %v1659_v15 = vmul.f32 %v5695_v8, %v1647_v13  ;;  %v6507_v16 = vadd.f32 %v1672_v4, %v1666_v56  ;;  %v1681_v17 = vadd.f32 1e-07, %v1677_v43  ;;  %v6554_v56 = vld [vmem:[%s7579_s1 + $0x18] sm:$0xff]  ;;  %v5471_v13 = vld [vmem:[%s7582_s4 + $0x164] ss:$8 sps:$4 sm:$0xff]  }
 0x97c   :  { %v5469_v8 = vld [vmem:[%s7582_s4 + $0x160] ss:$8 sps:$4 sm:$0xff]   ;;  %1943 = vmatprep.subr.bf16.mxu0 %v5471_v13 }
 0x97d   :  { %v1667_v29 = vmul.f32 %v1664_v39, %v1659_v15  ;;  %v1678_v37 = vmax.f32 %v6507_v16, 0.0  ;;  %1944 = vmatpush1.bf16.msra.mxu0 %v5469_v8  ;;  %v5472_v15 = vld [vmem:[%s7582_s4 + $0x150] ss:$8 sps:$4 sm:$0xff]  }
 0x97e   :  { %v5697_v38 = vpop.eup %5696  ;;  %1945 = vmatprep.subr.bf16.mxu0 %v5474_v58 }
 0x97f   :  { %v1660_v61 = vmul.f32 %v5697_v38, %v1648_v47  ;;  %v6511_v7 = vadd.f32 %v1672_v4, %v1667_v29  ;;  %v1682_v10 = vadd.f32 1e-07, %v1678_v37  ;;  %v5475_v47 = vld [vmem:[%s7582_s4 + $0x140] ss:$8 sps:$4 sm:$0xff]   ;;  %v5480_v29 = vld [vmem:[%s7582_s4 + $0x134] ss:$8 sps:$4 sm:$0xff]  }
 0x980   :  { %v5478_v38 = vld [vmem:[%s7582_s4 + $0x130] ss:$8 sps:$4 sm:$0xff]  }
 0x981   :  { %v1668_v21 = vmul.f32 %v1664_v39, %v1660_v61  ;;  %v1679_v59 = vmax.f32 %v6511_v7, 0.0  ;;  %v1685_v51 = vmax.f32 %v1681_v17, %v1682_v10  ;;  %v6530_v39 = vld [vmem:[%s7579_s1] sm:$0xff]  ;;  %1946 = vmatpush1.bf16.msra.mxu0 %v5472_v15 }
 0x982   :  { %v5483_v61 = vld [vmem:[%s7582_s4 + $0x124] ss:$8 sps:$4 sm:$0xff]  }
 0x983   :  { %v6514_v42 = vadd.f32 %v1672_v4, %v1668_v21  ;;  %v1683_v26 = vadd.f32 1e-07, %v1679_v59  ;;  %v5477_v4 = vld [vmem:[%s7582_s4 + $0x144] ss:$8 sps:$4 sm:$0xff]   ;;  %v5481_v21 = vld [vmem:[%s7582_s4 + $0x120] ss:$8 sps:$4 sm:$0xff]  }
 0x984   :  { %1947 = vmatprep.subr.bf16.mxu0 %v5477_v4 }
 0x985   :  { %v1680_v24 = vmax.f32 %v6514_v42, 0.0  ;;  %1948 = vmatpush1.bf16.msra.mxu0 %v5475_v47 }
 0x986   :  { %1949 = vmatprep.subr.bf16.mxu0 %v5480_v29 }
 0x987   :  { %v1684_v36 = vadd.f32 1e-07, %v1680_v24 }
 0x989   :  { %v1686_v40 = vmax.f32 %v1683_v26, %v1684_v36  ;;  %1950 = vmatpush1.bf16.msra.mxu0 %v5478_v38 }
 0x98a   :  { %1951 = vmatprep.subr.bf16.mxu0 %v5483_v61 }
 0x98b   :  { %v1687_v9 = vmax.f32 %v1685_v51, %v1686_v40 }
 0x98d   :  { %v1688_v31 = vrot.slane %v1687_v9, 4  ;;  %1952 = vmatpush1.bf16.msra.mxu0 %v5481_v21 }
 0x98f   :  { %v1689_v19 = vmax.f32 %v1687_v9, %v1688_v31 }
 0x991   :  { %v1690_v27 = vrot.slane %v1689_v19, 2 }
 0x993   :  { %v1691_v54 = vmax.f32 %v1689_v19, %v1690_v27 }
 0x995   :  { %v1692_v22 = vrot.slane %v1691_v54, 1 }
 0x997   :  { %v1693_v30 = vmax.f32 %v1691_v54, %v1692_v22 }
 0x999   :  { %v1697_v0 = vsub.f32 %v1684_v36, %v1693_v30  ;;  %v1696_v3 = vsub.f32 %v1683_v26, %v1693_v30  ;;  %v1695_v32 = vsub.f32 %v1682_v10, %v1693_v30  ;;  %v1694_v1 = vsub.f32 %v1681_v17, %v1693_v30 }
 0x99b   :  { %v1704_v57 = vmul.f32 1.442695, %v1697_v0  ;;  %v1702_v34 = vmul.f32 1.442695, %v1696_v3  ;;  %v1700_v35 = vmul.f32 1.442695, %v1695_v32 }
 0x99c   :  { %v1698_v44 = vmul.f32 1.442695, %v1694_v1 }
 0x99d   :  { %5698 = vpow2.f32 %v1704_v57 }
 0x99e   :  { %5700 = vpow2.f32 %v1702_v34 }
 0x99f   :  { %5702 = vpow2.f32 %v1700_v35 }
 0x9a0   :  { %5704 = vpow2.f32 %v1698_v44 }
 0x9aa   :  { %v5699_v12 = vpop.eup %5698 }
 0x9ab   :  { %v5701_v2 = vpop.eup %5700  ;;  %v1709_v5 = vmul.f32 %v5699_v12, %v1684_v36  ;;  %v5487_v36 = vld [vmem:[%s7582_s4 + $0x100] ss:$8 sps:$4 sm:$0xff]  }
 0x9ac   :  { %v5703_v33 = vpop.eup %5702  ;;  %v1708_v11 = vmul.f32 %v5701_v2, %v1683_v26  ;;  %v5489_v26 = vld [vmem:[%s7582_s4 + $0x104] ss:$8 sps:$4 sm:$0xff]  }
 0x9ad   :  { %1734 = vmatprep.subr.mxu1 %v1709_v5  ;;  %v5705_v46 = vpop.eup %5704  ;;  %v1707_v28 = vmul.f32 %v5703_v33, %v1682_v10  ;;  %v5486_v10 = vld [vmem:[%s7582_s4 + $0x114] ss:$8 sps:$4 sm:$0xff]  }
 0x9ae   :  { %1735 = vmatpush1.msra.mxu1 %v5699_v12  ;;  %v1706_v60 = vmul.f32 %v5705_v46, %v1681_v17  ;;  %v5484_v17 = vld [vmem:[%s7582_s4 + $0x110] ss:$8 sps:$4 sm:$0xff]   ;;  %1953 = vmatprep.subr.bf16.mxu0 %v5486_v10 }
 0x9af   :  { %1736 = vmatprep.subr.mxu1 %v1708_v11  ;;  %1954 = vmatpush1.bf16.msra.mxu0 %v5484_v17 }
 0x9b0   :  { %1737 = vmatpush1.msra.mxu1 %v5701_v2  ;;  %1955 = vmatprep.subr.bf16.mxu0 %v5489_v26 }
 0x9b1   :  { %1738 = vmatprep.subr.mxu1 %v1707_v28 }
 0x9b2   :  { %1739 = vmatpush1.msra.mxu1 %v5703_v33 }
 0x9b3   :  { %1740 = vmatprep.subr.mxu1 %v1706_v60  ;;  %1956 = vmatpush1.bf16.msra.mxu0 %v5487_v36 }
 0x9b4   :  { %1741 = vmatpush1.msra.mxu1 %v5705_v46 }
 0x9b5   :  { %4789 = vmatmul.mubr.msk.f32.vlgmr.msra.gmra.mxu1 %vm261_vm1, %v6530_v39 }
 0x9b6   :  { %1780 = vmatprep.mubr.f32.mxu1 %v5848_v18 }
 0x9b9   :  { %4790 = vmatmul.mubr.msk.f32.gmra.mxu1 %vm261_vm1, %v6538_v41 }
 0x9ba   :  { %1786 = vmatprep.mubr.f32.mxu1 %v5848_v18 }
 0x9bd   :  { %4791 = vmatmul.mubr.msk.f32.gmra.mxu1 %vm261_vm1, %v6546_v48 }
 0x9be   :  { %1792 = vmatprep.mubr.f32.mxu1 %v5848_v18 }
 0x9c1   :  { %4792 = vmatmul.mubr.msk.f32.gmra.mxu1 %vm261_vm1, %v6554_v56 }
 0xa75   :  { %v1776_v51 = vpop.f32.mrf.mxu1 }
 0xa76   :  { %v1799_v40 = vmax.f32 %v1776_v51, 1e-12  ;;  %vm1807_vm10 = vcmp.gt.f32.partialorder %v1776_v51, 0.0 }
 0xa77   :  { %v1778_v9 = vpop.f32.mrf.mxu1 }
 0xa78   :  { %5706 = vrcp.f32 %v1799_v40 }
 0xa79   :  { %v1782_v31 = vpop.f32.mrf.mxu1 }
 0xa7a   :  { %v1800_v19 = vmax.f32 %v1782_v31, 1e-12  ;;  %vm1808_vm11 = vcmp.gt.f32.partialorder %v1782_v31, 0.0 }
 0xa7b   :  { %v1784_v27 = vpop.f32.mrf.mxu1 }
 0xa7c   :  { %5708 = vrcp.f32 %v1800_v19 }
 0xa7d   :  { %v1788_v54 = vpop.f32.mrf.mxu1 }
 0xa7e   :  { %v1801_v22 = vmax.f32 %v1788_v54, 1e-12  ;;  %vm1809_vm12 = vcmp.gt.f32.partialorder %v1788_v54, 0.0 }
 0xa7f   :  { %v1790_v30 = vpop.f32.mrf.mxu1 }
 0xa80   :  { %5710 = vrcp.f32 %v1801_v22 }
 0xa81   :  { %v1794_v0 = vpop.f32.mrf.mxu1 }
 0xa82   :  { %v1802_v3 = vmax.f32 %v1794_v0, 1e-12  ;;  %vm1810_vm13 = vcmp.gt.f32.partialorder %v1794_v0, 0.0 }
 0xa83   :  { %v1796_v28 = vpop.f32.mrf.mxu1 }
 0xa84   :  { %5712 = vrcp.f32 %v1802_v3 }
 0xa85   :  { %v5707_v32 = vpop.eup %5706 }
 0xa86   :  { %v1811_v1 = vmul.f32 %v5707_v32, %v1778_v9 }
 0xa88   :  { %v1815_v34 = vsel %vm1807_vm10, %v1811_v1, 0.0 }
 0xa89   :  { %v5709_v57 = vpop.eup %5708  ;;  %v1819_v2 = vadd.f32 %v1815_v34, %v1677_v43 }
 0xa8a   :  { %v1812_v35 = vmul.f32 %v5709_v57, %v1784_v27 }
 0xa8c   :  { %v1816_v44 = vsel %vm1808_vm11, %v1812_v35, 0.0  ;;  %vm5850_vm11 = vmmov 0  }
 0xa8d   :  { %v5711_v12 = vpop.eup %5710  ;;  %v1820_v5 = vadd.f32 %v1816_v44, %v1678_v37  ;;  %v6613_v37 = vld [vmem:[%s7585_s7 + $0x10] sm:$0x77] }
 0xa8e   :  { %v1813_v33 = vmul.f32 %v5711_v12, %v1790_v30  ;;  %v1846_v43 = vrot.slane %v6613_v37, %v5960_v55  ;;  %v1850_v15 = vrot.slane %v6613_v37, %v6082_v20 }
 0xa8f   :  { %v1823_v11 = vpack.c.bf16 %v1820_v5, %v1819_v2 }
 0xa90   :  { %v1817_v60 = vsel %vm1809_vm12, %v1813_v33, 0.0  ;;  %v1856_v7 = vrot.slane %v1846_v43, %v5960_v55  ;;  %v1860_v42 = vrot.slane %v1850_v15, %v5960_v55  ;;  %v5490_v33 = vld [vmem:[%s7583_s5 + $0x178] sm:$0xff]   ;;  %v5500_v43 = vld [vmem:[%s7583_s5 + $0x150] sm:$0xff]   ;;  %vm4644_vm12 = vcmask 25600  }
 0xa91   :  { %v5713_v46 = vpop.eup %5712  ;;  %1974 = vmatmul.mubr.bf16.vlgmr.msra.gmra.mxu0 %v1823_v11  ;;  %v1821_v58 = vadd.f32 %v1817_v60, %v1679_v59  ;;  %v5491_v11 = vld [vmem:[%s7583_s5 + $0x138] sm:$0xff]   ;;  %5194 = vmatprep.subr.bf16.mxu1 %v5490_v33  ;;  %v5494_v60 = vld [vmem:[%s7583_s5 + $0x168] sm:$0xff]   ;;  %v5501_v15 = vld [vmem:[%s7583_s5 + $0x110] sm:$0xff]  }
 0xa92   :  { %v1814_v13 = vmul.f32 %v5713_v46, %v1796_v28  ;;  %1983 = vmatprep.mubr.bf16.mxu0 %v5849_v25  ;;  %5195 = vmatpush3.bf16.msra.mxu1 %v5491_v11  ;;  %v5492_v46 = vld [vmem:[%s7583_s5 + $0x170] sm:$0xff]  }
 0xa93   :  { %v5493_v28 = vld [vmem:[%s7583_s5 + $0x130] sm:$0xff]   ;;  %5196 = vmatprep.subr.bf16.mxu1 %v5492_v46 }
 0xa94   :  { %v1818_v8 = vsel %vm1810_vm13, %v1814_v13, 0.0  ;;  %v5495_v13 = vld [vmem:[%s7583_s5 + $0x128] sm:$0xff]  }
 0xa95   :  { %v1822_v23 = vadd.f32 %v1818_v8, %v1680_v24  ;;  %v5496_v8 = vld [vmem:[%s7583_s5 + $0x160] sm:$0xff]  }
 0xa96   :  { %5197 = vmatpush3.bf16.msra.mxu1 %v5493_v28 }
 0xa97   :  { %v1824_v16 = vpack.c.bf16 %v1822_v23, %v1821_v58  ;;  %5198 = vmatprep.subr.bf16.mxu1 %v5494_v60  ;;  %v5497_v58 = vld [vmem:[%s7583_s5 + $0x120] sm:$0xff]   ;;  %v5498_v23 = vld [vmem:[%s7583_s5 + $0x158] sm:$0xff]  }
 0xa99   :  { %1984 = vmatmul.mubr.bf16.gmra.mxu0 %v1824_v16  ;;  %v5499_v16 = vld [vmem:[%s7583_s5 + $0x118] sm:$0xff]  }
 0xa9a   :  { %2493 = vmatprep.mubr.f32.mxu0 %v5848_v18  ;;  %5199 = vmatpush3.bf16.msra.mxu1 %v5495_v13 }
 0xa9b   :  { %5200 = vmatprep.subr.bf16.mxu1 %v5496_v8 }
 0xa9e   :  { %5201 = vmatpush3.bf16.msra.mxu1 %v5497_v58 }
 0xa9f   :  { %5202 = vmatprep.subr.bf16.mxu1 %v5498_v23  ;;  %v2077_v23 = vrot.slane %v6613_v37, %v6184_v45 }
 0xaa2   :  { %5203 = vmatpush3.bf16.msra.mxu1 %v5499_v16 }
 0xaa3   :  { %5204 = vmatprep.subr.bf16.mxu1 %v5500_v43  ;;  %v2073_v43 = vrot.slane %v6613_v37, %v5972_v62 }
 0xaa6   :  { %5205 = vmatpush3.bf16.msra.mxu1 %v5501_v15 }
 0xb51   :  { %v1975_v59 = vpop.f32.mrf.mxu0 }
 0xb52   :  { %v6621_v4 = vadd.f32 %v1975_v59, %v1856_v7  ;;  %v5504_v59 = vld [vmem:[%s7583_s5 + $0x140] sm:$0xff]  }
 0xb53   :  { %v1977_v24 = vpop.f32.mrf.mxu0 }
 0xb54   :  { %v6623_v47 = vadd.f32 %v1977_v24, %v1860_v42  ;;  %v2006_v26 = vmul.f32 %v6621_v4, %v6621_v4  ;;  %v5505_v24 = vld [vmem:[%s7583_s5 + $0x100] sm:$0xff]  }
 0xb55   :  { %v1979_v29 = vpop.f32.mrf.mxu0 }
 0xb56   :  { %v1994_v38 = vadd.f32 %v6623_v47, %v6621_v4  ;;  %v2007_v61 = vmul.f32 %v6623_v47, %v6623_v47  ;;  %v6629_v10 = vadd.f32 %v1979_v29, %v1856_v7 }
 0xb57   :  { %v1981_v21 = vpop.f32.mrf.mxu0 }
 0xb58   :  { %v6631_v17 = vadd.f32 %v1981_v21, %v1860_v42  ;;  %1995 = vadd.xlane.f32.xlu0 %v1994_v38  ;;  %v2014_v40 = vadd.f32 %v2007_v61, %v2006_v26  ;;  %v2008_v54 = vmul.f32 %v6629_v10, %v6629_v10 }
 0xb59   :  { %v1985_v36 = vpop.f32.mrf.mxu0 }
 0xb5a   :  { %v1997_v51 = vadd.f32 %v6631_v17, %v6629_v10  ;;  %v2009_v9 = vmul.f32 %v6631_v17, %v6631_v17  ;;  %v6639_v19 = vadd.f32 %v1985_v36, %v1856_v7 }
 0xb5b   :  { %v1987_v31 = vpop.f32.mrf.mxu0 }
 0xb5c   :  { %v6641_v27 = vadd.f32 %v1987_v31, %v1860_v42  ;;  %1998 = vadd.xlane.f32.xlu1 %v1997_v51  ;;  %2015 = vadd.xlane.f32.xlu0 %v2014_v40  ;;  %v2017_v30 = vadd.f32 %v2009_v9, %v2008_v54  ;;  %v2010_v34 = vmul.f32 %v6639_v19, %v6639_v19 }
 0xb5d   :  { %v1989_v22 = vpop.f32.mrf.mxu0 }
 0xb5e   :  { %v2000_v0 = vadd.f32 %v6641_v27, %v6639_v19  ;;  %v2011_v3 = vmul.f32 %v6641_v27, %v6641_v27  ;;  %v6649_v1 = vadd.f32 %v1989_v22, %v1856_v7  ;;  %v5502_v7 = vld [vmem:[%s7583_s5 + $0x148] sm:$0xff]  }
 0xb5f   :  { %v1991_v32 = vpop.f32.mrf.mxu0  ;;  %5206 = vmatprep.subr.bf16.mxu1 %v5502_v7  ;;  %v2087_v7 = vrot.slane %v2077_v23, %v5972_v62 }
 0xb60   :  { %v6651_v57 = vadd.f32 %v1991_v32, %v1860_v42  ;;  %2018 = vadd.xlane.f32.xlu1 %v2017_v30  ;;  %2001 = vadd.xlane.f32.xlu0 %v2000_v0  ;;  %v2020_v44 = vadd.f32 %v2011_v3, %v2010_v34  ;;  %v2012_v2 = vmul.f32 %v6649_v1, %v6649_v1  ;;  %v5503_v42 = vld [vmem:[%s7583_s5 + $0x108] sm:$0xff]  }
 0xb61   :  { %5207 = vmatpush3.bf16.msra.mxu1 %v5503_v42  ;;  %v2103_v42 = vrot.slane %v6613_v37, %v6192_v53 }
 0xb62   :  { %v2003_v35 = vadd.f32 %v6651_v57, %v6649_v1  ;;  %v2013_v12 = vmul.f32 %v6651_v57, %v6651_v57  ;;  %5208 = vmatprep.subr.bf16.mxu1 %v5504_v59  ;;  %v2099_v59 = vrot.slane %v6613_v37, %v6189_v52 }
 0xb64   :  { %2004 = vadd.xlane.f32.xlu1 %v2003_v35  ;;  %2021 = vadd.xlane.f32.xlu0 %v2020_v44  ;;  %v2023_v5 = vadd.f32 %v2013_v12, %v2012_v2 }
 0xb65   :  { %5209 = vmatpush3.bf16.msra.mxu1 %v5505_v24 }
 0xb68   :  { %2024 = vadd.xlane.f32.xlu1 %v2023_v5 }
 0xbe1   :  { %v1996_v29 = vpop.xlane.xlu0 %1995 }
 0xbe2   :  { %v2026_v38 = vmul.f32 0.00390625, %v1996_v29 }
 0xbe4   :  { %v2034_v36 = vmul.f32 %v2026_v38, %v2026_v38  ;;  %v2046_v24 = vsub.f32 %v6621_v4, %v2026_v38  ;;  %v2047_v29 = vsub.f32 %v6623_v47, %v2026_v38 }
 0xbe5   :  { %v1999_v61 = vpop.xlane.xlu1 %1998  ;;  %v2016_v21 = vpop.xlane.xlu0 %2015 }
 0xbe6   :  { %v2027_v26 = vmul.f32 0.00390625, %v1999_v61  ;;  %v2030_v51 = vmul.f32 0.00390625, %v2016_v21  ;;  %v2083_v61 = vrot.slane %v2073_v43, %v5972_v62 }
 0xbe8   :  { %v2038_v40 = vsub.f32 %v2030_v51, %v2034_v36  ;;  %v2035_v22 = vmul.f32 %v2027_v26, %v2027_v26 }
 0xbe9   :  { %v2019_v9 = vpop.xlane.xlu1 %2018  ;;  %v2002_v31 = vpop.xlane.xlu0 %2001 }
 0xbea   :  { %v2042_v54 = vmax.f32 %v2038_v40, 0.0  ;;  %v2031_v30 = vmul.f32 0.00390625, %v2019_v9  ;;  %v2028_v0 = vmul.f32 0.00390625, %v2002_v31  ;;  %v2113_v40 = vrot.slane %v2103_v42, %v6189_v52 }
 0xbeb   :  { %v2109_v9 = vrot.slane %v2099_v59, %v6189_v52  ;;  %v2048_v31 = vsub.f32 %v6629_v10, %v2027_v26 }
 0xbec   :  { %v2054_v3 = vadd.f32 1e-05, %v2042_v54  ;;  %v2039_v32 = vsub.f32 %v2031_v30, %v2035_v22  ;;  %v2036_v35 = vmul.f32 %v2028_v0, %v2028_v0  ;;  %v2049_v54 = vsub.f32 %v6631_v17, %v2027_v26 }
 0xbed   :  { %v2005_v34 = vpop.xlane.xlu1 %2004  ;;  %v2022_v44 = vpop.xlane.xlu0 %2021  ;;  %v2050_v47 = vsub.f32 %v6639_v19, %v2028_v0 }
 0xbee   :  { %5714 = vrsqrt.f32 %v2054_v3  ;;  %v2043_v12 = vmax.f32 %v2039_v32, 0.0  ;;  %v2029_v2 = vmul.f32 0.00390625, %v2005_v34  ;;  %v2032_v5 = vmul.f32 0.00390625, %v2022_v44 }
 0xbef   :  { %v2051_v32 = vsub.f32 %v6641_v27, %v2028_v0 }
 0xbf0   :  { %v2055_v33 = vadd.f32 1e-05, %v2043_v12  ;;  %v2040_v11 = vsub.f32 %v2032_v5, %v2036_v35  ;;  %v2037_v60 = vmul.f32 %v2029_v2, %v2029_v2  ;;  %v2053_v17 = vsub.f32 %v6651_v57, %v2029_v2 }
 0xbf1   :  { %v2025_v46 = vpop.xlane.xlu1 %2024  ;;  %v2052_v19 = vsub.f32 %v6649_v1, %v2029_v2  ;;  %v2170_v2 = vrot.slane %v6497_v6, %v6189_v52 }
 0xbf2   :  { %5716 = vrsqrt.f32 %v2055_v33  ;;  %v2044_v28 = vmax.f32 %v2040_v11, 0.0  ;;  %v2033_v13 = vmul.f32 0.00390625, %v2025_v46 }
 0xbf4   :  { %v2056_v8 = vadd.f32 1e-05, %v2044_v28  ;;  %v2041_v58 = vsub.f32 %v2033_v13, %v2037_v60 }
 0xbf6   :  { %5718 = vrsqrt.f32 %v2056_v8  ;;  %v2045_v16 = vmax.f32 %v2041_v58, 0.0 }
 0xbf8   :  { %v2057_v15 = vadd.f32 1e-05, %v2045_v16 }
 0xbfa   :  { %5720 = vrsqrt.f32 %v2057_v15 }
 0xbfb   :  { %v5715_v21 = vpop.eup %5714 }
 0xbfc   :  { %v2062_v36 = vmul.f32 %v5715_v21, %v2046_v24  ;;  %v2063_v51 = vmul.f32 %v5715_v21, %v2047_v29 }
 0xbfe   :  { %v2089_v22 = vmul.f32 %v2087_v7, %v2063_v51  ;;  %v2088_v37 = vmul.f32 %v2083_v61, %v2062_v36 }
 0xbff   :  { %v5717_v30 = vpop.eup %5716 }
 0xc00   :  { %v2064_v4 = vmul.f32 %v5717_v30, %v2048_v31  ;;  %v2065_v3 = vmul.f32 %v5717_v30, %v2049_v54  ;;  %v2115_v38 = vadd.f32 %v2113_v40, %v2089_v22  ;;  %v2114_v44 = vadd.f32 %v2109_v9, %v2088_v37 }
 0xc02   :  { %v2091_v34 = vmul.f32 %v2087_v7, %v2065_v3  ;;  %v2090_v35 = vmul.f32 %v2083_v61, %v2064_v4  ;;  %v2123_v26 = vmax.f32 %v2115_v38, 0.0  ;;  %v2122_v28 = vmax.f32 %v2114_v44, 0.0 }
 0xc03   :  { %v5719_v12 = vpop.eup %5718 }
 0xc04   :  { %v2117_v5 = vadd.f32 %v2113_v40, %v2091_v34  ;;  %v2116_v33 = vadd.f32 %v2109_v9, %v2090_v35  ;;  %v2067_v11 = vmul.f32 %v5719_v12, %v2051_v32  ;;  %v2066_v10 = vmul.f32 %v5719_v12, %v2050_v47 }
 0xc06   :  { %v2125_v46 = vmax.f32 %v2117_v5, 0.0  ;;  %v2124_v60 = vmax.f32 %v2116_v33, 0.0  ;;  %v2093_v13 = vmul.f32 %v2087_v7, %v2067_v11  ;;  %v2092_v58 = vmul.f32 %v2083_v61, %v2066_v10  ;;  %v5506_v10 = vld [vmem:[%s7582_s4 + $0x1f0] ss:$8 sps:$4 sm:$0xff]  }
 0xc07   :  { %v5721_v8 = vpop.eup %5720 }
 0xc08   :  { %v2131_v27 = vpack.c.bf16 %v2125_v46, %v2123_v26  ;;  %v2130_v0 = vpack.c.bf16 %v2124_v60, %v2122_v28  ;;  %v2069_v23 = vmul.f32 %v5721_v8, %v2053_v17  ;;  %v2068_v16 = vmul.f32 %v5721_v8, %v2052_v19  ;;  %v5508_v17 = vld [vmem:[%s7582_s4 + $0x1f4] ss:$8 sps:$4 sm:$0xff]  }
 0xc09   :  { %v2119_v15 = vadd.f32 %v2113_v40, %v2093_v13  ;;  %v2118_v59 = vadd.f32 %v2109_v9, %v2092_v58  ;;  %2660 = vmatprep.subr.bf16.mxu1 %v5508_v17 }
 0xc0a   :  { %2299 = vmatprep.mubr.bf16.mxu1 %v2131_v27  ;;  %v2095_v43 = vmul.f32 %v2087_v7, %v2069_v23  ;;  %v2094_v42 = vmul.f32 %v2083_v61, %v2068_v16 }
 0xc0b   :  { %2300 = vmatmul.mubr.bf16.vlgmr.msra.gmra.mxu1 %v2130_v0  ;;  %v2127_v29 = vmax.f32 %v2119_v15, 0.0  ;;  %v2126_v36 = vmax.f32 %v2118_v59, 0.0 }
 0xc0c   :  { %v2121_v57 = vadd.f32 %v2113_v40, %v2095_v43  ;;  %v2120_v24 = vadd.f32 %v2109_v9, %v2094_v42  ;;  %2661 = vmatpush1.bf16.msra.mxu1 %v5506_v10 }
 0xc0e   :  { %v2129_v21 = vmax.f32 %v2121_v57, 0.0  ;;  %v2128_v51 = vmax.f32 %v2120_v24, 0.0 }
 0xc10   :  { %v2133_v31 = vpack.c.bf16 %v2129_v21, %v2127_v29  ;;  %v2132_v54 = vpack.c.bf16 %v2128_v51, %v2126_v36 }
 0xc12   :  { %2307 = vmatprep.mubr.bf16.mxu1 %v2133_v31 }
 0xc13   :  { %2308 = vmatmul.mubr.bf16.gmra.mxu1 %v2132_v54 }
 0xc14   :  { %2692 = vmatprep.mubr.bf16.mxu1 %v5849_v25 }
 0xccb   :  { %v5210_v1 = vpop.f32.mrf.mxu1 }
 0xccd   :  { %v5211_v7 = vpop.f32.mrf.mxu1 }
 0xcce   :  { %v5212_v22 = vadd.f32 %v5211_v7, %v5210_v1 }
 0xccf   :  { %v5213_v61 = vpop.f32.mrf.mxu1 }
 0xcd0   :  { %v2302_v37 = vadd.f32 %v5212_v22, %v2170_v2 }
 0xcd1   :  { %v5214_v40 = vpop.f32.mrf.mxu1 }
 0xcd2   :  { %v6733_v9 = vadd.f32 %v2302_v37, %v6465_v50  ;;  %v5215_v30 = vadd.f32 %v5214_v40, %v5213_v61 }
 0xcd3   :  { %v5216_v4 = vpop.f32.mrf.mxu1 }
 0xcd4   :  { %v2305_v3 = vadd.f32 %v5215_v30, %v2170_v2  ;;  %2324 = vadd.xlane.f32.xlu0 %v6733_v9  ;;  %v2332_v6 = vmul.f32 %v6733_v9, %v6733_v9 }
 0xcd5   :  { %v5217_v47 = vpop.f32.mrf.mxu1 }
 0xcd6   :  { %v6737_v38 = vadd.f32 %v2305_v3, %v6469_v14  ;;  %v5218_v32 = vadd.f32 %v5217_v47, %v5216_v4  ;;  %v6765_v4 = vld [vmem:[%s7584_s6 + $0xc] sm:$0x7] }
 0xcd7   :  { %v5219_v34 = vpop.f32.mrf.mxu1 }
 0xcd8   :  { %v2310_v35 = vadd.f32 %v5218_v32, %v2170_v2  ;;  %2326 = vadd.xlane.f32.xlu1 %v6737_v38  ;;  %2336 = vadd.xlane.f32.xlu0 %v2332_v6  ;;  %v2333_v5 = vmul.f32 %v6737_v38, %v6737_v38  ;;  %v2383_v6 = vrot.slane %v6765_v4, %v5960_v55 }
 0xcd9   :  { %v5220_v50 = vpop.f32.mrf.mxu1 }
 0xcda   :  { %v6743_v44 = vadd.f32 %v2310_v35, %v6475_v49  ;;  %v5221_v12 = vadd.f32 %v5220_v50, %v5219_v34 }
 0xcdc   :  { %v2313_v33 = vadd.f32 %v5221_v12, %v2170_v2  ;;  %2338 = vadd.xlane.f32.xlu1 %v2333_v5  ;;  %2328 = vadd.xlane.f32.xlu0 %v6743_v44  ;;  %v2334_v11 = vmul.f32 %v6743_v44, %v6743_v44 }
 0xcde   :  { %v6749_v14 = vadd.f32 %v2313_v33, %v6481_v63 }
 0xce0   :  { %2330 = vadd.xlane.f32.xlu1 %v6749_v14  ;;  %2340 = vadd.xlane.f32.xlu0 %v2334_v11  ;;  %v2335_v49 = vmul.f32 %v6749_v14, %v6749_v14 }
 0xce4   :  { %2342 = vadd.xlane.f32.xlu1 %v2335_v49  ;;  %v2391_v49 = vrot.slane %v6765_v4, %v5972_v62 }
 0xd5d   :  { %v2325_v63 = vpop.xlane.xlu0 %2324 }
 0xd5e   :  { %v2344_v26 = vmul.f32 0.0078125, %v2325_v63 }
 0xd60   :  { %v2352_v60 = vmul.f32 %v2344_v26, %v2344_v26  ;;  %v2364_v3 = vsub.f32 %v6733_v9, %v2344_v26 }
 0xd61   :  { %v2327_v46 = vpop.xlane.xlu1 %2326  ;;  %v2337_v28 = vpop.xlane.xlu0 %2336 }
 0xd62   :  { %v2345_v13 = vmul.f32 0.0078125, %v2327_v46  ;;  %v2348_v8 = vmul.f32 0.0078125, %v2337_v28 }
 0xd64   :  { %v2356_v19 = vsub.f32 %v2348_v8, %v2352_v60  ;;  %v2353_v0 = vmul.f32 %v2345_v13, %v2345_v13  ;;  %v2365_v47 = vsub.f32 %v6737_v38, %v2345_v13 }
 0xd65   :  { %v2339_v58 = vpop.xlane.xlu1 %2338  ;;  %v2329_v27 = vpop.xlane.xlu0 %2328 }
 0xd66   :  { %v2360_v23 = vmax.f32 %v2356_v19, 0.0  ;;  %v2349_v16 = vmul.f32 0.0078125, %v2339_v58  ;;  %v2346_v43 = vmul.f32 0.0078125, %v2329_v27 }
 0xd68   :  { %v2368_v15 = vadd.f32 1e-05, %v2360_v23  ;;  %v2357_v42 = vsub.f32 %v2349_v16, %v2353_v0  ;;  %v2354_v29 = vmul.f32 %v2346_v43, %v2346_v43  ;;  %v2366_v12 = vsub.f32 %v6743_v44, %v2346_v43 }
 0xd69   :  { %v2331_v59 = vpop.xlane.xlu1 %2330  ;;  %v2341_v57 = vpop.xlane.xlu0 %2340 }
 0xd6a   :  { %v2361_v24 = vmax.f32 %v2357_v42, 0.0  ;;  %v2347_v21 = vmul.f32 0.0078125, %v2331_v59  ;;  %v2350_v36 = vmul.f32 0.0078125, %v2341_v57  ;;  %5722 = vrsqrt.f32 %v2368_v15 }
 0xd6c   :  { %v2369_v51 = vadd.f32 1e-05, %v2361_v24  ;;  %v2358_v31 = vsub.f32 %v2350_v36, %v2354_v29  ;;  %v2355_v1 = vmul.f32 %v2347_v21, %v2347_v21  ;;  %v2367_v10 = vsub.f32 %v6749_v14, %v2347_v21 }
 0xd6d   :  { %v2343_v54 = vpop.xlane.xlu1 %2342 }
 0xd6e   :  { %5724 = vrsqrt.f32 %v2369_v51  ;;  %v2362_v2 = vmax.f32 %v2358_v31, 0.0  ;;  %v2351_v7 = vmul.f32 0.0078125, %v2343_v54 }
 0xd70   :  { %v2370_v22 = vadd.f32 1e-05, %v2362_v2  ;;  %v2359_v61 = vsub.f32 %v2351_v7, %v2355_v1 }
 0xd72   :  { %5726 = vrsqrt.f32 %v2370_v22  ;;  %v2363_v37 = vmax.f32 %v2359_v61, 0.0 }
 0xd74   :  { %v2371_v40 = vadd.f32 1e-05, %v2363_v37 }
 0xd76   :  { %5728 = vrsqrt.f32 %v2371_v40 }
 0xd77   :  { %v5723_v30 = vpop.eup %5722 }
 0xd78   :  { %v2376_v34 = vmul.f32 %v5723_v30, %v2364_v3 }
 0xd7a   :  { %v2384_v33 = vmul.f32 %v2383_v6, %v2376_v34 }
 0xd7b   :  { %v5725_v32 = vpop.eup %5724 }
 0xd7c   :  { %v2377_v35 = vmul.f32 %v5725_v32, %v2365_v47  ;;  %v6777_v28 = vadd.f32 %v2391_v49, %v2384_v33  ;;  %v5520_v33 = vld [vmem:[%s7582_s4 + $0x1b4] ss:$8 sps:$4 sm:$0xff]  }
 0xd7e   :  { %v2385_v50 = vmul.f32 %v2383_v6, %v2377_v35  ;;  %v2396_v58 = vmax.f32 %v6777_v28, 0.0 }
 0xd7f   :  { %v5727_v5 = vpop.eup %5726 }
 0xd80   :  { %v2378_v11 = vmul.f32 %v5727_v5, %v2366_v12  ;;  %v6775_v63 = vadd.f32 %v2391_v49, %v2385_v50  ;;  %v2400_v16 = vadd.f32 1e-07, %v2396_v58  ;;  %v5511_v12 = vld [vmem:[%s7582_s4 + $0x1e4] ss:$8 sps:$4 sm:$0xff]   ;;  %v5515_v5 = vld [vmem:[%s7582_s4 + $0x1c0] ss:$8 sps:$4 sm:$0xff]  }
 0xd81   :  { %2662 = vmatprep.subr.bf16.mxu1 %v5511_v12 }
 0xd82   :  { %v2386_v17 = vmul.f32 %v2383_v6, %v2378_v11  ;;  %v2397_v8 = vmax.f32 %v6775_v63, 0.0  ;;  %v5518_v11 = vld [vmem:[%s7582_s4 + $0x1b0] ss:$8 sps:$4 sm:$0xff]  }
 0xd83   :  { %v5729_v26 = vpop.eup %5728 }
 0xd84   :  { %v2379_v46 = vmul.f32 %v5729_v26, %v2367_v10  ;;  %v6779_v60 = vadd.f32 %v2391_v49, %v2386_v17  ;;  %v2401_v23 = vadd.f32 1e-07, %v2397_v8  ;;  %v5521_v10 = vld [vmem:[%s7582_s4 + $0x1a0] ss:$8 sps:$4 sm:$0xff]   ;;  %v5526_v17 = vld [vmem:[%s7582_s4 + $0x194] ss:$8 sps:$4 sm:$0xff]  }
 0xd85   :  { %v5524_v26 = vld [vmem:[%s7582_s4 + $0x190] ss:$8 sps:$4 sm:$0xff]  }
 0xd86   :  { %v2387_v13 = vmul.f32 %v2383_v6, %v2379_v46  ;;  %v2398_v27 = vmax.f32 %v6779_v60, 0.0  ;;  %v2404_v42 = vmax.f32 %v2400_v16, %v2401_v23  ;;  %v5529_v46 = vld [vmem:[%s7582_s4 + $0x184] ss:$8 sps:$4 sm:$0xff]  }
 0xd88   :  { %v6782_v19 = vadd.f32 %v2391_v49, %v2387_v13  ;;  %v2402_v43 = vadd.f32 1e-07, %v2398_v27  ;;  %v5523_v49 = vld [vmem:[%s7582_s4 + $0x1a4] ss:$8 sps:$4 sm:$0xff]   ;;  %v5527_v13 = vld [vmem:[%s7582_s4 + $0x180] ss:$8 sps:$4 sm:$0xff]  }
 0xd8a   :  { %v2399_v0 = vmax.f32 %v6782_v19, 0.0 }
 0xd8c   :  { %v2403_v15 = vadd.f32 1e-07, %v2399_v0 }
 0xd8e   :  { %v2405_v59 = vmax.f32 %v2402_v43, %v2403_v15 }
 0xd90   :  { %v2406_v57 = vmax.f32 %v2404_v42, %v2405_v59 }
 0xd92   :  { %v2407_v24 = vrot.slane %v2406_v57, 4 }
 0xd94   :  { %v2408_v29 = vmax.f32 %v2406_v57, %v2407_v24 }
 0xd96   :  { %v2409_v21 = vrot.slane %v2408_v29, 2 }
 0xd98   :  { %v2410_v36 = vmax.f32 %v2408_v29, %v2409_v21 }
 0xd9a   :  { %v2411_v51 = vrot.slane %v2410_v36, 1 }
 0xd9c   :  { %v2412_v31 = vmax.f32 %v2410_v36, %v2411_v51 }
 0xd9e   :  { %v2416_v54 = vsub.f32 %v2403_v15, %v2412_v31  ;;  %v2415_v1 = vsub.f32 %v2402_v43, %v2412_v31  ;;  %v2414_v2 = vsub.f32 %v2401_v23, %v2412_v31  ;;  %v2413_v7 = vsub.f32 %v2400_v16, %v2412_v31 }
 0xda0   :  { %v2423_v22 = vmul.f32 1.442695, %v2416_v54  ;;  %v2421_v61 = vmul.f32 1.442695, %v2415_v1  ;;  %v2419_v37 = vmul.f32 1.442695, %v2414_v2 }
 0xda1   :  { %v2417_v40 = vmul.f32 1.442695, %v2413_v7 }
 0xda2   :  { %5730 = vpow2.f32 %v2423_v22 }
 0xda3   :  { %5732 = vpow2.f32 %v2421_v61 }
 0xda4   :  { %5734 = vpow2.f32 %v2419_v37 }
 0xda5   :  { %5736 = vpow2.f32 %v2417_v40 }
 0xdaf   :  { %v5731_v30 = vpop.eup %5730 }
 0xdb0   :  { %v5733_v3 = vpop.eup %5732  ;;  %v2428_v47 = vmul.f32 %v5731_v30, %v2403_v15 }
 0xdb1   :  { %v5735_v32 = vpop.eup %5734  ;;  %v2427_v6 = vmul.f32 %v5733_v3, %v2402_v43 }
 0xdb2   :  { %2453 = vmatprep.subr.mxu0 %v2428_v47  ;;  %v5737_v34 = vpop.eup %5736  ;;  %v2426_v35 = vmul.f32 %v5735_v32, %v2401_v23 }
 0xdb3   :  { %2454 = vmatpush1.msra.mxu0 %v5731_v30  ;;  %v2425_v50 = vmul.f32 %v5737_v34, %v2400_v16 }
 0xdb4   :  { %2455 = vmatprep.subr.mxu0 %v2427_v6 }
 0xdb5   :  { %2456 = vmatpush1.msra.mxu0 %v5733_v3 }
 0xdb6   :  { %2457 = vmatprep.subr.mxu0 %v2426_v35 }
 0xdb7   :  { %2458 = vmatpush1.msra.mxu0 %v5735_v32 }
 0xdb8   :  { %2459 = vmatprep.subr.mxu0 %v2425_v50 }
 0xdb9   :  { %2460 = vmatpush1.msra.mxu0 %v5737_v34 }
 0xdba   :  { %4875 = vmatmul.mubr.msk.f32.vlgmr.msra.gmra.mxu0 %vm261_vm1, %v6530_v39  ;;  %v5509_v39 = vld [vmem:[%s7582_s4 + $0x1e0] ss:$8 sps:$4 sm:$0xff]  }
 0xdbb   :  { %2499 = vmatprep.mubr.f32.mxu0 %v5848_v18  ;;  %2663 = vmatpush1.bf16.msra.mxu1 %v5509_v39 }
 0xdbe   :  { %4876 = vmatmul.mubr.msk.f32.gmra.mxu0 %vm261_vm1, %v6538_v41  ;;  %v5514_v41 = vld [vmem:[%s7582_s4 + $0x1d4] ss:$8 sps:$4 sm:$0xff]  }
 0xdbf   :  { %2505 = vmatprep.mubr.f32.mxu0 %v5848_v18  ;;  %2664 = vmatprep.subr.bf16.mxu1 %v5514_v41 }
 0xdc2   :  { %4877 = vmatmul.mubr.msk.f32.gmra.mxu0 %vm261_vm1, %v6546_v48  ;;  %v5512_v48 = vld [vmem:[%s7582_s4 + $0x1d0] ss:$8 sps:$4 sm:$0xff]  }
 0xdc3   :  { %2511 = vmatprep.mubr.f32.mxu0 %v5848_v18  ;;  %2665 = vmatpush1.bf16.msra.mxu1 %v5512_v48 }
 0xdc6   :  { %4878 = vmatmul.mubr.msk.f32.gmra.mxu0 %vm261_vm1, %v6554_v56  ;;  %v5517_v56 = vld [vmem:[%s7582_s4 + $0x1c4] ss:$8 sps:$4 sm:$0xff]  }
 0xdc7   :  { %2666 = vmatprep.subr.bf16.mxu1 %v5517_v56 }
 0xdc8   :  { %2667 = vmatpush1.bf16.msra.mxu1 %v5515_v5 }
 0xdc9   :  { %2668 = vmatprep.subr.bf16.mxu1 %v5520_v33 }
 0xdcc   :  { %2669 = vmatpush1.bf16.msra.mxu1 %v5518_v11 }
 0xdcd   :  { %2670 = vmatprep.subr.bf16.mxu1 %v5523_v49 }
 0xdd0   :  { %2671 = vmatpush1.bf16.msra.mxu1 %v5521_v10 }
 0xdd1   :  { %2672 = vmatprep.subr.bf16.mxu1 %v5526_v17 }
 0xdd4   :  { %2673 = vmatpush1.bf16.msra.mxu1 %v5524_v26 }
 0xdd5   :  { %2674 = vmatprep.subr.bf16.mxu1 %v5529_v46 }
 0xdd8   :  { %2675 = vmatpush1.bf16.msra.mxu1 %v5527_v13 }
 0xe7a   :  { %v2495_v23 = vpop.f32.mrf.mxu0 }
 0xe7b   :  { %v2518_v16 = vmax.f32 %v2495_v23, 1e-12  ;;  %vm2526_vm14 = vcmp.gt.f32.partialorder %v2495_v23, 0.0 }
 0xe7c   :  { %v2497_v43 = vpop.f32.mrf.mxu0 }
 0xe7d   :  { %5738 = vrcp.f32 %v2518_v16 }
 0xe7e   :  { %v2501_v15 = vpop.f32.mrf.mxu0 }
 0xe7f   :  { %v2519_v42 = vmax.f32 %v2501_v15, 1e-12  ;;  %vm2527_vm15 = vcmp.gt.f32.partialorder %v2501_v15, 0.0 }
 0xe80   :  { %v2503_v59 = vpop.f32.mrf.mxu0 }
 0xe81   :  { %5740 = vrcp.f32 %v2519_v42 }
 0xe82   :  { %v2507_v57 = vpop.f32.mrf.mxu0 }
 0xe83   :  { %v2520_v24 = vmax.f32 %v2507_v57, 1e-12  ;;  %vm2528_vm0 = vcmp.gt.f32.partialorder %v2507_v57, 0.0 }
 0xe84   :  { %v2509_v29 = vpop.f32.mrf.mxu0 }
 0xe85   :  { %5742 = vrcp.f32 %v2520_v24 }
 0xe86   :  { %v2513_v21 = vpop.f32.mrf.mxu0 }
 0xe87   :  { %v2521_v36 = vmax.f32 %v2513_v21, 1e-12  ;;  %vm2529_vm2 = vcmp.gt.f32.partialorder %v2513_v21, 0.0 }
 0xe88   :  { %v2515_v47 = vpop.f32.mrf.mxu0 }
 0xe89   :  { %5744 = vrcp.f32 %v2521_v36 }
 0xe8a   :  { %v5739_v51 = vpop.eup %5738 }
 0xe8b   :  { %v2530_v31 = vmul.f32 %v5739_v51, %v2497_v43 }
 0xe8d   :  { %v2534_v1 = vsel %vm2526_vm14, %v2530_v31, 0.0 }
 0xe8e   :  { %v5741_v54 = vpop.eup %5740  ;;  %v2538_v61 = vadd.f32 %v2534_v1, %v2396_v58 }
 0xe8f   :  { %v2531_v2 = vmul.f32 %v5741_v54, %v2503_v59 }
 0xe91   :  { %v2535_v7 = vsel %vm2527_vm15, %v2531_v2, 0.0 }
 0xe92   :  { %v5743_v22 = vpop.eup %5742  ;;  %v2539_v37 = vadd.f32 %v2535_v7, %v2397_v8  ;;  %v6861_v8 = vld [vmem:[%s7585_s7 + $0x18] sm:$0x77] }
 0xe93   :  { %v2532_v40 = vmul.f32 %v5743_v22, %v2509_v29  ;;  %v2565_v58 = vrot.slane %v6861_v8, %v5960_v55  ;;  %v2569_v50 = vrot.slane %v6861_v8, %v6082_v20  ;;  %v5530_v7 = vld [vmem:[%s7583_s5 + $0x1f8] sm:$0xff]  }
 0xe94   :  { %v2542_v30 = vpack.c.bf16 %v2539_v37, %v2538_v61  ;;  %v5531_v22 = vld [vmem:[%s7583_s5 + $0x1b8] sm:$0xff]   ;;  %5222 = vmatprep.subr.bf16.mxu0 %v5530_v7  ;;  %v5532_v61 = vld [vmem:[%s7583_s5 + $0x1f0] sm:$0xff]  }
 0xe95   :  { %v2536_v32 = vsel %vm2528_vm0, %v2532_v40, 0.0  ;;  %v2575_v60 = vrot.slane %v2565_v58, %v5960_v55  ;;  %v2579_v19 = vrot.slane %v2569_v50, %v5960_v55  ;;  %5223 = vmatpush3.bf16.msra.mxu0 %v5531_v22  ;;  %v5533_v37 = vld [vmem:[%s7583_s5 + $0x1b0] sm:$0xff]   ;;  %v5534_v40 = vld [vmem:[%s7583_s5 + $0x1e8] sm:$0xff]   ;;  %v5544_v58 = vld [vmem:[%s7583_s5 + $0x1c0] sm:$0xff]  }
 0xe96   :  { %v5745_v3 = vpop.eup %5744  ;;  %2693 = vmatmul.mubr.bf16.vlgmr.msra.gmra.mxu1 %v2542_v30  ;;  %v2540_v35 = vadd.f32 %v2536_v32, %v2398_v27  ;;  %5224 = vmatprep.subr.bf16.mxu0 %v5532_v61  ;;  %v5535_v30 = vld [vmem:[%s7583_s5 + $0x1a8] sm:$0xff]   ;;  %v5538_v32 = vld [vmem:[%s7583_s5 + $0x1d8] sm:$0xff]   ;;  %v5545_v50 = vld [vmem:[%s7583_s5 + $0x180] sm:$0xff]  }
 0xe97   :  { %v2533_v6 = vmul.f32 %v5745_v3, %v2515_v47  ;;  %2702 = vmatprep.mubr.bf16.mxu1 %v5849_v25  ;;  %v5536_v3 = vld [vmem:[%s7583_s5 + $0x1e0] sm:$0xff]  }
 0xe98   :  { %v5537_v47 = vld [vmem:[%s7583_s5 + $0x1a0] sm:$0xff]  }
 0xe99   :  { %v2537_v34 = vsel %vm2529_vm2, %v2533_v6, 0.0  ;;  %5225 = vmatpush3.bf16.msra.mxu0 %v5533_v37  ;;  %v5539_v6 = vld [vmem:[%s7583_s5 + $0x198] sm:$0xff]  }
 0xe9a   :  { %v2541_v28 = vadd.f32 %v2537_v34, %v2399_v0  ;;  %5226 = vmatprep.subr.bf16.mxu0 %v5534_v40  ;;  %v5540_v34 = vld [vmem:[%s7583_s5 + $0x1d0] sm:$0xff]   ;;  %v2796_v40 = vrot.slane %v6861_v8, %v6184_v45 }
 0xe9c   :  { %v2543_v63 = vpack.c.bf16 %v2541_v28, %v2540_v35  ;;  %v5541_v35 = vld [vmem:[%s7583_s5 + $0x190] sm:$0xff]   ;;  %v5542_v28 = vld [vmem:[%s7583_s5 + $0x1c8] sm:$0xff]  }
 0xe9d   :  { %5227 = vmatpush3.bf16.msra.mxu0 %v5535_v30 }
 0xe9e   :  { %2703 = vmatmul.mubr.bf16.gmra.mxu1 %v2543_v63  ;;  %5228 = vmatprep.subr.bf16.mxu0 %v5536_v3  ;;  %v5543_v63 = vld [vmem:[%s7583_s5 + $0x188] sm:$0xff]   ;;  %v2792_v3 = vrot.slane %v6861_v8, %v5972_v62 }
 0xe9f   :  { %3212 = vmatprep.mubr.f32.mxu1 %v5848_v18 }
 0xea1   :  { %5229 = vmatpush3.bf16.msra.mxu0 %v5537_v47 }
 0xea2   :  { %5230 = vmatprep.subr.bf16.mxu0 %v5538_v32  ;;  %v2806_v32 = vrot.slane %v2796_v40, %v5972_v62 }
 0xea5   :  { %5231 = vmatpush3.bf16.msra.mxu0 %v5539_v6  ;;  %v2822_v6 = vrot.slane %v6861_v8, %v6192_v53 }
 0xea6   :  { %5232 = vmatprep.subr.bf16.mxu0 %v5540_v34  ;;  %v2818_v34 = vrot.slane %v6861_v8, %v6189_v52 }
 0xea9   :  { %5233 = vmatpush3.bf16.msra.mxu0 %v5541_v35 }
 0xeaa   :  { %5234 = vmatprep.subr.bf16.mxu0 %v5542_v28 }
 0xead   :  { %5235 = vmatpush3.bf16.msra.mxu0 %v5543_v63  ;;  %v2802_v63 = vrot.slane %v2792_v3, %v5972_v62 }
 0xeae   :  { %5236 = vmatprep.subr.bf16.mxu0 %v5544_v58 }
 0xeb1   :  { %5237 = vmatpush3.bf16.msra.mxu0 %v5545_v50 }
 0xf56   :  { %v2694_v27 = vpop.f32.mrf.mxu1 }
 0xf57   :  { %v6869_v12 = vadd.f32 %v2694_v27, %v2575_v60 }
 0xf58   :  { %v2696_v0 = vpop.f32.mrf.mxu1 }
 0xf59   :  { %v6871_v39 = vadd.f32 %v2696_v0, %v2579_v19  ;;  %v2725_v49 = vmul.f32 %v6869_v12, %v6869_v12 }
 0xf5a   :  { %v2698_v41 = vpop.f32.mrf.mxu1 }
 0xf5b   :  { %v2713_v48 = vadd.f32 %v6871_v39, %v6869_v12  ;;  %v2726_v56 = vmul.f32 %v6871_v39, %v6871_v39  ;;  %v6877_v33 = vadd.f32 %v2698_v41, %v2575_v60 }
 0xf5c   :  { %v2700_v5 = vpop.f32.mrf.mxu1 }
 0xf5d   :  { %v6879_v11 = vadd.f32 %v2700_v5, %v2579_v19  ;;  %2714 = vadd.xlane.f32.xlu0 %v2713_v48  ;;  %v2733_v26 = vadd.f32 %v2726_v56, %v2725_v49  ;;  %v2727_v43 = vmul.f32 %v6877_v33, %v6877_v33 }
 0xf5e   :  { %v2704_v10 = vpop.f32.mrf.mxu1 }
 0xf5f   :  { %v2716_v17 = vadd.f32 %v6879_v11, %v6877_v33  ;;  %v2728_v46 = vmul.f32 %v6879_v11, %v6879_v11  ;;  %v6887_v23 = vadd.f32 %v2704_v10, %v2575_v60 }
 0xf60   :  { %v2706_v13 = vpop.f32.mrf.mxu1 }
 0xf61   :  { %v6889_v16 = vadd.f32 %v2706_v13, %v2579_v19  ;;  %2717 = vadd.xlane.f32.xlu1 %v2716_v17  ;;  %2734 = vadd.xlane.f32.xlu0 %v2733_v26  ;;  %v2736_v42 = vadd.f32 %v2728_v46, %v2727_v43  ;;  %v2729_v36 = vmul.f32 %v6887_v23, %v6887_v23 }
 0xf62   :  { %v2708_v15 = vpop.f32.mrf.mxu1 }
 0xf63   :  { %v2719_v59 = vadd.f32 %v6889_v16, %v6887_v23  ;;  %v2730_v57 = vmul.f32 %v6889_v16, %v6889_v16  ;;  %v6897_v29 = vadd.f32 %v2708_v15, %v2575_v60 }
 0xf64   :  { %v2710_v24 = vpop.f32.mrf.mxu1 }
 0xf65   :  { %v6899_v21 = vadd.f32 %v2710_v24, %v2579_v19  ;;  %2737 = vadd.xlane.f32.xlu1 %v2736_v42  ;;  %2720 = vadd.xlane.f32.xlu0 %v2719_v59  ;;  %v2739_v31 = vadd.f32 %v2730_v57, %v2729_v36  ;;  %v2731_v1 = vmul.f32 %v6897_v29, %v6897_v29 }
 0xf67   :  { %v2722_v51 = vadd.f32 %v6899_v21, %v6897_v29  ;;  %v2732_v54 = vmul.f32 %v6899_v21, %v6899_v21 }
 0xf69   :  { %2723 = vadd.xlane.f32.xlu1 %v2722_v51  ;;  %2740 = vadd.xlane.f32.xlu0 %v2739_v31  ;;  %v2742_v2 = vadd.f32 %v2732_v54, %v2731_v1 }
 0xf6d   :  { %2743 = vadd.xlane.f32.xlu1 %v2742_v2 }
 0xfe6   :  { %v2715_v60 = vpop.xlane.xlu0 %2714 }
 0xfe7   :  { %v2745_v19 = vmul.f32 0.00390625, %v2715_v60 }
 0xfe9   :  { %v2753_v48 = vmul.f32 %v2745_v19, %v2745_v19  ;;  %v2765_v35 = vsub.f32 %v6869_v12, %v2745_v19  ;;  %v2766_v28 = vsub.f32 %v6871_v39, %v2745_v19 }
 0xfea   :  { %v2718_v27 = vpop.xlane.xlu1 %2717  ;;  %v2735_v0 = vpop.xlane.xlu0 %2734 }
 0xfeb   :  { %v2746_v41 = vmul.f32 0.00390625, %v2718_v27  ;;  %v2749_v56 = vmul.f32 0.00390625, %v2735_v0  ;;  %v2832_v27 = vrot.slane %v2822_v6, %v6189_v52  ;;  %v2828_v0 = vrot.slane %v2818_v34, %v6189_v52 }
 0xfed   :  { %v2757_v5 = vsub.f32 %v2749_v56, %v2753_v48  ;;  %v2754_v26 = vmul.f32 %v2746_v41, %v2746_v41  ;;  %v2767_v48 = vsub.f32 %v6877_v33, %v2746_v41  ;;  %v2768_v56 = vsub.f32 %v6879_v11, %v2746_v41 }
 0xfee   :  { %v2738_v49 = vpop.xlane.xlu1 %2737  ;;  %v2721_v10 = vpop.xlane.xlu0 %2720 }
 0xfef   :  { %v2761_v17 = vmax.f32 %v2757_v5, 0.0  ;;  %v2750_v46 = vmul.f32 0.00390625, %v2738_v49  ;;  %v2747_v13 = vmul.f32 0.00390625, %v2721_v10 }
 0xff1   :  { %v2773_v43 = vadd.f32 1e-05, %v2761_v17  ;;  %v2758_v15 = vsub.f32 %v2750_v46, %v2754_v26  ;;  %v2755_v59 = vmul.f32 %v2747_v13, %v2747_v13  ;;  %v2769_v39 = vsub.f32 %v6887_v23, %v2747_v13 }
 0xff2   :  { %v2724_v42 = vpop.xlane.xlu1 %2723  ;;  %v2741_v57 = vpop.xlane.xlu0 %2740  ;;  %v2770_v17 = vsub.f32 %v6889_v16, %v2747_v13 }
 0xff3   :  { %5746 = vrsqrt.f32 %v2773_v43  ;;  %v2762_v24 = vmax.f32 %v2758_v15, 0.0  ;;  %v2748_v36 = vmul.f32 0.00390625, %v2724_v42  ;;  %v2751_v51 = vmul.f32 0.00390625, %v2741_v57 }
 0xff5   :  { %v2774_v31 = vadd.f32 1e-05, %v2762_v24  ;;  %v2759_v54 = vsub.f32 %v2751_v51, %v2755_v59  ;;  %v2756_v7 = vmul.f32 %v2748_v36, %v2748_v36  ;;  %v2772_v11 = vsub.f32 %v6899_v21, %v2748_v36 }
 0xff6   :  { %v2744_v1 = vpop.xlane.xlu1 %2743  ;;  %v2771_v23 = vsub.f32 %v6897_v29, %v2748_v36  ;;  %v2889_v36 = vrot.slane %v6765_v4, %v6189_v52 }
 0xff7   :  { %5748 = vrsqrt.f32 %v2774_v31  ;;  %v2763_v2 = vmax.f32 %v2759_v54, 0.0  ;;  %v2752_v22 = vmul.f32 0.00390625, %v2744_v1 }
 0xff9   :  { %v2775_v61 = vadd.f32 1e-05, %v2763_v2  ;;  %v2760_v37 = vsub.f32 %v2752_v22, %v2756_v7 }
 0xffb   :  { %5750 = vrsqrt.f32 %v2775_v61  ;;  %v2764_v30 = vmax.f32 %v2760_v37, 0.0 }
 0xffd   :  { %v2776_v47 = vadd.f32 1e-05, %v2764_v30 }
 0xfff   :  { %5752 = vrsqrt.f32 %v2776_v47 }
0x1000   :  { %v5747_v58 = vpop.eup %5746 }
0x1001   :  { %v2781_v50 = vmul.f32 %v5747_v58, %v2765_v35  ;;  %v2782_v60 = vmul.f32 %v5747_v58, %v2766_v28 }
0x1003   :  { %v2808_v5 = vmul.f32 %v2806_v32, %v2782_v60  ;;  %v2807_v8 = vmul.f32 %v2802_v63, %v2781_v50 }
0x1004   :  { %v5749_v49 = vpop.eup %5748 }
0x1005   :  { %v2783_v12 = vmul.f32 %v5749_v49, %v2767_v48  ;;  %v2784_v10 = vmul.f32 %v5749_v49, %v2768_v56  ;;  %v2834_v19 = vadd.f32 %v2832_v27, %v2808_v5  ;;  %v2833_v43 = vadd.f32 %v2828_v0, %v2807_v8 }
0x1007   :  { %v2810_v26 = vmul.f32 %v2806_v32, %v2784_v10  ;;  %v2809_v46 = vmul.f32 %v2802_v63, %v2783_v12  ;;  %v2842_v41 = vmax.f32 %v2834_v19, 0.0  ;;  %v2841_v51 = vmax.f32 %v2833_v43, 0.0 }
0x1008   :  { %v5751_v15 = vpop.eup %5750 }
0x1009   :  { %v2836_v42 = vadd.f32 %v2832_v27, %v2810_v26  ;;  %v2835_v59 = vadd.f32 %v2828_v0, %v2809_v46  ;;  %v2786_v57 = vmul.f32 %v5751_v15, %v2770_v17  ;;  %v2785_v33 = vmul.f32 %v5751_v15, %v2769_v39  ;;  %v5546_v15 = vld [vmem:[%s7582_s4 + $0x270] ss:$8 sps:$4 sm:$0xff]  }
0x100b   :  { %v2844_v24 = vmax.f32 %v2836_v42, 0.0  ;;  %v2843_v31 = vmax.f32 %v2835_v59, 0.0  ;;  %v2812_v54 = vmul.f32 %v2806_v32, %v2786_v57  ;;  %v2811_v2 = vmul.f32 %v2802_v63, %v2785_v33  ;;  %v5548_v42 = vld [vmem:[%s7582_s4 + $0x274] ss:$8 sps:$4 sm:$0xff]  }
0x100c   :  { %v5753_v1 = vpop.eup %5752  ;;  %3379 = vmatprep.subr.bf16.mxu0 %v5548_v42 }
0x100d   :  { %v2850_v16 = vpack.c.bf16 %v2844_v24, %v2842_v41  ;;  %v2849_v13 = vpack.c.bf16 %v2843_v31, %v2841_v51  ;;  %v2788_v7 = vmul.f32 %v5753_v1, %v2772_v11  ;;  %v2787_v22 = vmul.f32 %v5753_v1, %v2771_v23 }
0x100e   :  { %v2838_v37 = vadd.f32 %v2832_v27, %v2812_v54  ;;  %v2837_v30 = vadd.f32 %v2828_v0, %v2811_v2 }
0x100f   :  { %3018 = vmatprep.mubr.bf16.mxu0 %v2850_v16  ;;  %v2814_v61 = vmul.f32 %v2806_v32, %v2788_v7  ;;  %v2813_v40 = vmul.f32 %v2802_v63, %v2787_v22 }
0x1010   :  { %3019 = vmatmul.mubr.bf16.vlgmr.msra.gmra.mxu0 %v2849_v13  ;;  %v2846_v47 = vmax.f32 %v2838_v37, 0.0  ;;  %v2845_v34 = vmax.f32 %v2837_v30, 0.0 }
0x1011   :  { %v2840_v21 = vadd.f32 %v2832_v27, %v2814_v61  ;;  %v2839_v3 = vadd.f32 %v2828_v0, %v2813_v40  ;;  %3380 = vmatpush1.bf16.msra.mxu0 %v5546_v15 }
0x1013   :  { %v2848_v6 = vmax.f32 %v2840_v21, 0.0  ;;  %v2847_v35 = vmax.f32 %v2839_v3, 0.0 }
0x1015   :  { %v2852_v28 = vpack.c.bf16 %v2848_v6, %v2846_v47  ;;  %v2851_v58 = vpack.c.bf16 %v2847_v35, %v2845_v34 }
0x1017   :  { %3026 = vmatprep.mubr.bf16.mxu0 %v2852_v28 }
0x1018   :  { %3027 = vmatmul.mubr.bf16.gmra.mxu0 %v2851_v58 }
0x1019   :  { %3411 = vmatprep.mubr.bf16.mxu0 %v5849_v25 }
0x10d0   :  { %v5238_v29 = vpop.f32.mrf.mxu0 }
0x10d2   :  { %v5239_v32 = vpop.f32.mrf.mxu0 }
0x10d3   :  { %v5240_v50 = vadd.f32 %v5239_v32, %v5238_v29 }
0x10d4   :  { %v5241_v63 = vpop.f32.mrf.mxu0 }
0x10d5   :  { %v3021_v60 = vadd.f32 %v5240_v50, %v2889_v36 }
0x10d6   :  { %v5242_v27 = vpop.f32.mrf.mxu0 }
0x10d7   :  { %v6981_v0 = vadd.f32 %v3021_v60, %v6733_v9  ;;  %v5243_v48 = vadd.f32 %v5242_v27, %v5241_v63  ;;  %v7013_v63 = vld [vmem:[%s7584_s6 + $0x10] sm:$0x7] }
0x10d8   :  { %v5244_v56 = vpop.f32.mrf.mxu0 }
0x10d9   :  { %v3024_v5 = vadd.f32 %v5243_v48, %v2889_v36  ;;  %3043 = vadd.xlane.f32.xlu0 %v6981_v0  ;;  %v3051_v4 = vmul.f32 %v6981_v0, %v6981_v0 }
0x10da   :  { %v5245_v8 = vpop.f32.mrf.mxu0 }
0x10db   :  { %v6985_v49 = vadd.f32 %v3024_v5, %v6737_v38  ;;  %v5246_v12 = vadd.f32 %v5245_v8, %v5244_v56  ;;  %v3102_v56 = vrot.slane %v7013_v63, %v5960_v55 }
0x10dc   :  { %v5247_v10 = vpop.f32.mrf.mxu0 }
0x10dd   :  { %v3029_v39 = vadd.f32 %v5246_v12, %v2889_v36  ;;  %3045 = vadd.xlane.f32.xlu1 %v6985_v49  ;;  %3055 = vadd.xlane.f32.xlu0 %v3051_v4  ;;  %v3052_v26 = vmul.f32 %v6985_v49, %v6985_v49 }
0x10de   :  { %v5248_v9 = vpop.f32.mrf.mxu0 }
0x10df   :  { %v6991_v19 = vadd.f32 %v3029_v39, %v6743_v44  ;;  %v5249_v17 = vadd.f32 %v5248_v9, %v5247_v10 }
0x10e1   :  { %v3032_v46 = vadd.f32 %v5249_v17, %v2889_v36  ;;  %3057 = vadd.xlane.f32.xlu1 %v3052_v26  ;;  %3047 = vadd.xlane.f32.xlu0 %v6991_v19  ;;  %v3053_v43 = vmul.f32 %v6991_v19, %v6991_v19  ;;  %v3110_v17 = vrot.slane %v7013_v63, %v5972_v62 }
0x10e3   :  { %v6997_v38 = vadd.f32 %v3032_v46, %v6749_v14 }
0x10e5   :  { %3049 = vadd.xlane.f32.xlu1 %v6997_v38  ;;  %3059 = vadd.xlane.f32.xlu0 %v3053_v43  ;;  %v3054_v44 = vmul.f32 %v6997_v38, %v6997_v38 }
0x10e9   :  { %3061 = vadd.xlane.f32.xlu1 %v3054_v44 }
0x1162   :  { %v3044_v14 = vpop.xlane.xlu0 %3043 }
0x1163   :  { %v3063_v59 = vmul.f32 0.0078125, %v3044_v14 }
0x1165   :  { %v3071_v11 = vmul.f32 %v3063_v59, %v3063_v59  ;;  %v3083_v60 = vsub.f32 %v6981_v0, %v3063_v59 }
0x1166   :  { %v3046_v57 = vpop.xlane.xlu1 %3045  ;;  %v3056_v33 = vpop.xlane.xlu0 %3055 }
0x1167   :  { %v3064_v41 = vmul.f32 0.0078125, %v3046_v57  ;;  %v3067_v24 = vmul.f32 0.0078125, %v3056_v33 }
0x1169   :  { %v3075_v51 = vsub.f32 %v3067_v24, %v3071_v11  ;;  %v3072_v1 = vmul.f32 %v3064_v41, %v3064_v41  ;;  %v3084_v27 = vsub.f32 %v6985_v49, %v3064_v41 }
0x116a   :  { %v3058_v31 = vpop.xlane.xlu1 %3057  ;;  %v3048_v54 = vpop.xlane.xlu0 %3047 }
0x116b   :  { %v3079_v23 = vmax.f32 %v3075_v51, 0.0  ;;  %v3068_v2 = vmul.f32 0.0078125, %v3058_v31  ;;  %v3065_v16 = vmul.f32 0.0078125, %v3048_v54 }
0x116d   :  { %v3087_v13 = vadd.f32 1e-05, %v3079_v23  ;;  %v3076_v7 = vsub.f32 %v3068_v2, %v3072_v1  ;;  %v3073_v40 = vmul.f32 %v3065_v16, %v3065_v16  ;;  %v3085_v4 = vsub.f32 %v6991_v19, %v3065_v16 }
0x116e   :  { %v3050_v22 = vpop.xlane.xlu1 %3049  ;;  %v3060_v61 = vpop.xlane.xlu0 %3059 }
0x116f   :  { %v3080_v37 = vmax.f32 %v3076_v7, 0.0  ;;  %v3066_v30 = vmul.f32 0.0078125, %v3050_v22  ;;  %v3069_v21 = vmul.f32 0.0078125, %v3060_v61  ;;  %5754 = vrsqrt.f32 %v3087_v13 }
0x1171   :  { %v3088_v3 = vadd.f32 1e-05, %v3080_v37  ;;  %v3077_v47 = vsub.f32 %v3069_v21, %v3073_v40  ;;  %v3074_v34 = vmul.f32 %v3066_v30, %v3066_v30  ;;  %v3086_v26 = vsub.f32 %v6997_v38, %v3066_v30 }
0x1172   :  { %v3062_v6 = vpop.xlane.xlu1 %3061 }
0x1173   :  { %5756 = vrsqrt.f32 %v3088_v3  ;;  %v3081_v35 = vmax.f32 %v3077_v47, 0.0  ;;  %v3070_v28 = vmul.f32 0.0078125, %v3062_v6 }
0x1175   :  { %v3089_v58 = vadd.f32 1e-05, %v3081_v35  ;;  %v3078_v29 = vsub.f32 %v3070_v28, %v3074_v34 }
0x1177   :  { %5758 = vrsqrt.f32 %v3089_v58  ;;  %v3082_v36 = vmax.f32 %v3078_v29, 0.0 }
0x1179   :  { %v3090_v32 = vadd.f32 1e-05, %v3082_v36 }
0x117b   :  { %5760 = vrsqrt.f32 %v3090_v32 }
0x117c   :  { %v5755_v50 = vpop.eup %5754 }
0x117d   :  { %v3095_v5 = vmul.f32 %v5755_v50, %v3083_v60 }
0x117f   :  { %v3103_v39 = vmul.f32 %v3102_v56, %v3095_v5  ;;  %v7054_v5 = vld [vmem:[%s7579_s1 + $0x8] sm:$0xff] }
0x1180   :  { %v5757_v48 = vpop.eup %5756 }
0x1181   :  { %v3096_v8 = vmul.f32 %v5757_v48, %v3084_v27  ;;  %v7025_v42 = vadd.f32 %v3110_v17, %v3103_v39  ;;  %v5554_v39 = vld [vmem:[%s7582_s4 + $0x254] ss:$8 sps:$4 sm:$0xff]  }
0x1183   :  { %v3104_v12 = vmul.f32 %v3102_v56, %v3096_v8  ;;  %v3115_v11 = vmax.f32 %v7025_v42, 0.0  ;;  %v7062_v8 = vld [vmem:[%s7579_s1 + $0x10] sm:$0xff] }
0x1184   :  { %v5759_v10 = vpop.eup %5758 }
0x1185   :  { %v3097_v9 = vmul.f32 %v5759_v10, %v3085_v4  ;;  %v7023_v43 = vadd.f32 %v3110_v17, %v3104_v12  ;;  %v3119_v31 = vadd.f32 1e-07, %v3115_v11  ;;  %v7070_v12 = vld [vmem:[%s7579_s1 + $0x18] sm:$0xff]  ;;  %v5551_v4 = vld [vmem:[%s7582_s4 + $0x264] ss:$8 sps:$4 sm:$0xff]  }
0x1186   :  { %v5549_v10 = vld [vmem:[%s7582_s4 + $0x260] ss:$8 sps:$4 sm:$0xff]   ;;  %3381 = vmatprep.subr.bf16.mxu0 %v5551_v4 }
0x1187   :  { %v3105_v46 = vmul.f32 %v3102_v56, %v3097_v9  ;;  %v3116_v57 = vmax.f32 %v7023_v43, 0.0  ;;  %3382 = vmatpush1.bf16.msra.mxu0 %v5549_v10  ;;  %v5552_v9 = vld [vmem:[%s7582_s4 + $0x250] ss:$8 sps:$4 sm:$0xff]  }
0x1188   :  { %v5761_v44 = vpop.eup %5760  ;;  %3383 = vmatprep.subr.bf16.mxu0 %v5554_v39 }
0x1189   :  { %v3098_v15 = vmul.f32 %v5761_v44, %v3086_v26  ;;  %v7027_v14 = vadd.f32 %v3110_v17, %v3105_v46  ;;  %v3120_v51 = vadd.f32 1e-07, %v3116_v57  ;;  %v5555_v26 = vld [vmem:[%s7582_s4 + $0x240] ss:$8 sps:$4 sm:$0xff]   ;;  %v5560_v46 = vld [vmem:[%s7582_s4 + $0x234] ss:$8 sps:$4 sm:$0xff]  }
0x118a   :  { %v5558_v44 = vld [vmem:[%s7582_s4 + $0x230] ss:$8 sps:$4 sm:$0xff]  }
0x118b   :  { %v3106_v59 = vmul.f32 %v3102_v56, %v3098_v15  ;;  %v3117_v41 = vmax.f32 %v7027_v14, 0.0  ;;  %v3123_v23 = vmax.f32 %v3119_v31, %v3120_v51  ;;  %v7046_v56 = vld [vmem:[%s7579_s1] sm:$0xff]  ;;  %3384 = vmatpush1.bf16.msra.mxu0 %v5552_v9 }
0x118c   :  { %v5563_v15 = vld [vmem:[%s7582_s4 + $0x224] ss:$8 sps:$4 sm:$0xff]  }
0x118d   :  { %v7030_v33 = vadd.f32 %v3110_v17, %v3106_v59  ;;  %v3121_v54 = vadd.f32 1e-07, %v3117_v41  ;;  %v5557_v17 = vld [vmem:[%s7582_s4 + $0x244] ss:$8 sps:$4 sm:$0xff]   ;;  %v5561_v59 = vld [vmem:[%s7582_s4 + $0x220] ss:$8 sps:$4 sm:$0xff]  }
0x118e   :  { %3385 = vmatprep.subr.bf16.mxu0 %v5557_v17 }
0x118f   :  { %v3118_v24 = vmax.f32 %v7030_v33, 0.0  ;;  %3386 = vmatpush1.bf16.msra.mxu0 %v5555_v26 }
0x1190   :  { %3387 = vmatprep.subr.bf16.mxu0 %v5560_v46 }
0x1191   :  { %v3122_v1 = vadd.f32 1e-07, %v3118_v24 }
0x1193   :  { %v3124_v2 = vmax.f32 %v3121_v54, %v3122_v1  ;;  %3388 = vmatpush1.bf16.msra.mxu0 %v5558_v44 }
0x1194   :  { %3389 = vmatprep.subr.bf16.mxu0 %v5563_v15 }
0x1195   :  { %v3125_v16 = vmax.f32 %v3123_v23, %v3124_v2 }
0x1197   :  { %v3126_v13 = vrot.slane %v3125_v16, 4  ;;  %3390 = vmatpush1.bf16.msra.mxu0 %v5561_v59 }
0x1199   :  { %v3127_v7 = vmax.f32 %v3125_v16, %v3126_v13 }
0x119b   :  { %v3128_v22 = vrot.slane %v3127_v7, 2 }
0x119d   :  { %v3129_v61 = vmax.f32 %v3127_v7, %v3128_v22 }
0x119f   :  { %v3130_v37 = vrot.slane %v3129_v61, 1 }
0x11a1   :  { %v3131_v40 = vmax.f32 %v3129_v61, %v3130_v37 }
0x11a3   :  { %v3135_v30 = vsub.f32 %v3122_v1, %v3131_v40  ;;  %v3134_v21 = vsub.f32 %v3121_v54, %v3131_v40  ;;  %v3133_v3 = vsub.f32 %v3120_v51, %v3131_v40  ;;  %v3132_v47 = vsub.f32 %v3119_v31, %v3131_v40 }
0x11a5   :  { %v3142_v6 = vmul.f32 1.442695, %v3135_v30  ;;  %v3140_v34 = vmul.f32 1.442695, %v3134_v21  ;;  %v3138_v35 = vmul.f32 1.442695, %v3133_v3 }
0x11a6   :  { %v3136_v28 = vmul.f32 1.442695, %v3132_v47 }
0x11a7   :  { %5762 = vpow2.f32 %v3142_v6 }
0x11a8   :  { %5764 = vpow2.f32 %v3140_v34 }
0x11a9   :  { %5766 = vpow2.f32 %v3138_v35 }
0x11aa   :  { %5768 = vpow2.f32 %v3136_v28 }
0x11b4   :  { %v5763_v58 = vpop.eup %5762 }
0x11b5   :  { %v5765_v29 = vpop.eup %5764  ;;  %v3147_v36 = vmul.f32 %v5763_v58, %v3122_v1  ;;  %v5567_v1 = vld [vmem:[%s7582_s4 + $0x200] ss:$8 sps:$4 sm:$0xff]  }
0x11b6   :  { %v5767_v32 = vpop.eup %5766  ;;  %v3146_v50 = vmul.f32 %v5765_v29, %v3121_v54  ;;  %v5569_v54 = vld [vmem:[%s7582_s4 + $0x204] ss:$8 sps:$4 sm:$0xff]  }
0x11b7   :  { %3172 = vmatprep.subr.mxu1 %v3147_v36  ;;  %v5769_v60 = vpop.eup %5768  ;;  %v3145_v27 = vmul.f32 %v5767_v32, %v3120_v51  ;;  %v5566_v51 = vld [vmem:[%s7582_s4 + $0x214] ss:$8 sps:$4 sm:$0xff]  }
0x11b8   :  { %3173 = vmatpush1.msra.mxu1 %v5763_v58  ;;  %v3144_v48 = vmul.f32 %v5769_v60, %v3119_v31  ;;  %v5564_v31 = vld [vmem:[%s7582_s4 + $0x210] ss:$8 sps:$4 sm:$0xff]   ;;  %3391 = vmatprep.subr.bf16.mxu0 %v5566_v51 }
0x11b9   :  { %3174 = vmatprep.subr.mxu1 %v3146_v50  ;;  %3392 = vmatpush1.bf16.msra.mxu0 %v5564_v31 }
0x11ba   :  { %3175 = vmatpush1.msra.mxu1 %v5765_v29  ;;  %3393 = vmatprep.subr.bf16.mxu0 %v5569_v54 }
0x11bb   :  { %3176 = vmatprep.subr.mxu1 %v3145_v27 }
0x11bc   :  { %3177 = vmatpush1.msra.mxu1 %v5767_v32 }
0x11bd   :  { %3178 = vmatprep.subr.mxu1 %v3144_v48  ;;  %3394 = vmatpush1.bf16.msra.mxu0 %v5567_v1 }
0x11be   :  { %3179 = vmatpush1.msra.mxu1 %v5769_v60 }
0x11bf   :  { %4961 = vmatmul.mubr.msk.f32.vlgmr.msra.gmra.mxu1 %vm261_vm1, %v7046_v56 }
0x11c0   :  { %3218 = vmatprep.mubr.f32.mxu1 %v5848_v18 }
0x11c3   :  { %4962 = vmatmul.mubr.msk.f32.gmra.mxu1 %vm261_vm1, %v7054_v5 }
0x11c4   :  { %3224 = vmatprep.mubr.f32.mxu1 %v5848_v18 }
0x11c7   :  { %4963 = vmatmul.mubr.msk.f32.gmra.mxu1 %vm261_vm1, %v7062_v8 }
0x11c8   :  { %3230 = vmatprep.mubr.f32.mxu1 %v5848_v18 }
0x11cb   :  { %4964 = vmatmul.mubr.msk.f32.gmra.mxu1 %vm261_vm1, %v7070_v12 }
0x127f   :  { %v3214_v23 = vpop.f32.mrf.mxu1 }
0x1280   :  { %v3237_v2 = vmax.f32 %v3214_v23, 1e-12  ;;  %vm3245_vm3 = vcmp.gt.f32.partialorder %v3214_v23, 0.0 }
0x1281   :  { %v3216_v16 = vpop.f32.mrf.mxu1 }
0x1282   :  { %5770 = vrcp.f32 %v3237_v2 }
0x1283   :  { %v3220_v13 = vpop.f32.mrf.mxu1 }
0x1284   :  { %v3238_v7 = vmax.f32 %v3220_v13, 1e-12  ;;  %vm3246_vm4 = vcmp.gt.f32.partialorder %v3220_v13, 0.0 }
0x1285   :  { %v3222_v22 = vpop.f32.mrf.mxu1 }
0x1286   :  { %5772 = vrcp.f32 %v3238_v7 }
0x1287   :  { %v3226_v61 = vpop.f32.mrf.mxu1 }
0x1288   :  { %v3239_v37 = vmax.f32 %v3226_v61, 1e-12  ;;  %vm3247_vm5 = vcmp.gt.f32.partialorder %v3226_v61, 0.0 }
0x1289   :  { %v3228_v40 = vpop.f32.mrf.mxu1 }
0x128a   :  { %5774 = vrcp.f32 %v3239_v37 }
0x128b   :  { %v3232_v30 = vpop.f32.mrf.mxu1 }
0x128c   :  { %v3240_v21 = vmax.f32 %v3232_v30, 1e-12  ;;  %vm3248_vm6 = vcmp.gt.f32.partialorder %v3232_v30, 0.0 }
0x128d   :  { %v3234_v27 = vpop.f32.mrf.mxu1 }
0x128e   :  { %5776 = vrcp.f32 %v3240_v21 }
0x128f   :  { %v5771_v3 = vpop.eup %5770 }
0x1290   :  { %v3249_v47 = vmul.f32 %v5771_v3, %v3216_v16 }
0x1292   :  { %v3253_v34 = vsel %vm3245_vm3, %v3249_v47, 0.0 }
0x1293   :  { %v5773_v6 = vpop.eup %5772  ;;  %v3257_v29 = vadd.f32 %v3253_v34, %v3115_v11 }
0x1294   :  { %v3250_v35 = vmul.f32 %v5773_v6, %v3222_v22 }
0x1296   :  { %v3254_v28 = vsel %vm3246_vm4, %v3250_v35, 0.0 }
0x1297   :  { %v5775_v58 = vpop.eup %5774  ;;  %v3258_v36 = vadd.f32 %v3254_v28, %v3116_v57  ;;  %v7129_v57 = vld [vmem:[%s7585_s7 + $0x20] sm:$0x77] }
0x1298   :  { %v3251_v32 = vmul.f32 %v5775_v58, %v3228_v40  ;;  %v3284_v11 = vrot.slane %v7129_v57, %v5960_v55  ;;  %v3288_v9 = vrot.slane %v7129_v57, %v6082_v20 }
0x1299   :  { %v3261_v50 = vpack.c.bf16 %v3258_v36, %v3257_v29 }
0x129a   :  { %v3255_v48 = vsel %vm3247_vm5, %v3251_v32, 0.0  ;;  %v3294_v14 = vrot.slane %v3284_v11, %v5960_v55  ;;  %v3298_v33 = vrot.slane %v3288_v9, %v5960_v55  ;;  %v5570_v32 = vld [vmem:[%s7583_s5 + $0x278] sm:$0xff]   ;;  %v5580_v11 = vld [vmem:[%s7583_s5 + $0x250] sm:$0xff]  }
0x129b   :  { %v5777_v60 = vpop.eup %5776  ;;  %3412 = vmatmul.mubr.bf16.vlgmr.msra.gmra.mxu0 %v3261_v50  ;;  %v3259_v39 = vadd.f32 %v3255_v48, %v3117_v41  ;;  %v5571_v50 = vld [vmem:[%s7583_s5 + $0x238] sm:$0xff]   ;;  %5250 = vmatprep.subr.bf16.mxu1 %v5570_v32  ;;  %v5574_v48 = vld [vmem:[%s7583_s5 + $0x268] sm:$0xff]   ;;  %v5581_v9 = vld [vmem:[%s7583_s5 + $0x210] sm:$0xff]  }
0x129c   :  { %v3252_v4 = vmul.f32 %v5777_v60, %v3234_v27  ;;  %3421 = vmatprep.mubr.bf16.mxu0 %v5849_v25  ;;  %5251 = vmatpush3.bf16.msra.mxu1 %v5571_v50  ;;  %v5572_v60 = vld [vmem:[%s7583_s5 + $0x270] sm:$0xff]  }
0x129d   :  { %v5573_v27 = vld [vmem:[%s7583_s5 + $0x230] sm:$0xff]   ;;  %5252 = vmatprep.subr.bf16.mxu1 %v5572_v60 }
0x129e   :  { %v3256_v10 = vsel %vm3248_vm6, %v3252_v4, 0.0  ;;  %v5575_v4 = vld [vmem:[%s7583_s5 + $0x228] sm:$0xff]  }
0x129f   :  { %v3260_v42 = vadd.f32 %v3256_v10, %v3118_v24  ;;  %v5576_v10 = vld [vmem:[%s7583_s5 + $0x260] sm:$0xff]  }
0x12a0   :  { %5253 = vmatpush3.bf16.msra.mxu1 %v5573_v27 }
0x12a1   :  { %v3262_v43 = vpack.c.bf16 %v3260_v42, %v3259_v39  ;;  %5254 = vmatprep.subr.bf16.mxu1 %v5574_v48  ;;  %v5577_v39 = vld [vmem:[%s7583_s5 + $0x220] sm:$0xff]   ;;  %v5578_v42 = vld [vmem:[%s7583_s5 + $0x258] sm:$0xff]  }
0x12a3   :  { %3422 = vmatmul.mubr.bf16.gmra.mxu0 %v3262_v43  ;;  %v5579_v43 = vld [vmem:[%s7583_s5 + $0x218] sm:$0xff]  }
0x12a4   :  { %3931 = vmatprep.mubr.f32.mxu0 %v5848_v18  ;;  %5255 = vmatpush3.bf16.msra.mxu1 %v5575_v4 }
0x12a5   :  { %5256 = vmatprep.subr.bf16.mxu1 %v5576_v10 }
0x12a8   :  { %5257 = vmatpush3.bf16.msra.mxu1 %v5577_v39 }
0x12a9   :  { %5258 = vmatprep.subr.bf16.mxu1 %v5578_v42  ;;  %v3515_v42 = vrot.slane %v7129_v57, %v6184_v45 }
0x12ac   :  { %5259 = vmatpush3.bf16.msra.mxu1 %v5579_v43 }
0x12ad   :  { %5260 = vmatprep.subr.bf16.mxu1 %v5580_v11  ;;  %v3511_v11 = vrot.slane %v7129_v57, %v5972_v62 }
0x12b0   :  { %5261 = vmatpush3.bf16.msra.mxu1 %v5581_v9 }
0x135b   :  { %v3413_v41 = vpop.f32.mrf.mxu0 }
0x135c   :  { %v7137_v17 = vadd.f32 %v3413_v41, %v3294_v14  ;;  %v5584_v41 = vld [vmem:[%s7583_s5 + $0x240] sm:$0xff]  }
0x135d   :  { %v3415_v24 = vpop.f32.mrf.mxu0 }
0x135e   :  { %v7139_v26 = vadd.f32 %v3415_v24, %v3298_v33  ;;  %v3444_v54 = vmul.f32 %v7137_v17, %v7137_v17  ;;  %v5585_v24 = vld [vmem:[%s7583_s5 + $0x200] sm:$0xff]  }
0x135f   :  { %v3417_v46 = vpop.f32.mrf.mxu0 }
0x1360   :  { %v3432_v44 = vadd.f32 %v7139_v26, %v7137_v17  ;;  %v3445_v15 = vmul.f32 %v7139_v26, %v7139_v26  ;;  %v7145_v51 = vadd.f32 %v3417_v46, %v3294_v14 }
0x1361   :  { %v3419_v59 = vpop.f32.mrf.mxu0 }
0x1362   :  { %v7147_v31 = vadd.f32 %v3419_v59, %v3298_v33  ;;  %3433 = vadd.xlane.f32.xlu0 %v3432_v44  ;;  %v3452_v2 = vadd.f32 %v3445_v15, %v3444_v54  ;;  %v3446_v61 = vmul.f32 %v7145_v51, %v7145_v51 }
0x1363   :  { %v3423_v1 = vpop.f32.mrf.mxu0 }
0x1364   :  { %v3435_v23 = vadd.f32 %v7147_v31, %v7145_v51  ;;  %v3447_v16 = vmul.f32 %v7147_v31, %v7147_v31  ;;  %v7155_v7 = vadd.f32 %v3423_v1, %v3294_v14 }
0x1365   :  { %v3425_v13 = vpop.f32.mrf.mxu0 }
0x1366   :  { %v7157_v22 = vadd.f32 %v3425_v13, %v3298_v33  ;;  %3436 = vadd.xlane.f32.xlu1 %v3435_v23  ;;  %3453 = vadd.xlane.f32.xlu0 %v3452_v2  ;;  %v3455_v40 = vadd.f32 %v3447_v16, %v3446_v61  ;;  %v3448_v34 = vmul.f32 %v7155_v7, %v7155_v7 }
0x1367   :  { %v3427_v37 = vpop.f32.mrf.mxu0 }
0x1368   :  { %v3438_v30 = vadd.f32 %v7157_v22, %v7155_v7  ;;  %v3449_v21 = vmul.f32 %v7157_v22, %v7157_v22  ;;  %v7165_v47 = vadd.f32 %v3427_v37, %v3294_v14  ;;  %v5582_v14 = vld [vmem:[%s7583_s5 + $0x248] sm:$0xff]  }
0x1369   :  { %v3429_v3 = vpop.f32.mrf.mxu0  ;;  %5262 = vmatprep.subr.bf16.mxu1 %v5582_v14  ;;  %v3525_v14 = vrot.slane %v3515_v42, %v5972_v62 }
0x136a   :  { %v7167_v6 = vadd.f32 %v3429_v3, %v3298_v33  ;;  %3456 = vadd.xlane.f32.xlu1 %v3455_v40  ;;  %3439 = vadd.xlane.f32.xlu0 %v3438_v30  ;;  %v3458_v28 = vadd.f32 %v3449_v21, %v3448_v34  ;;  %v3450_v29 = vmul.f32 %v7165_v47, %v7165_v47  ;;  %v5583_v33 = vld [vmem:[%s7583_s5 + $0x208] sm:$0xff]  }
0x136b   :  { %5263 = vmatpush3.bf16.msra.mxu1 %v5583_v33  ;;  %v3541_v33 = vrot.slane %v7129_v57, %v6192_v53 }
0x136c   :  { %v3441_v35 = vadd.f32 %v7167_v6, %v7165_v47  ;;  %v3451_v58 = vmul.f32 %v7167_v6, %v7167_v6  ;;  %5264 = vmatprep.subr.bf16.mxu1 %v5584_v41  ;;  %v3537_v41 = vrot.slane %v7129_v57, %v6189_v52 }
0x136e   :  { %3442 = vadd.xlane.f32.xlu1 %v3441_v35  ;;  %3459 = vadd.xlane.f32.xlu0 %v3458_v28  ;;  %v3461_v36 = vadd.f32 %v3451_v58, %v3450_v29 }
0x136f   :  { %5265 = vmatpush3.bf16.msra.mxu1 %v5585_v24 }
0x1372   :  { %3462 = vadd.xlane.f32.xlu1 %v3461_v36 }
0x13eb   :  { %v3434_v46 = vpop.xlane.xlu0 %3433 }
0x13ec   :  { %v3464_v44 = vmul.f32 0.00390625, %v3434_v46 }
0x13ee   :  { %v3472_v1 = vmul.f32 %v3464_v44, %v3464_v44  ;;  %v3484_v24 = vsub.f32 %v7137_v17, %v3464_v44  ;;  %v3485_v46 = vsub.f32 %v7139_v26, %v3464_v44 }
0x13ef   :  { %v3437_v15 = vpop.xlane.xlu1 %3436  ;;  %v3454_v59 = vpop.xlane.xlu0 %3453 }
0x13f0   :  { %v3465_v54 = vmul.f32 0.00390625, %v3437_v15  ;;  %v3468_v23 = vmul.f32 0.00390625, %v3454_v59  ;;  %v3521_v15 = vrot.slane %v3511_v11, %v5972_v62 }
0x13f2   :  { %v3476_v2 = vsub.f32 %v3468_v23, %v3472_v1  ;;  %v3473_v37 = vmul.f32 %v3465_v54, %v3465_v54 }
0x13f3   :  { %v3457_v16 = vpop.xlane.xlu1 %3456  ;;  %v3440_v13 = vpop.xlane.xlu0 %3439 }
0x13f4   :  { %v3480_v61 = vmax.f32 %v3476_v2, 0.0  ;;  %v3469_v40 = vmul.f32 0.00390625, %v3457_v16  ;;  %v3466_v30 = vmul.f32 0.00390625, %v3440_v13  ;;  %v3551_v2 = vrot.slane %v3541_v33, %v6189_v52 }
0x13f5   :  { %v3547_v16 = vrot.slane %v3537_v41, %v6189_v52  ;;  %v3486_v13 = vsub.f32 %v7145_v51, %v3465_v54 }
0x13f6   :  { %v3492_v21 = vadd.f32 1e-05, %v3480_v61  ;;  %v3477_v3 = vsub.f32 %v3469_v40, %v3473_v37  ;;  %v3474_v35 = vmul.f32 %v3466_v30, %v3466_v30  ;;  %v3487_v61 = vsub.f32 %v7147_v31, %v3465_v54 }
0x13f7   :  { %v3443_v34 = vpop.xlane.xlu1 %3442  ;;  %v3460_v28 = vpop.xlane.xlu0 %3459  ;;  %v3488_v26 = vsub.f32 %v7155_v7, %v3466_v30 }
0x13f8   :  { %5778 = vrsqrt.f32 %v3492_v21  ;;  %v3481_v58 = vmax.f32 %v3477_v3, 0.0  ;;  %v3467_v29 = vmul.f32 0.00390625, %v3443_v34  ;;  %v3470_v36 = vmul.f32 0.00390625, %v3460_v28 }
0x13f9   :  { %v3489_v3 = vsub.f32 %v7157_v22, %v3466_v30 }
0x13fa   :  { %v3493_v32 = vadd.f32 1e-05, %v3481_v58  ;;  %v3478_v50 = vsub.f32 %v3470_v36, %v3474_v35  ;;  %v3475_v48 = vmul.f32 %v3467_v29, %v3467_v29  ;;  %v3491_v31 = vsub.f32 %v7167_v6, %v3467_v29 }
0x13fb   :  { %v3463_v60 = vpop.xlane.xlu1 %3462  ;;  %v3490_v7 = vsub.f32 %v7165_v47, %v3467_v29  ;;  %v3608_v29 = vrot.slane %v7013_v63, %v6189_v52 }
0x13fc   :  { %5780 = vrsqrt.f32 %v3493_v32  ;;  %v3482_v27 = vmax.f32 %v3478_v50, 0.0  ;;  %v3471_v4 = vmul.f32 0.00390625, %v3463_v60 }
0x13fe   :  { %v3494_v10 = vadd.f32 1e-05, %v3482_v27  ;;  %v3479_v39 = vsub.f32 %v3471_v4, %v3475_v48 }
0x1400   :  { %5782 = vrsqrt.f32 %v3494_v10  ;;  %v3483_v43 = vmax.f32 %v3479_v39, 0.0 }
0x1402   :  { %v3495_v9 = vadd.f32 1e-05, %v3483_v43 }
0x1404   :  { %5784 = vrsqrt.f32 %v3495_v9 }
0x1405   :  { %v5779_v59 = vpop.eup %5778 }
0x1406   :  { %v3500_v1 = vmul.f32 %v5779_v59, %v3484_v24  ;;  %v3501_v23 = vmul.f32 %v5779_v59, %v3485_v46 }
0x1408   :  { %v3527_v37 = vmul.f32 %v3525_v14, %v3501_v23  ;;  %v3526_v57 = vmul.f32 %v3521_v15, %v3500_v1 }
0x1409   :  { %v5781_v40 = vpop.eup %5780 }
0x140a   :  { %v3502_v17 = vmul.f32 %v5781_v40, %v3486_v13  ;;  %v3503_v21 = vmul.f32 %v5781_v40, %v3487_v61  ;;  %v3553_v44 = vadd.f32 %v3551_v2, %v3527_v37  ;;  %v3552_v28 = vadd.f32 %v3547_v16, %v3526_v57 }
0x140c   :  { %v3529_v34 = vmul.f32 %v3525_v14, %v3503_v21  ;;  %v3528_v35 = vmul.f32 %v3521_v15, %v3502_v17  ;;  %v3561_v54 = vmax.f32 %v3553_v44, 0.0  ;;  %v3560_v27 = vmax.f32 %v3552_v28, 0.0 }
0x140d   :  { %v5783_v58 = vpop.eup %5782 }
0x140e   :  { %v3555_v36 = vadd.f32 %v3551_v2, %v3529_v34  ;;  %v3554_v32 = vadd.f32 %v3547_v16, %v3528_v35  ;;  %v3505_v50 = vmul.f32 %v5783_v58, %v3489_v3  ;;  %v3504_v51 = vmul.f32 %v5783_v58, %v3488_v26 }
0x1410   :  { %v3563_v60 = vmax.f32 %v3555_v36, 0.0  ;;  %v3562_v48 = vmax.f32 %v3554_v32, 0.0  ;;  %v3531_v4 = vmul.f32 %v3525_v14, %v3505_v50  ;;  %v3530_v39 = vmul.f32 %v3521_v15, %v3504_v51  ;;  %v5586_v51 = vld [vmem:[%s7582_s4 + $0x2f0] ss:$8 sps:$4 sm:$0xff]  }
0x1411   :  { %v5785_v10 = vpop.eup %5784 }
0x1412   :  { %v3569_v22 = vpack.c.bf16 %v3563_v60, %v3561_v54  ;;  %v3568_v30 = vpack.c.bf16 %v3562_v48, %v3560_v27  ;;  %v3507_v42 = vmul.f32 %v5785_v10, %v3491_v31  ;;  %v3506_v43 = vmul.f32 %v5785_v10, %v3490_v7  ;;  %v5588_v31 = vld [vmem:[%s7582_s4 + $0x2f4] ss:$8 sps:$4 sm:$0xff]  }
0x1413   :  { %v3557_v9 = vadd.f32 %v3551_v2, %v3531_v4  ;;  %v3556_v41 = vadd.f32 %v3547_v16, %v3530_v39  ;;  %4098 = vmatprep.subr.bf16.mxu1 %v5588_v31 }
0x1414   :  { %3737 = vmatprep.mubr.bf16.mxu1 %v3569_v22  ;;  %v3533_v11 = vmul.f32 %v3525_v14, %v3507_v42  ;;  %v3532_v33 = vmul.f32 %v3521_v15, %v3506_v43 }
0x1415   :  { %3738 = vmatmul.mubr.bf16.vlgmr.msra.gmra.mxu1 %v3568_v30  ;;  %v3565_v46 = vmax.f32 %v3557_v9, 0.0  ;;  %v3564_v1 = vmax.f32 %v3556_v41, 0.0 }
0x1416   :  { %v3559_v6 = vadd.f32 %v3551_v2, %v3533_v11  ;;  %v3558_v24 = vadd.f32 %v3547_v16, %v3532_v33  ;;  %4099 = vmatpush1.bf16.msra.mxu1 %v5586_v51 }
0x1418   :  { %v3567_v59 = vmax.f32 %v3559_v6, 0.0  ;;  %v3566_v23 = vmax.f32 %v3558_v24, 0.0 }
0x141a   :  { %v3571_v13 = vpack.c.bf16 %v3567_v59, %v3565_v46  ;;  %v3570_v61 = vpack.c.bf16 %v3566_v23, %v3564_v1 }
0x141c   :  { %3745 = vmatprep.mubr.bf16.mxu1 %v3571_v13 }
0x141d   :  { %3746 = vmatmul.mubr.bf16.gmra.mxu1 %v3570_v61 }
0x141e   :  { %4130 = vmatprep.mubr.bf16.mxu1 %v5849_v25 }
0x14d5   :  { %v5266_v47 = vpop.f32.mrf.mxu1 }
0x14d7   :  { %v5267_v14 = vpop.f32.mrf.mxu1 }
0x14d8   :  { %v5268_v37 = vadd.f32 %v5267_v14, %v5266_v47 }
0x14d9   :  { %v5269_v15 = vpop.f32.mrf.mxu1 }
0x14da   :  { %v3740_v57 = vadd.f32 %v5268_v37, %v3608_v29 }
0x14db   :  { %v5270_v2 = vpop.f32.mrf.mxu1 }
0x14dc   :  { %v7249_v16 = vadd.f32 %v3740_v57, %v6981_v0  ;;  %v5271_v40 = vadd.f32 %v5270_v2, %v5269_v15 }
0x14dd   :  { %v5272_v17 = vpop.f32.mrf.mxu1 }
0x14de   :  { %v3743_v21 = vadd.f32 %v5271_v40, %v3608_v29  ;;  %3762 = vadd.xlane.f32.xlu0 %v7249_v16  ;;  %v3770_v63 = vmul.f32 %v7249_v16, %v7249_v16 }
0x14df   :  { %v5273_v26 = vpop.f32.mrf.mxu1 }
0x14e0   :  { %v7253_v44 = vadd.f32 %v3743_v21, %v6985_v49  ;;  %v5274_v3 = vadd.f32 %v5273_v26, %v5272_v17  ;;  %v7281_v17 = vld [vmem:[%s7584_s6 + $0x14] sm:$0x7] }
0x14e1   :  { %v5275_v34 = vpop.f32.mrf.mxu1 }
0x14e2   :  { %v3748_v35 = vadd.f32 %v5274_v3, %v3608_v29  ;;  %3764 = vadd.xlane.f32.xlu1 %v7253_v44  ;;  %3774 = vadd.xlane.f32.xlu0 %v3770_v63  ;;  %v3771_v36 = vmul.f32 %v7253_v44, %v7253_v44  ;;  %v3821_v63 = vrot.slane %v7281_v17, %v5960_v55 }
0x14e3   :  { %v5276_v0 = vpop.f32.mrf.mxu1 }
0x14e4   :  { %v7259_v28 = vadd.f32 %v3748_v35, %v6991_v19  ;;  %v5277_v58 = vadd.f32 %v5276_v0, %v5275_v34 }
0x14e6   :  { %v3751_v32 = vadd.f32 %v5277_v58, %v3608_v29  ;;  %3776 = vadd.xlane.f32.xlu1 %v3771_v36  ;;  %3766 = vadd.xlane.f32.xlu0 %v7259_v28  ;;  %v3772_v50 = vmul.f32 %v7259_v28, %v7259_v28 }
0x14e8   :  { %v7265_v49 = vadd.f32 %v3751_v32, %v6997_v38 }
0x14ea   :  { %3768 = vadd.xlane.f32.xlu1 %v7265_v49  ;;  %3778 = vadd.xlane.f32.xlu0 %v3772_v50  ;;  %v3773_v19 = vmul.f32 %v7265_v49, %v7265_v49 }
0x14ee   :  { %3780 = vadd.xlane.f32.xlu1 %v3773_v19  ;;  %v3829_v19 = vrot.slane %v7281_v17, %v5972_v62 }
0x1567   :  { %v3763_v38 = vpop.xlane.xlu0 %3762 }
0x1568   :  { %v3782_v54 = vmul.f32 0.0078125, %v3763_v38 }
0x156a   :  { %v3790_v48 = vmul.f32 %v3782_v54, %v3782_v54  ;;  %v3802_v21 = vsub.f32 %v7249_v16, %v3782_v54 }
0x156b   :  { %v3765_v60 = vpop.xlane.xlu1 %3764  ;;  %v3775_v27 = vpop.xlane.xlu0 %3774 }
0x156c   :  { %v3783_v4 = vmul.f32 0.0078125, %v3765_v60  ;;  %v3786_v10 = vmul.f32 0.0078125, %v3775_v27 }
0x156e   :  { %v3794_v7 = vsub.f32 %v3786_v10, %v3790_v48  ;;  %v3791_v30 = vmul.f32 %v3783_v4, %v3783_v4  ;;  %v3803_v26 = vsub.f32 %v7253_v44, %v3783_v4 }
0x156f   :  { %v3777_v39 = vpop.xlane.xlu1 %3776  ;;  %v3767_v22 = vpop.xlane.xlu0 %3766 }
0x1570   :  { %v3798_v42 = vmax.f32 %v3794_v7, 0.0  ;;  %v3787_v43 = vmul.f32 0.0078125, %v3777_v39  ;;  %v3784_v11 = vmul.f32 0.0078125, %v3767_v22 }
0x1572   :  { %v3806_v9 = vadd.f32 1e-05, %v3798_v42  ;;  %v3795_v33 = vsub.f32 %v3787_v43, %v3791_v30  ;;  %v3792_v46 = vmul.f32 %v3784_v11, %v3784_v11  ;;  %v3804_v58 = vsub.f32 %v7259_v28, %v3784_v11 }
0x1573   :  { %v3769_v41 = vpop.xlane.xlu1 %3768  ;;  %v3779_v6 = vpop.xlane.xlu0 %3778 }
0x1574   :  { %v3799_v24 = vmax.f32 %v3795_v33, 0.0  ;;  %v3785_v59 = vmul.f32 0.0078125, %v3769_v41  ;;  %v3788_v1 = vmul.f32 0.0078125, %v3779_v6  ;;  %5786 = vrsqrt.f32 %v3806_v9 }
0x1576   :  { %v3807_v23 = vadd.f32 1e-05, %v3799_v24  ;;  %v3796_v13 = vsub.f32 %v3788_v1, %v3792_v46  ;;  %v3793_v47 = vmul.f32 %v3785_v59, %v3785_v59  ;;  %v3805_v51 = vsub.f32 %v7265_v49, %v3785_v59 }
0x1577   :  { %v3781_v61 = vpop.xlane.xlu1 %3780 }
0x1578   :  { %5788 = vrsqrt.f32 %v3807_v23  ;;  %v3800_v29 = vmax.f32 %v3796_v13, 0.0  ;;  %v3789_v14 = vmul.f32 0.0078125, %v3781_v61 }
0x157a   :  { %v3808_v37 = vadd.f32 1e-05, %v3800_v29  ;;  %v3797_v15 = vsub.f32 %v3789_v14, %v3793_v47 }
0x157c   :  { %5790 = vrsqrt.f32 %v3808_v37  ;;  %v3801_v57 = vmax.f32 %v3797_v15, 0.0 }
0x157e   :  { %v3809_v2 = vadd.f32 1e-05, %v3801_v57 }
0x1580   :  { %5792 = vrsqrt.f32 %v3809_v2 }
0x1581   :  { %v5787_v40 = vpop.eup %5786 }
0x1582   :  { %v3814_v34 = vmul.f32 %v5787_v40, %v3802_v21 }
0x1584   :  { %v3822_v32 = vmul.f32 %v3821_v63, %v3814_v34 }
0x1585   :  { %v5789_v3 = vpop.eup %5788 }
0x1586   :  { %v3815_v35 = vmul.f32 %v5789_v3, %v3803_v26  ;;  %v7293_v27 = vadd.f32 %v3829_v19, %v3822_v32  ;;  %v5600_v32 = vld [vmem:[%s7582_s4 + $0x2b4] ss:$8 sps:$4 sm:$0xff]  }
0x1588   :  { %v3823_v0 = vmul.f32 %v3821_v63, %v3815_v35  ;;  %v3834_v39 = vmax.f32 %v7293_v27, 0.0 }
0x1589   :  { %v5791_v36 = vpop.eup %5790 }
0x158a   :  { %v3816_v50 = vmul.f32 %v5791_v36, %v3804_v58  ;;  %v7291_v38 = vadd.f32 %v3829_v19, %v3823_v0  ;;  %v3838_v43 = vadd.f32 1e-07, %v3834_v39  ;;  %v5591_v58 = vld [vmem:[%s7582_s4 + $0x2e4] ss:$8 sps:$4 sm:$0xff]   ;;  %v5595_v36 = vld [vmem:[%s7582_s4 + $0x2c0] ss:$8 sps:$4 sm:$0xff]  }
0x158b   :  { %4100 = vmatprep.subr.bf16.mxu1 %v5591_v58 }
0x158c   :  { %v3824_v31 = vmul.f32 %v3821_v63, %v3816_v50  ;;  %v3835_v10 = vmax.f32 %v7291_v38, 0.0  ;;  %v5598_v50 = vld [vmem:[%s7582_s4 + $0x2b0] ss:$8 sps:$4 sm:$0xff]  }
0x158d   :  { %v5793_v54 = vpop.eup %5792 }
0x158e   :  { %v3817_v60 = vmul.f32 %v5793_v54, %v3805_v51  ;;  %v7295_v48 = vadd.f32 %v3829_v19, %v3824_v31  ;;  %v3839_v42 = vadd.f32 1e-07, %v3835_v10  ;;  %v5601_v51 = vld [vmem:[%s7582_s4 + $0x2a0] ss:$8 sps:$4 sm:$0xff]   ;;  %v5606_v31 = vld [vmem:[%s7582_s4 + $0x294] ss:$8 sps:$4 sm:$0xff]  }
0x158f   :  { %v5604_v54 = vld [vmem:[%s7582_s4 + $0x290] ss:$8 sps:$4 sm:$0xff]  }
0x1590   :  { %v3825_v4 = vmul.f32 %v3821_v63, %v3817_v60  ;;  %v3836_v22 = vmax.f32 %v7295_v48, 0.0  ;;  %v3842_v33 = vmax.f32 %v3838_v43, %v3839_v42  ;;  %v5609_v60 = vld [vmem:[%s7582_s4 + $0x284] ss:$8 sps:$4 sm:$0xff]  }
0x1592   :  { %v7298_v7 = vadd.f32 %v3829_v19, %v3825_v4  ;;  %v3840_v11 = vadd.f32 1e-07, %v3836_v22  ;;  %v5603_v19 = vld [vmem:[%s7582_s4 + $0x2a4] ss:$8 sps:$4 sm:$0xff]   ;;  %v5607_v4 = vld [vmem:[%s7582_s4 + $0x280] ss:$8 sps:$4 sm:$0xff]  }
0x1594   :  { %v3837_v30 = vmax.f32 %v7298_v7, 0.0 }
0x1596   :  { %v3841_v9 = vadd.f32 1e-07, %v3837_v30 }
0x1598   :  { %v3843_v41 = vmax.f32 %v3840_v11, %v3841_v9 }
0x159a   :  { %v3844_v6 = vmax.f32 %v3842_v33, %v3843_v41 }
0x159c   :  { %v3845_v24 = vrot.slane %v3844_v6, 4 }
0x159e   :  { %v3846_v46 = vmax.f32 %v3844_v6, %v3845_v24 }
0x15a0   :  { %v3847_v59 = vrot.slane %v3846_v46, 2 }
0x15a2   :  { %v3848_v1 = vmax.f32 %v3846_v46, %v3847_v59 }
0x15a4   :  { %v3849_v23 = vrot.slane %v3848_v1, 1 }
0x15a6   :  { %v3850_v13 = vmax.f32 %v3848_v1, %v3849_v23 }
0x15a8   :  { %v3854_v61 = vsub.f32 %v3841_v9, %v3850_v13  ;;  %v3853_v47 = vsub.f32 %v3840_v11, %v3850_v13  ;;  %v3852_v29 = vsub.f32 %v3839_v42, %v3850_v13  ;;  %v3851_v14 = vsub.f32 %v3838_v43, %v3850_v13 }
0x15aa   :  { %v3861_v37 = vmul.f32 1.442695, %v3854_v61  ;;  %v3859_v15 = vmul.f32 1.442695, %v3853_v47  ;;  %v3857_v57 = vmul.f32 1.442695, %v3852_v29 }
0x15ab   :  { %v3855_v2 = vmul.f32 1.442695, %v3851_v14 }
0x15ac   :  { %5794 = vpow2.f32 %v3861_v37 }
0x15ad   :  { %5796 = vpow2.f32 %v3859_v15 }
0x15ae   :  { %5798 = vpow2.f32 %v3857_v57 }
0x15af   :  { %5800 = vpow2.f32 %v3855_v2 }
0x15b9   :  { %v5795_v40 = vpop.eup %5794 }
0x15ba   :  { %v5797_v21 = vpop.eup %5796  ;;  %v3866_v26 = vmul.f32 %v5795_v40, %v3841_v9 }
0x15bb   :  { %v5799_v3 = vpop.eup %5798  ;;  %v3865_v63 = vmul.f32 %v5797_v21, %v3840_v11 }
0x15bc   :  { %3891 = vmatprep.subr.mxu0 %v3866_v26  ;;  %v5801_v34 = vpop.eup %5800  ;;  %v3864_v35 = vmul.f32 %v5799_v3, %v3839_v42 }
0x15bd   :  { %3892 = vmatpush1.msra.mxu0 %v5795_v40  ;;  %v3863_v0 = vmul.f32 %v5801_v34, %v3838_v43 }
0x15be   :  { %3893 = vmatprep.subr.mxu0 %v3865_v63 }
0x15bf   :  { %3894 = vmatpush1.msra.mxu0 %v5797_v21 }
0x15c0   :  { %3895 = vmatprep.subr.mxu0 %v3864_v35 }
0x15c1   :  { %3896 = vmatpush1.msra.mxu0 %v5799_v3 }
0x15c2   :  { %3897 = vmatprep.subr.mxu0 %v3863_v0 }
0x15c3   :  { %3898 = vmatpush1.msra.mxu0 %v5801_v34 }
0x15c4   :  { %5047 = vmatmul.mubr.msk.f32.vlgmr.msra.gmra.mxu0 %vm261_vm1, %v7046_v56  ;;  %v5589_v56 = vld [vmem:[%s7582_s4 + $0x2e0] ss:$8 sps:$4 sm:$0xff]  }
0x15c5   :  { %3937 = vmatprep.mubr.f32.mxu0 %v5848_v18  ;;  %4101 = vmatpush1.bf16.msra.mxu1 %v5589_v56 }
0x15c8   :  { %5048 = vmatmul.mubr.msk.f32.gmra.mxu0 %vm261_vm1, %v7054_v5  ;;  %v5594_v5 = vld [vmem:[%s7582_s4 + $0x2d4] ss:$8 sps:$4 sm:$0xff]  }
0x15c9   :  { %3943 = vmatprep.mubr.f32.mxu0 %v5848_v18  ;;  %4102 = vmatprep.subr.bf16.mxu1 %v5594_v5 }
0x15cc   :  { %5049 = vmatmul.mubr.msk.f32.gmra.mxu0 %vm261_vm1, %v7062_v8  ;;  %v5592_v8 = vld [vmem:[%s7582_s4 + $0x2d0] ss:$8 sps:$4 sm:$0xff]  }
0x15cd   :  { %3949 = vmatprep.mubr.f32.mxu0 %v5848_v18  ;;  %4103 = vmatpush1.bf16.msra.mxu1 %v5592_v8 }
0x15d0   :  { %5050 = vmatmul.mubr.msk.f32.gmra.mxu0 %vm261_vm1, %v7070_v12  ;;  %v5597_v12 = vld [vmem:[%s7582_s4 + $0x2c4] ss:$8 sps:$4 sm:$0xff]  }
0x15d1   :  { %4104 = vmatprep.subr.bf16.mxu1 %v5597_v12 }
0x15d2   :  { %4105 = vmatpush1.bf16.msra.mxu1 %v5595_v36 }
0x15d3   :  { %4106 = vmatprep.subr.bf16.mxu1 %v5600_v32 }
0x15d6   :  { %4107 = vmatpush1.bf16.msra.mxu1 %v5598_v50 }
0x15d7   :  { %4108 = vmatprep.subr.bf16.mxu1 %v5603_v19 }
0x15da   :  { %4109 = vmatpush1.bf16.msra.mxu1 %v5601_v51 }
0x15db   :  { %4110 = vmatprep.subr.bf16.mxu1 %v5606_v31 }
0x15de   :  { %4111 = vmatpush1.bf16.msra.mxu1 %v5604_v54 }
0x15df   :  { %4112 = vmatprep.subr.bf16.mxu1 %v5609_v60 }
0x15e2   :  { %4113 = vmatpush1.bf16.msra.mxu1 %v5607_v4 }
0x15e3   :  { %5336 = vmatprep.subr.mxu1 %v5848_v18 }
0x1684   :  { %v3933_v42 = vpop.f32.mrf.mxu0 }
0x1685   :  { %v3956_v43 = vmax.f32 %v3933_v42, 1e-12  ;;  %vm3964_vm7 = vcmp.gt.f32.partialorder %v3933_v42, 0.0 }
0x1686   :  { %v3935_v11 = vpop.f32.mrf.mxu0 }
0x1687   :  { %5802 = vrcp.f32 %v3956_v43 }
0x1688   :  { %v3939_v9 = vpop.f32.mrf.mxu0 }
0x1689   :  { %v3957_v33 = vmax.f32 %v3939_v9, 1e-12  ;;  %vm3965_vm8 = vcmp.gt.f32.partialorder %v3939_v9, 0.0 }
0x168a   :  { %v3941_v41 = vpop.f32.mrf.mxu0 }
0x168b   :  { %5804 = vrcp.f32 %v3957_v33 }
0x168c   :  { %v3945_v6 = vpop.f32.mrf.mxu0 }
0x168d   :  { %v3958_v24 = vmax.f32 %v3945_v6, 1e-12  ;;  %vm3966_vm9 = vcmp.gt.f32.partialorder %v3945_v6, 0.0 }
0x168e   :  { %v3947_v46 = vpop.f32.mrf.mxu0 }
0x168f   :  { %5806 = vrcp.f32 %v3958_v24 }
0x1690   :  { %v3951_v59 = vpop.f32.mrf.mxu0 }
0x1691   :  { %v3959_v1 = vmax.f32 %v3951_v59, 1e-12  ;;  %vm3967_vm10 = vcmp.gt.f32.partialorder %v3951_v59, 0.0 }
0x1692   :  { %v3953_v26 = vpop.f32.mrf.mxu0 }
0x1693   :  { %5808 = vrcp.f32 %v3959_v1 }
0x1694   :  { %v5803_v23 = vpop.eup %5802 }
0x1695   :  { %v3968_v13 = vmul.f32 %v5803_v23, %v3935_v11 }
0x1697   :  { %v3972_v47 = vsel %vm3964_vm7, %v3968_v13, 0.0 }
0x1698   :  { %v5805_v61 = vpop.eup %5804  ;;  %v3976_v15 = vadd.f32 %v3972_v47, %v3834_v39  ;;  %v5611_v47 = vld [vmem:[%s7583_s5 + $0x2b8] sm:$0xff]  }
0x1699   :  { %v3969_v29 = vmul.f32 %v5805_v61, %v3941_v41  ;;  %v5610_v61 = vld [vmem:[%s7583_s5 + $0x2f8] sm:$0xff]  }
0x169a   :  { %5278 = vmatprep.subr.bf16.mxu0 %v5610_v61 }
0x169b   :  { %v3973_v14 = vsel %vm3965_vm8, %v3969_v29, 0.0  ;;  %5279 = vmatpush3.bf16.msra.mxu0 %v5611_v47  ;;  %v5612_v29 = vld [vmem:[%s7583_s5 + $0x2f0] sm:$0xff]  }
0x169c   :  { %v5807_v37 = vpop.eup %5806  ;;  %v3977_v57 = vadd.f32 %v3973_v14, %v3835_v10  ;;  %v7377_v10 = vld [vmem:[%s7585_s7 + $0x28] sm:$0x77]  ;;  %v5613_v14 = vld [vmem:[%s7583_s5 + $0x2b0] sm:$0xff]   ;;  %5280 = vmatprep.subr.bf16.mxu0 %v5612_v29 }
0x169d   :  { %v3970_v2 = vmul.f32 %v5807_v37, %v3947_v46  ;;  %v4003_v39 = vrot.slane %v7377_v10, %v5960_v55  ;;  %v5614_v37 = vld [vmem:[%s7583_s5 + $0x2e8] sm:$0xff]   ;;  %v4234_v47 = vrot.slane %v7377_v10, %v6184_v45 }
0x169e   :  { %v3980_v40 = vpack.c.bf16 %v3977_v57, %v3976_v15  ;;  %v5615_v15 = vld [vmem:[%s7583_s5 + $0x2a8] sm:$0xff]   ;;  %v5616_v57 = vld [vmem:[%s7583_s5 + $0x2e0] sm:$0xff]  }
0x169f   :  { %v3974_v3 = vsel %vm3966_vm9, %v3970_v2, 0.0  ;;  %v4013_v0 = vrot.slane %v4003_v39, %v5960_v55  ;;  %5281 = vmatpush3.bf16.msra.mxu0 %v5613_v14  ;;  %v5617_v2 = vld [vmem:[%s7583_s5 + $0x2a0] sm:$0xff]   ;;  %v4230_v14 = vrot.slane %v7377_v10, %v5972_v62 }
0x16a0   :  { %v5809_v21 = vpop.eup %5808  ;;  %4131 = vmatmul.mubr.bf16.vlgmr.msra.gmra.mxu1 %v3980_v40  ;;  %v3978_v35 = vadd.f32 %v3974_v3, %v3836_v22  ;;  %5282 = vmatprep.subr.bf16.mxu0 %v5614_v37  ;;  %v5618_v40 = vld [vmem:[%s7583_s5 + $0x2d8] sm:$0xff]   ;;  %v5621_v3 = vld [vmem:[%s7583_s5 + $0x290] sm:$0xff]  }
0x16a1   :  { %v3971_v63 = vmul.f32 %v5809_v21, %v3953_v26  ;;  %4140 = vmatprep.mubr.bf16.mxu1 %v5849_v25  ;;  %v4007_v25 = vrot.slane %v7377_v10, %v6082_v20  ;;  %v5619_v21 = vld [vmem:[%s7583_s5 + $0x298] sm:$0xff]   ;;  %v5620_v26 = vld [vmem:[%s7583_s5 + $0x2d0] sm:$0xff]   ;;  %v4240_v45 = vrot.slane %v4230_v14, %v5972_v62 }
0x16a3   :  { %v3975_v34 = vsel %vm3967_vm10, %v3971_v63, 0.0  ;;  %v4017_v48 = vrot.slane %v4007_v25, %v5960_v55  ;;  %5283 = vmatpush3.bf16.msra.mxu0 %v5615_v15  ;;  %v5622_v63 = vld [vmem:[%s7583_s5 + $0x2c8] sm:$0xff]   ;;  %v4244_v15 = vrot.slane %v4234_v47, %v5972_v62 }
0x16a4   :  { %v3979_v27 = vadd.f32 %v3975_v34, %v3837_v30  ;;  %5284 = vmatprep.subr.bf16.mxu0 %v5616_v57  ;;  %v5623_v34 = vld [vmem:[%s7583_s5 + $0x288] sm:$0xff]   ;;  %v4260_v57 = vrot.slane %v7377_v10, %v6192_v53 }
0x16a6   :  { %v3981_v38 = vpack.c.bf16 %v3979_v27, %v3978_v35  ;;  %v5624_v35 = vld [vmem:[%s7583_s5 + $0x2c0] sm:$0xff]  }
0x16a7   :  { %5285 = vmatpush3.bf16.msra.mxu0 %v5617_v2  ;;  %v5625_v27 = vld [vmem:[%s7583_s5 + $0x280] sm:$0xff]   ;;  %v4256_v2 = vrot.slane %v7377_v10, %v6189_v52 }
0x16a8   :  { %4141 = vmatmul.mubr.bf16.gmra.mxu1 %v3981_v38  ;;  %5286 = vmatprep.subr.bf16.mxu0 %v5618_v40 }
0x16a9   :  { %5344 = vmatprep.mubr.msk.f32.mxu1 %vm5850_vm11, %v5848_v18 }
0x16ab   :  { %5287 = vmatpush3.bf16.msra.mxu0 %v5619_v21 }
0x16ac   :  { %5288 = vmatprep.subr.bf16.mxu0 %v5620_v26 }
0x16af   :  { %5289 = vmatpush3.bf16.msra.mxu0 %v5621_v3 }
0x16b0   :  { %5290 = vmatprep.subr.bf16.mxu0 %v5622_v63 }
0x16b3   :  { %5291 = vmatpush3.bf16.msra.mxu0 %v5623_v34  ;;  %v4270_v34 = vrot.slane %v4260_v57, %v6189_v52  ;;  %v4562_v57 = vld [vmem:[%s7587_s9 + $0x58] sm:$0xff] }
0x16b4   :  { %5292 = vmatprep.subr.bf16.mxu0 %v5624_v35  ;;  %v4266_v35 = vrot.slane %v4256_v2, %v6189_v52  ;;  %v4561_v2 = vld [vmem:[%s7587_s9 + $0x50] sm:$0xff] }
0x16b7   :  { %5293 = vmatpush3.bf16.msra.mxu0 %v5625_v27 }
0x16b8   :  { %5347 = vmatprep.subr.mxu0 %v5848_v18 }
0x1760   :  { %v4132_v22 = vpop.f32.mrf.mxu1 }
0x1761   :  { %v7385_v30 = vadd.f32 %v4132_v22, %v4013_v0 }
0x1762   :  { %v4134_v7 = vpop.f32.mrf.mxu1 }
0x1763   :  { %v7387_v58 = vadd.f32 %v4134_v7, %v4017_v48  ;;  %v4163_v55 = vmul.f32 %v7385_v30, %v7385_v30 }
0x1764   :  { %v4136_v56 = vpop.f32.mrf.mxu1 }
0x1765   :  { %v4151_v5 = vadd.f32 %v7387_v58, %v7385_v30  ;;  %v4164_v8 = vmul.f32 %v7387_v58, %v7387_v58  ;;  %v7393_v36 = vadd.f32 %v4136_v56, %v4013_v0 }
0x1766   :  { %v4138_v12 = vpop.f32.mrf.mxu1 }
0x1767   :  { %v7395_v20 = vadd.f32 %v4138_v12, %v4017_v48  ;;  %4152 = vadd.xlane.f32.xlu0 %v4151_v5  ;;  %v4171_v19 = vadd.f32 %v4164_v8, %v4163_v55  ;;  %v4165_v4 = vmul.f32 %v7393_v36, %v7393_v36 }
0x1768   :  { %v4142_v32 = vpop.f32.mrf.mxu1 }
0x1769   :  { %v4154_v50 = vadd.f32 %v7395_v20, %v7393_v36  ;;  %v4166_v51 = vmul.f32 %v7395_v20, %v7395_v20  ;;  %v7403_v54 = vadd.f32 %v4142_v32, %v4013_v0 }
0x176a   :  { %v4144_v31 = vpop.f32.mrf.mxu1 }
0x176b   :  { %v7405_v60 = vadd.f32 %v4144_v31, %v4017_v48  ;;  %4155 = vadd.xlane.f32.xlu1 %v4154_v50  ;;  %4172 = vadd.xlane.f32.xlu0 %v4171_v19  ;;  %v4174_v43 = vadd.f32 %v4166_v51, %v4165_v4  ;;  %v4167_v24 = vmul.f32 %v7403_v54, %v7403_v54 }
0x176c   :  { %v4146_v42 = vpop.f32.mrf.mxu1 }
0x176d   :  { %v4157_v11 = vadd.f32 %v7405_v60, %v7403_v54  ;;  %v4168_v9 = vmul.f32 %v7405_v60, %v7405_v60  ;;  %v7413_v41 = vadd.f32 %v4146_v42, %v4013_v0 }
0x176e   :  { %v4148_v33 = vpop.f32.mrf.mxu1 }
0x176f   :  { %v7415_v6 = vadd.f32 %v4148_v33, %v4017_v48  ;;  %4175 = vadd.xlane.f32.xlu1 %v4174_v43  ;;  %4158 = vadd.xlane.f32.xlu0 %v4157_v11  ;;  %v4177_v59 = vadd.f32 %v4168_v9, %v4167_v24  ;;  %v4169_v23 = vmul.f32 %v7413_v41, %v7413_v41 }
0x1771   :  { %v4160_v46 = vadd.f32 %v7415_v6, %v7413_v41  ;;  %v4170_v1 = vmul.f32 %v7415_v6, %v7415_v6 }
0x1773   :  { %4161 = vadd.xlane.f32.xlu1 %v4160_v46  ;;  %4178 = vadd.xlane.f32.xlu0 %v4177_v59  ;;  %v4180_v13 = vadd.f32 %v4170_v1, %v4169_v23 }
0x1777   :  { %4181 = vadd.xlane.f32.xlu1 %v4180_v13 }
0x17f0   :  { %v4153_v38 = vpop.xlane.xlu0 %4152 }
0x17f1   :  { %v4183_v39 = vmul.f32 0.00390625, %v4153_v38 }
0x17f3   :  { %v4191_v22 = vmul.f32 %v4183_v39, %v4183_v39  ;;  %v4203_v40 = vsub.f32 %v7385_v30, %v4183_v39  ;;  %v4204_v21 = vsub.f32 %v7387_v58, %v4183_v39 }
0x17f4   :  { %v4156_v25 = vpop.xlane.xlu1 %4155  ;;  %v4173_v0 = vpop.xlane.xlu0 %4172 }
0x17f5   :  { %v4184_v48 = vmul.f32 0.00390625, %v4156_v25  ;;  %v4187_v7 = vmul.f32 0.00390625, %v4173_v0 }
0x17f7   :  { %v4195_v56 = vsub.f32 %v4187_v7, %v4191_v22  ;;  %v4192_v55 = vmul.f32 %v4184_v48, %v4184_v48  ;;  %v4205_v27 = vsub.f32 %v7393_v36, %v4184_v48  ;;  %v4206_v53 = vsub.f32 %v7395_v20, %v4184_v48 }
0x17f8   :  { %v4176_v5 = vpop.xlane.xlu1 %4175  ;;  %v4159_v8 = vpop.xlane.xlu0 %4158 }
0x17f9   :  { %v4199_v12 = vmax.f32 %v4195_v56, 0.0  ;;  %v4188_v32 = vmul.f32 0.00390625, %v4176_v5  ;;  %v4185_v50 = vmul.f32 0.00390625, %v4159_v8 }
0x17fb   :  { %v4211_v19 = vadd.f32 1e-05, %v4199_v12  ;;  %v4196_v51 = vsub.f32 %v4188_v32, %v4192_v55  ;;  %v4193_v4 = vmul.f32 %v4185_v50, %v4185_v50  ;;  %v4207_v58 = vsub.f32 %v7403_v54, %v4185_v50 }
0x17fc   :  { %v4162_v31 = vpop.xlane.xlu1 %4161  ;;  %v4179_v42 = vpop.xlane.xlu0 %4178  ;;  %v4208_v62 = vsub.f32 %v7405_v60, %v4185_v50 }
0x17fd   :  { %5810 = vrsqrt.f32 %v4211_v19  ;;  %v4200_v43 = vmax.f32 %v4196_v51, 0.0  ;;  %v4186_v11 = vmul.f32 0.00390625, %v4162_v31  ;;  %v4189_v9 = vmul.f32 0.00390625, %v4179_v42 }
0x17ff   :  { %v4212_v33 = vadd.f32 1e-05, %v4200_v43  ;;  %v4197_v24 = vsub.f32 %v4189_v9, %v4193_v4  ;;  %v4194_v1 = vmul.f32 %v4186_v11, %v4186_v11  ;;  %v4210_v20 = vsub.f32 %v7415_v6, %v4186_v11 }
0x1800   :  { %v4182_v46 = vpop.xlane.xlu1 %4181  ;;  %v4209_v54 = vsub.f32 %v7413_v41, %v4186_v11  ;;  %v4566_v41 = vld [vmem:[%s7587_s9 + $0x78] sm:$0xff]  ;;  %v4565_v11 = vld [vmem:[%s7587_s9 + $0x70] sm:$0xff] }
0x1801   :  { %5812 = vrsqrt.f32 %v4212_v33  ;;  %v4201_v59 = vmax.f32 %v4197_v24, 0.0  ;;  %v4190_v23 = vmul.f32 0.00390625, %v4182_v46 }
0x1803   :  { %v4213_v13 = vadd.f32 1e-05, %v4201_v59  ;;  %v4198_v61 = vsub.f32 %v4190_v23, %v4194_v1 }
0x1805   :  { %5814 = vrsqrt.f32 %v4213_v13  ;;  %v4202_v29 = vmax.f32 %v4198_v61, 0.0 }
0x1807   :  { %v4214_v37 = vadd.f32 1e-05, %v4202_v29 }
0x1809   :  { %5816 = vrsqrt.f32 %v4214_v37  ;;  %v4564_v37 = vld [vmem:[%s7587_s9 + $0x68] sm:$0xff] }
0x180a   :  { %v5811_v26 = vpop.eup %5810 }
0x180b   :  { %v4219_v3 = vmul.f32 %v5811_v26, %v4203_v40  ;;  %v4220_v63 = vmul.f32 %v5811_v26, %v4204_v21  ;;  %v4560_v40 = vld [vmem:[%s7587_s9 + $0x48] sm:$0xff]  ;;  %v4559_v21 = vld [vmem:[%s7587_s9 + $0x40] sm:$0xff]  ;;  %v4557_v26 = vld [vmem:[%s7587_s9 + $0x30] sm:$0xff] }
0x180d   :  { %v4246_v38 = vmul.f32 %v4244_v15, %v4220_v63  ;;  %v4245_v10 = vmul.f32 %v4240_v45, %v4219_v3  ;;  %v4556_v3 = vld [vmem:[%s7587_s9 + $0x28] sm:$0xff]  ;;  %v4555_v63 = vld [vmem:[%s7587_s9 + $0x20] sm:$0xff] }
0x180e   :  { %v5813_v25 = vpop.eup %5812 }
0x180f   :  { %v4221_v30 = vmul.f32 %v5813_v25, %v4205_v27  ;;  %v4222_v0 = vmul.f32 %v5813_v25, %v4206_v53  ;;  %v4272_v39 = vadd.f32 %v4270_v34, %v4246_v38  ;;  %v4271_v56 = vadd.f32 %v4266_v35, %v4245_v10  ;;  %v4552_v27 = vld [vmem:[%s7587_s9 + $0x8] sm:$0xff] }
0x1811   :  { %v4248_v22 = vmul.f32 %v4244_v15, %v4222_v0  ;;  %v4247_v7 = vmul.f32 %v4240_v45, %v4221_v30  ;;  %v4280_v48 = vmax.f32 %v4272_v39, 0.0  ;;  %v4279_v19 = vmax.f32 %v4271_v56, 0.0 }
0x1812   :  { %v5815_v5 = vpop.eup %5814 }
0x1813   :  { %v4274_v8 = vadd.f32 %v4270_v34, %v4248_v22  ;;  %v4273_v12 = vadd.f32 %v4266_v35, %v4247_v7  ;;  %v4224_v55 = vmul.f32 %v5815_v5, %v4208_v62  ;;  %v4223_v36 = vmul.f32 %v5815_v5, %v4207_v58 }
0x1814   :  { %v4327_v22 = vrot.slane %v7281_v17, %v6189_v52  ;;  %v4477_v17 = vld [vmem:[%s7586_s8] sm:$0x3]  ;;  %s5826_s8 = scalar_lea.vmem %s4653_s17, 32 }
0x1815   :  { %v4282_v32 = vmax.f32 %v4274_v8, 0.0  ;;  %v4281_v51 = vmax.f32 %v4273_v12, 0.0  ;;  %v4250_v31 = vmul.f32 %v4244_v15, %v4224_v55  ;;  %v4249_v42 = vmul.f32 %v4240_v45, %v4223_v36  ;;  %p5827_p0 = scmp.ne.s32.totalorder %s4653_s17, %s5826_s8  ;;  %p5832_p2 = scmp.lt.s32.totalorder %s5826_s8, %s5826_s8 }
0x1816   :  { %v5817_v4 = vpop.eup %5816 }
0x1817   :  { %v4288_v60 = vpack.c.bf16 %v4282_v32, %v4280_v48  ;;  %v4287_v50 = vpack.c.bf16 %v4281_v51, %v4279_v19  ;;  %v4226_v43 = vmul.f32 %v5817_v4, %v4210_v20  ;;  %v4225_v9 = vmul.f32 %v5817_v4, %v4209_v54  ;;  %p5833_p3 = por %p5832_p2, %p5831_p1 }
0x1818   :  { %v4276_v24 = vadd.f32 %v4270_v34, %v4250_v31  ;;  %v4275_v59 = vadd.f32 %v4266_v35, %v4249_v42 }
0x1819   :  { %4456 = vmatprep.mubr.bf16.mxu0 %v4288_v60  ;;  %v4252_v33 = vmul.f32 %v4244_v15, %v4226_v43  ;;  %v4251_v46 = vmul.f32 %v4240_v45, %v4225_v9  ;;  %v4563_v15 = vld [vmem:[%s7587_s9 + $0x60] sm:$0xff]  ;;  %v4558_v45 = vld [vmem:[%s7587_s9 + $0x38] sm:$0xff]  ;;  %p5834_p4 = pnand %p5833_p3, %p5827_p0 }
0x181a   :  { %4457 = vmatmul.mubr.bf16.vlgmr.msra.gmra.mxu0 %v4287_v50  ;;  %v4284_v23 = vmax.f32 %v4276_v24, 0.0  ;;  %v4283_v61 = vmax.f32 %v4275_v59, 0.0 }
0x181b   :  { %v4278_v6 = vadd.f32 %v4270_v34, %v4252_v33  ;;  %v4277_v1 = vadd.f32 %v4266_v35, %v4251_v46  ;;  %5348 = vmatpush3.msra.mxu0 %v4566_v41  ;;  %v4554_v34 = vld [vmem:[%s7587_s9 + $0x18] sm:$0xff]  ;;  %v4553_v35 = vld [vmem:[%s7587_s9 + $0x10] sm:$0xff] }
0x181c   :  { %5349 = vmatprep.subr.mxu0 %v5848_v18 }
0x181d   :  { %v4286_v13 = vmax.f32 %v4278_v6, 0.0  ;;  %v4285_v47 = vmax.f32 %v4277_v1, 0.0  ;;  %5350 = vmatpush3.msra.mxu0 %v4565_v11 }
0x181e   :  { %5351 = vmatprep.subr.mxu0 %v5848_v18 }
0x181f   :  { %v4290_v29 = vpack.c.bf16 %v4286_v13, %v4284_v23  ;;  %v4289_v14 = vpack.c.bf16 %v4285_v47, %v4283_v61  ;;  %5352 = vmatpush3.msra.mxu0 %v4564_v37 }
0x1820   :  { %5353 = vmatprep.subr.mxu0 %v5848_v18 }
0x1821   :  { %4464 = vmatprep.mubr.bf16.mxu0 %v4290_v29  ;;  %5354 = vmatpush3.msra.mxu0 %v4563_v15 }
0x1822   :  { %4465 = vmatmul.mubr.bf16.gmra.mxu0 %v4289_v14  ;;  %5355 = vmatprep.subr.mxu0 %v5848_v18 }
0x1823   :  { %5379 = vmatprep.mubr.msk.f32.mxu0 %vm5850_vm11, %v5848_v18  ;;  %5356 = vmatpush3.msra.mxu0 %v4562_v57 }
0x1824   :  { %5357 = vmatprep.subr.mxu0 %v5848_v18 }
0x1825   :  { %5358 = vmatpush3.msra.mxu0 %v4561_v2 }
0x1826   :  { %5359 = vmatprep.subr.mxu0 %v5848_v18 }
0x1827   :  { %5360 = vmatpush3.msra.mxu0 %v4560_v40 }
0x1828   :  { %5361 = vmatprep.subr.mxu0 %v5848_v18 }
0x1829   :  { %5362 = vmatpush3.msra.mxu0 %v4559_v21 }
0x182a   :  { %5363 = vmatprep.subr.mxu0 %v5848_v18 }
0x182b   :  { %5364 = vmatpush3.msra.mxu0 %v4558_v45 }
0x182c   :  { %5365 = vmatprep.subr.mxu0 %v5848_v18 }
0x182d   :  { %5366 = vmatpush3.msra.mxu0 %v4557_v26 }
0x182e   :  { %5367 = vmatprep.subr.mxu0 %v5848_v18 }
0x182f   :  { %5368 = vmatpush3.msra.mxu0 %v4556_v3 }
0x1830   :  { %5369 = vmatprep.subr.mxu0 %v5848_v18 }
0x1831   :  { %5370 = vmatpush3.msra.mxu0 %v4555_v63 }
0x1832   :  { %5371 = vmatprep.subr.mxu0 %v5848_v18 }
0x1833   :  { %5372 = vmatpush3.msra.mxu0 %v4554_v34 }
0x1834   :  { %5373 = vmatprep.subr.mxu0 %v5848_v18 }
0x1835   :  { %5374 = vmatpush3.msra.mxu0 %v4553_v35 }
0x1836   :  { %5375 = vmatprep.subr.mxu0 %v5848_v18 }
0x1837   :  { %5376 = vmatpush3.msra.mxu0 %v4552_v27 }
0x1838   :  { %5377 = vmatprep.subr.mxu0 %v5848_v18 }
0x18da   :  { %v5294_v53 = vpop.f32.mrf.mxu0 }
0x18dc   :  { %v5295_v38 = vpop.f32.mrf.mxu0 }
0x18dd   :  { %v5296_v5 = vadd.f32 %v5295_v38, %v5294_v53 }
0x18de   :  { %v5297_v10 = vpop.f32.mrf.mxu0 }
0x18df   :  { %v4459_v20 = vadd.f32 %v5296_v5, %v4327_v22 }
0x18e0   :  { %v5298_v25 = vpop.f32.mrf.mxu0 }
0x18e1   :  { %v5299_v7 = vadd.f32 %v5298_v25, %v5297_v10  ;;  %v4473_v52 = vadd.f32 %v4459_v20, %v7249_v16  ;;  %v5132_v16 = vld [vmem:[%s7588_s10] ss:$0 sm:$0xff] }
0x18e2   :  { %v5300_v30 = vpop.f32.mrf.mxu0 }
0x18e3   :  { %v4462_v55 = vadd.f32 %v5299_v7, %v4327_v22 }
0x18e4   :  { %v5301_v0 = vpop.f32.mrf.mxu0 }
0x18e5   :  { %v5302_v39 = vadd.f32 %v5301_v0, %v5300_v30  ;;  %v4474_v32 = vadd.f32 %v4462_v55, %v7253_v44 }
0x18e6   :  { %v5303_v58 = vpop.f32.mrf.mxu0 }
0x18e7   :  { %v4467_v8 = vadd.f32 %v5302_v39, %v4327_v22 }
0x18e8   :  { %v5304_v62 = vpop.f32.mrf.mxu0 }
0x18e9   :  { %v5305_v56 = vadd.f32 %v5304_v62, %v5303_v58  ;;  %v4475_v48 = vadd.f32 %v4467_v8, %v7259_v28  ;;  %v4551_v28 = vld [vmem:[%s7587_s9] sm:$0xff] }
0x18ea   :  { %5378 = vmatpush3.msra.mxu0 %v4551_v28 }
0x18eb   :  { %v4470_v12 = vadd.f32 %v5305_v56, %v4327_v22 }
0x18ed   :  { %v4476_v36 = vadd.f32 %v4470_v12, %v7265_v49 }
0x18ef   :  { %5337 = vmatpush3.msra.mxu1 %v4476_v36 }
0x18f0   :  { %5338 = vmatprep.subr.mxu1 %v5848_v18 }
0x18f1   :  { %5339 = vmatpush3.msra.mxu1 %v4475_v48 }
0x18f2   :  { %5340 = vmatprep.subr.mxu1 %v5848_v18 }
0x18f3   :  { %5341 = vmatpush3.msra.mxu1 %v4474_v32 }
0x18f4   :  { %5342 = vmatprep.subr.mxu1 %v5848_v18 }
0x18f5   :  { %5343 = vmatpush3.msra.mxu1 %v4473_v52 }
0x18f6   :  { %5345 = vmatmul.mubr.msk.f32.vlgmr.msra.gmra.mxu1 %vm261_vm1, %v4477_v17 }
0x19b6   :  { %v4547_v44 = vpop.f32.mrf.mxu1 }
0x19b7   :  { %5380 = vmatmul.mubr.f32.vlgmr.msra.gmra.mxu0 %v4547_v44 }
0x19b8   :  { %v5346_v49 = vpop.f32.mrf.mxu1 }
0x1a77   :  { %v4640_v19 = vpop.f32.mrf.mxu0 }
0x1a78   :  { %v4641_v18 = vadd.f32 %v5132_v16, %v4640_v19 }
0x1a79   :  { %v5381_v51 = vpop.f32.mrf.mxu0 }
0x1a7a   :  { %4645 = vst.msk [vmem:[#allocation2] sm:$0x3] %vm4644_vm12, %v4641_v18 }
0x1a7b   :  { %5837 = shalt.err (!%p5834_p4)
}
0x1a7c   :  { %4655 = dma.vmem_to_hbm [thread:$0]  %s4653_s17, 32, %s7589_s11, [#allocation3]  }
0x1a7d   :  { %5846 = dma.done.wait [#allocation3], 32  }
0x1a7e   :  { %5847 = vsyncadd [#allocation3], 4294967264 }
0x1a7f   :  { %4659 = vsyncpa [#allocation3], 1 }

</bundles_post_ra>
